<compile_context>
chip_gen: v5e
topology: v5e:2x2
jax: 0.10.0
libtpu: 0.0.40
codegen_flags: <defaults>
</compile_context>

<pallas_src>
import functools

import numpy as np
import jax
import jax.numpy as jnp
from jax.experimental import pallas as pl
from jax.experimental.pallas import tpu as pltpu


_PARALLEL = pltpu.CompilerParams(dimension_semantics=("parallel",))


# ----------------------------------------------------------------------------
# Pallas kernels
# ----------------------------------------------------------------------------
def _conv_rowband_kernel(x_ref, t_ref, b_ref, o_ref, *, H, WCout):
    """3x3 'same' conv + bias + ReLU for one image as 3 row-band MXU matmuls.

    x_ref: (1, H+2, (W+2)*Cin) f32   padded input rows, channels innermost
    t_ref: (3, (W+2)*Cin, W*Cout) bf16  banded weight, one slab per kh
    b_ref: (1, W*Cout) f32
    o_ref: (1, H, W*Cout) f32        lane-dense output (lane index = w*Cout + co)
    """
    acc = jnp.zeros((H, WCout), jnp.float32)
    for kh in range(3):
        lhs = x_ref[0, kh:kh + H, :].astype(jnp.bfloat16)      # (H, (W+2)*Cin)
        acc = acc + jnp.dot(lhs, t_ref[kh], preferred_element_type=jnp.float32)
    o_ref[0] = jnp.maximum(acc + b_ref[...], 0.0)


def _maxpool2x2_kernel(x_ref, o_ref, *, C):
    """2x2 / stride-2 max pool for one image, static slices only.

    x_ref: (1, Hh, 2, Wh, 2*C) f32  (free reshape of the conv output (B, H, W*C))
    o_ref: (1, Hh, Wh, C) f32
    """
    x = x_ref[0]                                               # (Hh, 2, Wh, 2C)
    top = x[:, 0]                                              # even h rows
    bot = x[:, 1]                                              # odd  h rows
    m = jnp.maximum(jnp.maximum(top[..., :C], top[..., C:]),
                    jnp.maximum(bot[..., :C], bot[..., C:]))
    o_ref[0] = m


def _mlp_head_kernel(x_ref, w1_ref, b1_ref, w2_ref, b2_ref, o_ref):
    """Fused fc1 + ReLU + fc2: (TB, 3136) -> (TB, 10), bf16 MXU / f32 accumulate."""
    x = x_ref[...].astype(jnp.bfloat16)
    h = jnp.dot(x, w1_ref[...], preferred_element_type=jnp.float32)
    h = jnp.maximum(h + b1_ref[...], 0.0)
    o = jnp.dot(h.astype(jnp.bfloat16), w2_ref[...],
                preferred_element_type=jnp.float32)
    o_ref[...] = o + b2_ref[...]


# ----------------------------------------------------------------------------
# Wrappers around pallas_call
# ----------------------------------------------------------------------------
def conv3x3_relu(x_nhwc, t_w, b_row, *, H, W, Cin, Cout):
    """3x3 conv (padding=1) + bias + ReLU.  Returns (B, H, W*Cout) f32."""
    B = x_nhwc.shape[0]
    xp = jnp.pad(x_nhwc, ((0, 0), (1, 1), (1, 1), (0, 0)))     # (B, H+2, W+2, Cin)
    xp = xp.reshape(B, H + 2, (W + 2) * Cin)                   # contiguous -> free
    kernel = functools.partial(_conv_rowband_kernel, H=H, WCout=W * Cout)
    flops = 2 * B * 3 * H * ((W + 2) * Cin) * (W * Cout)
    bytes_accessed = (xp.size * 4 + t_w.size * 2 + b_row.size * 4
                      + B * H * W * Cout * 4)
    return pl.pallas_call(
        kernel,
        out_shape=jax.ShapeDtypeStruct((B, H, W * Cout), jnp.float32),
        grid=(B,),
        in_specs=[
            pl.BlockSpec((1, H + 2, (W + 2) * Cin), lambda b: (b, 0, 0)),
            pl.BlockSpec((3, (W + 2) * Cin, W * Cout), lambda b: (0, 0, 0)),
            pl.BlockSpec((1, W * Cout), lambda b: (0, 0)),
        ],
        out_specs=pl.BlockSpec((1, H, W * Cout), lambda b: (b, 0, 0)),
        compiler_params=_PARALLEL,
        cost_estimate=pl.CostEstimate(flops=flops, transcendentals=0,
                                      bytes_accessed=bytes_accessed),
    )(xp, t_w, b_row)


def maxpool2x2(x_rows, *, H, W, C):
    """x_rows: (B, H, W*C) conv output -> (B, H//2, W//2, C)."""
    B = x_rows.shape[0]
    Hh, Wh = H // 2, W // 2
    xr = x_rows.reshape(B, Hh, 2, Wh, 2 * C)                   # contiguous -> free
    kernel = functools.partial(_maxpool2x2_kernel, C=C)
    return pl.pallas_call(
        kernel,
        out_shape=jax.ShapeDtypeStruct((B, Hh, Wh, C), jnp.float32),
        grid=(B,),
        in_specs=[pl.BlockSpec((1, Hh, 2, Wh, 2 * C), lambda b: (b, 0, 0, 0, 0))],
        out_specs=pl.BlockSpec((1, Hh, Wh, C), lambda b: (b, 0, 0, 0)),
        compiler_params=_PARALLEL,
    )(xr)


def mlp_head(x, w1, b1, w2, b2, *, block_rows=128):
    """Fused fc1(+ReLU)+fc2 over row-blocks of the batch."""
    B, K = x.shape
    N1 = w1.shape[1]
    N2 = w2.shape[1]
    TB = min(block_rows, B)
    flops = 2 * B * (K * N1 + N1 * N2)
    bytes_accessed = B * K * 4 + K * N1 * 2 + N1 * N2 * 2 + B * N2 * 4
    return pl.pallas_call(
        _mlp_head_kernel,
        out_shape=jax.ShapeDtypeStruct((B, N2), jnp.float32),
        grid=(pl.cdiv(B, TB),),
        in_specs=[
            pl.BlockSpec((TB, K), lambda i: (i, 0)),
            pl.BlockSpec((K, N1), lambda i: (0, 0)),
            pl.BlockSpec((1, N1), lambda i: (0, 0)),
            pl.BlockSpec((N1, N2), lambda i: (0, 0)),
            pl.BlockSpec((1, N2), lambda i: (0, 0)),
        ],
        out_specs=pl.BlockSpec((TB, N2), lambda i: (i, 0)),
        compiler_params=_PARALLEL,
        cost_estimate=pl.CostEstimate(flops=flops, transcendentals=0,
                                      bytes_accessed=bytes_accessed),
    )(x, w1, b1, w2, b2)


# ----------------------------------------------------------------------------
# Parameters: synthetic torch-layout init + one-time packing into kernel layouts
# ----------------------------------------------------------------------------
def init_params(key):
    """PyTorch-layout params (kaiming-normal weights, uniform +-1/sqrt(fan_in) biases)."""
    ks = jax.random.split(key, 10)

    def kaiming(k, shape, fan_in):
        return jax.random.normal(k, shape, jnp.float32) * jnp.sqrt(2.0 / fan_in)

    def bias(k, shape, fan_in):
        bound = 1.0 / jnp.sqrt(fan_in)
        return jax.random.uniform(k, shape, jnp.float32, -bound, bound)

    return {
        "conv1_w": kaiming(ks[0], (16, 1, 3, 3), 1 * 9),
        "conv1_b": bias(ks[1], (16,), 1 * 9),
        "conv2_w": kaiming(ks[2], (32, 16, 3, 3), 16 * 9),
        "conv2_b": bias(ks[3], (32,), 16 * 9),
        "conv3_w": kaiming(ks[4], (64, 32, 3, 3), 32 * 9),
        "conv3_b": bias(ks[5], (64,), 32 * 9),
        "fc1_w": kaiming(ks[6], (128, 64 * 7 * 7), 64 * 7 * 7),   # (out, in)
        "fc1_b": bias(ks[7], (128,), 64 * 7 * 7),
        "fc2_w": kaiming(ks[8], (10, 128), 128),
        "fc2_b": bias(ks[9], (10,), 128),
    }


def _banded_conv_weight(w_oihw, W):
    """(O, I, 3, 3) torch conv weight -> (3, (W+2)*I, W*O) banded matrix T with
    T[kh, (w+kw)*I + ci, w*O + co] = w[co, ci, kh, kw]   (all other entries 0)."""
    w = np.asarray(w_oihw, np.float32)
    O, I = w.shape[0], w.shape[1]
    wt = np.transpose(w, (2, 3, 1, 0))                         # (3, 3, I, O)
    t = np.zeros((3, (W + 2) * I, W * O), np.float32)
    for kh in range(3):
        for kw in range(3):
            for wo in range(W):
                wi = wo + kw
                t[kh, wi * I:(wi + 1) * I, wo * O:(wo + 1) * O] = wt[kh, kw]
    return jnp.asarray(t, jnp.bfloat16)


def pack_params(p):
    """One-time conversion of torch-layout params into kernel-ready layouts."""
    out = {}
    for name, W in (("conv1", 28), ("conv2", 14), ("conv3", 7)):
        w = p[f"{name}_w"]
        O = int(w.shape[0])
        out[f"{name}_t"] = _banded_conv_weight(w, W)
        out[f"{name}_b"] = (jnp.tile(p[f"{name}_b"], (W,))
                            .reshape(1, W * O).astype(jnp.float32))

    # fc1: permute input features so the natural NHWC flatten ((h*7+w)*64 + c)
    # matches PyTorch's NCHW .view order (c*49 + h*7 + w); store as (in, out).
    fc1 = p["fc1_w"].reshape(128, 64, 7 * 7)                    # (out, c, hw)
    out["fc1_w"] = (jnp.transpose(fc1, (2, 1, 0))
                    .reshape(7 * 7 * 64, 128).astype(jnp.bfloat16))
    out["fc1_b"] = p["fc1_b"].reshape(1, 128).astype(jnp.float32)
    out["fc2_w"] = jnp.transpose(p["fc2_w"], (1, 0)).astype(jnp.bfloat16)   # (128, 10)
    out["fc2_b"] = p["fc2_b"].reshape(1, 10).astype(jnp.float32)
    return out


# ----------------------------------------------------------------------------
# Forward pass (mirrors CNNClassifier.forward)
# ----------------------------------------------------------------------------
@jax.jit
def cnn_forward(x_nchw, params):
    B = x_nchw.shape[0]
    x = x_nchw.reshape(B, 28, 28, 1)                 # NCHW with C=1 -> NHWC (pure reshape)

    x = conv3x3_relu(x, params["conv1_t"], params["conv1_b"],
                     H=28, W=28, Cin=1, Cout=16)     # (B, 28, 28*16)
    x = maxpool2x2(x, H=28, W=28, C=16)              # (B, 14, 14, 16)

    x = conv3x3_relu(x, params["conv2_t"], params["conv2_b"],
                     H=14, W=14, Cin=16, Cout=32)    # (B, 14, 14*32)
    x = maxpool2x2(x, H=14, W=14, C=32)              # (B, 7, 7, 32)

    x = conv3x3_relu(x, params["conv3_t"], params["conv3_b"],
                     H=7, W=7, Cin=32, Cout=64)      # (B, 7, 7*64)

    x = x.reshape(B, 7 * 7 * 64)                     # NHWC flatten (fc1_w permuted to match)
    return mlp_head(x, params["fc1_w"], params["fc1_b"],
                    params["fc2_w"], params["fc2_b"])            # (B, 10)


# ----------------------------------------------------------------------------
if __name__ == "__main__":
    key = jax.random.PRNGKey(0)
    k_params, k_x = jax.random.split(key)

    params = pack_params(init_params(k_params))

    # MNIST-style input; spatial size must be 28 so fc1 sees 64*7*7 features.
    x = jax.random.normal(k_x, (2, 1, 28, 28), dtype=jnp.float32)

    logits = cnn_forward(x, params)
    logits = jax.block_until_ready(logits)

    assert logits.shape == (2, 10), logits.shape
    assert bool(jnp.all(jnp.isfinite(logits)))
    print("KERNEL_OK")
</pallas_src>

<mosaic_0001>
module attributes {stable_mosaic.version = 11 : i64} {
  func.func @_conv_rowband_kernel(%arg0: i32, %arg1: memref<1x30x30xf32, #tpu.memory_space<vmem>>, %arg2: memref<3x30x448xbf16, #tpu.memory_space<vmem>>, %arg3: memref<1x448xf32, #tpu.memory_space<vmem>>, %arg4: memref<1x28x448xf32, #tpu.memory_space<vmem>>) attributes {dimension_semantics = [#tpu.dimension_semantics<parallel>], iteration_bounds = array<i64: 2>, scalar_prefetch = 0 : i64, scratch_operands = 0 : i64, tpu.core_type = #tpu.core_type<tc>, window_params = [{transform_indices = @transform_0, window_bounds = array<i64: 1, 30, 30>}, {pipeline_mode = #tpu.pipeline_mode<synchronous>, transform_indices = @transform_1, window_bounds = array<i64: 3, 30, 448>}, {pipeline_mode = #tpu.pipeline_mode<synchronous>, transform_indices = @transform_2, window_bounds = array<i64: 1, 448>}, {transform_indices = @transform_3, window_bounds = array<i64: 1, 28, 448>}]} {
    %cst = arith.constant 0.000000e+00 : f32
    %0 = vector.broadcast %cst : f32 to vector<28x448xf32>
    %c0 = arith.constant 0 : index
    %c0_0 = arith.constant 0 : index
    %c0_1 = arith.constant 0 : index
    %1 = vector.load %arg1[%c0, %c0_0, %c0_1] : memref<1x30x30xf32, #tpu.memory_space<vmem>>, vector<1x28x30xf32>
    %2 = vector.shape_cast %1 : vector<1x28x30xf32> to vector<28x30xf32>
    %3 = arith.truncf %2 : vector<28x30xf32> to vector<28x30xbf16>
    %c0_2 = arith.constant 0 : index
    %c0_3 = arith.constant 0 : index
    %c0_4 = arith.constant 0 : index
    %4 = vector.load %arg2[%c0_2, %c0_3, %c0_4] : memref<3x30x448xbf16, #tpu.memory_space<vmem>>, vector<1x30x448xbf16>
    %5 = vector.shape_cast %4 : vector<1x30x448xbf16> to vector<30x448xbf16>
    %cst_5 = arith.constant dense<0.000000e+00> : vector<28x448xf32>
    %6 = tpu.matmul %3, %5, %cst_5 {dimension_numbers = #tpu.dot_dimension_numbers<[1], [0], [0], [1], [0, 0, 1, 1], [], []>} : vector<28x30xbf16>, vector<30x448xbf16>, vector<28x448xf32> -> vector<28x448xf32>
    %7 = arith.addf %0, %6 : vector<28x448xf32>
    %c0_6 = arith.constant 0 : index
    %c1 = arith.constant 1 : index
    %c0_7 = arith.constant 0 : index
    %8 = vector.load %arg1[%c0_6, %c1, %c0_7] : memref<1x30x30xf32, #tpu.memory_space<vmem>>, vector<1x28x30xf32>
    %9 = vector.shape_cast %8 : vector<1x28x30xf32> to vector<28x30xf32>
    %10 = arith.truncf %9 : vector<28x30xf32> to vector<28x30xbf16>
    %c1_8 = arith.constant 1 : index
    %c0_9 = arith.constant 0 : index
    %c0_10 = arith.constant 0 : index
    %11 = vector.load %arg2[%c1_8, %c0_9, %c0_10] : memref<3x30x448xbf16, #tpu.memory_space<vmem>>, vector<1x30x448xbf16>
    %12 = vector.shape_cast %11 : vector<1x30x448xbf16> to vector<30x448xbf16>
    %cst_11 = arith.constant dense<0.000000e+00> : vector<28x448xf32>
    %13 = tpu.matmul %10, %12, %cst_11 {dimension_numbers = #tpu.dot_dimension_numbers<[1], [0], [0], [1], [0, 0, 1, 1], [], []>} : vector<28x30xbf16>, vector<30x448xbf16>, vector<28x448xf32> -> vector<28x448xf32>
    %14 = arith.addf %7, %13 : vector<28x448xf32>
    %c0_12 = arith.constant 0 : index
    %c2 = arith.constant 2 : index
    %c0_13 = arith.constant 0 : index
    %15 = vector.load %arg1[%c0_12, %c2, %c0_13] : memref<1x30x30xf32, #tpu.memory_space<vmem>>, vector<1x28x30xf32>
    %16 = vector.shape_cast %15 : vector<1x28x30xf32> to vector<28x30xf32>
    %17 = arith.truncf %16 : vector<28x30xf32> to vector<28x30xbf16>
    %c2_14 = arith.constant 2 : index
    %c0_15 = arith.constant 0 : index
    %c0_16 = arith.constant 0 : index
    %18 = vector.load %arg2[%c2_14, %c0_15, %c0_16] : memref<3x30x448xbf16, #tpu.memory_space<vmem>>, vector<1x30x448xbf16>
    %19 = vector.shape_cast %18 : vector<1x30x448xbf16> to vector<30x448xbf16>
    %cst_17 = arith.constant dense<0.000000e+00> : vector<28x448xf32>
    %20 = tpu.matmul %17, %19, %cst_17 {dimension_numbers = #tpu.dot_dimension_numbers<[1], [0], [0], [1], [0, 0, 1, 1], [], []>} : vector<28x30xbf16>, vector<30x448xbf16>, vector<28x448xf32> -> vector<28x448xf32>
    %21 = arith.addf %14, %20 : vector<28x448xf32>
    %c0_18 = arith.constant 0 : index
    %c0_19 = arith.constant 0 : index
    %22 = vector.load %arg3[%c0_18, %c0_19] : memref<1x448xf32, #tpu.memory_space<vmem>>, vector<1x448xf32>
    %23 = vector.broadcast %22 : vector<1x448xf32> to vector<28x448xf32>
    %24 = arith.addf %21, %23 : vector<28x448xf32>
    %cst_20 = arith.constant 0.000000e+00 : f32
    %25 = vector.broadcast %cst_20 : f32 to vector<28x448xf32>
    %26 = arith.maximumf %24, %25 : vector<28x448xf32>
    %c0_21 = arith.constant 0 : index
    %c0_22 = arith.constant 0 : index
    %c0_23 = arith.constant 0 : index
    %27 = vector.load %arg4[%c0_21, %c0_22, %c0_23] : memref<1x28x448xf32, #tpu.memory_space<vmem>>, vector<1x28x448xf32>
    %28 = vector.shape_cast %27 : vector<1x28x448xf32> to vector<28x448xf32>
    %29 = vector.shape_cast %26 : vector<28x448xf32> to vector<1x28x448xf32>
    tpu.vector_store %arg4[%c0_21, %c0_22, %c0_23], %29 {strides = array<i32>} : memref<1x28x448xf32, #tpu.memory_space<vmem>>, vector<1x28x448xf32>,
    return
  }
  func.func @transform_0(%arg0: i32) -> (i32, i32, i32) {
    %c0_i32 = arith.constant 0 : i32
    %c0_i32_0 = arith.constant 0 : i32
    %c0_i32_1 = arith.constant 0 : i32
    return %arg0, %c0_i32, %c0_i32_0 : i32, i32, i32
  }
  func.func @transform_1(%arg0: i32) -> (i32, i32, i32) {
    %c0_i32 = arith.constant 0 : i32
    %c0_i32_0 = arith.constant 0 : i32
    %c0_i32_1 = arith.constant 0 : i32
    %c0_i32_2 = arith.constant 0 : i32
    return %c0_i32, %c0_i32_0, %c0_i32_1 : i32, i32, i32
  }
  func.func @transform_2(%arg0: i32) -> (i32, i32) {
    %c0_i32 = arith.constant 0 : i32
    %c0_i32_0 = arith.constant 0 : i32
    %c0_i32_1 = arith.constant 0 : i32
    return %c0_i32, %c0_i32_0 : i32, i32
  }
  func.func @transform_3(%arg0: i32) -> (i32, i32, i32) {
    %c0_i32 = arith.constant 0 : i32
    %c0_i32_0 = arith.constant 0 : i32
    %c0_i32_1 = arith.constant 0 : i32
    return %arg0, %c0_i32, %c0_i32_0 : i32, i32, i32
  }
}

module attributes {stable_mosaic.version = 11 : i64} {
  func.func @_maxpool2x2_kernel(%arg0: i32, %arg1: memref<1x14x2x14x32xf32, #tpu.memory_space<vmem>>, %arg2: memref<1x14x14x16xf32, #tpu.memory_space<vmem>>) attributes {dimension_semantics = [#tpu.dimension_semantics<parallel>], iteration_bounds = array<i64: 2>, scalar_prefetch = 0 : i64, scratch_operands = 0 : i64, tpu.core_type = #tpu.core_type<tc>, window_params = [{transform_indices = @transform_0, window_bounds = array<i64: 1, 14, 2, 14, 32>}, {transform_indices = @transform_1, window_bounds = array<i64: 1, 14, 14, 16>}]} {
    %c0 = arith.constant 0 : index
    %c0_0 = arith.constant 0 : index
    %c0_1 = arith.constant 0 : index
    %c0_2 = arith.constant 0 : index
    %c0_3 = arith.constant 0 : index
    %0 = vector.load %arg1[%c0, %c0_0, %c0_1, %c0_2, %c0_3] : memref<1x14x2x14x32xf32, #tpu.memory_space<vmem>>, vector<1x14x2x14x32xf32>
    %1 = vector.shape_cast %0 : vector<1x14x2x14x32xf32> to vector<14x2x14x32xf32>
    %2 = vector.extract_strided_slice %1 {offsets = [0, 0, 0, 0], sizes = [14, 1, 14, 32], strides = [1, 1, 1, 1]} : vector<14x2x14x32xf32> to vector<14x1x14x32xf32>
    %3 = vector.shape_cast %2 : vector<14x1x14x32xf32> to vector<14x14x32xf32>
    %4 = vector.extract_strided_slice %1 {offsets = [0, 1, 0, 0], sizes = [14, 1, 14, 32], strides = [1, 1, 1, 1]} : vector<14x2x14x32xf32> to vector<14x1x14x32xf32>
    %5 = vector.shape_cast %4 : vector<14x1x14x32xf32> to vector<14x14x32xf32>
    %6 = vector.extract_strided_slice %3 {offsets = [0, 0, 0], sizes = [14, 14, 16], strides = [1, 1, 1]} : vector<14x14x32xf32> to vector<14x14x16xf32>
    %7 = vector.extract_strided_slice %3 {offsets = [0, 0, 16], sizes = [14, 14, 16], strides = [1, 1, 1]} : vector<14x14x32xf32> to vector<14x14x16xf32>
    %8 = arith.maximumf %6, %7 : vector<14x14x16xf32>
    %9 = vector.extract_strided_slice %5 {offsets = [0, 0, 0], sizes = [14, 14, 16], strides = [1, 1, 1]} : vector<14x14x32xf32> to vector<14x14x16xf32>
    %10 = vector.extract_strided_slice %5 {offsets = [0, 0, 16], sizes = [14, 14, 16], strides = [1, 1, 1]} : vector<14x14x32xf32> to vector<14x14x16xf32>
    %11 = arith.maximumf %9, %10 : vector<14x14x16xf32>
    %12 = arith.maximumf %8, %11 : vector<14x14x16xf32>
    %c0_4 = arith.constant 0 : index
    %c0_5 = arith.constant 0 : index
    %c0_6 = arith.constant 0 : index
    %c0_7 = arith.constant 0 : index
    %13 = vector.load %arg2[%c0_4, %c0_5, %c0_6, %c0_7] : memref<1x14x14x16xf32, #tpu.memory_space<vmem>>, vector<1x14x14x16xf32>
    %14 = vector.shape_cast %13 : vector<1x14x14x16xf32> to vector<14x14x16xf32>
    %15 = vector.shape_cast %12 : vector<14x14x16xf32> to vector<1x14x14x16xf32>
    tpu.vector_store %arg2[%c0_4, %c0_5, %c0_6, %c0_7], %15 {strides = array<i32>} : memref<1x14x14x16xf32, #tpu.memory_space<vmem>>, vector<1x14x14x16xf32>,
    return
  }
  func.func @transform_0(%arg0: i32) -> (i32, i32, i32, i32, i32) {
    %c0_i32 = arith.constant 0 : i32
    %c0_i32_0 = arith.constant 0 : i32
    %c0_i32_1 = arith.constant 0 : i32
    %c0_i32_2 = arith.constant 0 : i32
    %c0_i32_3 = arith.constant 0 : i32
    return %arg0, %c0_i32, %c0_i32_0, %c0_i32_1, %c0_i32_2 : i32, i32, i32, i32, i32
  }
  func.func @transform_1(%arg0: i32) -> (i32, i32, i32, i32) {
    %c0_i32 = arith.constant 0 : i32
    %c0_i32_0 = arith.constant 0 : i32
    %c0_i32_1 = arith.constant 0 : i32
    %c0_i32_2 = arith.constant 0 : i32
    return %arg0, %c0_i32, %c0_i32_0, %c0_i32_1 : i32, i32, i32, i32
  }
}

module attributes {stable_mosaic.version = 11 : i64} {
  func.func @_conv_rowband_kernel(%arg0: i32, %arg1: memref<1x16x256xf32, #tpu.memory_space<vmem>>, %arg2: memref<3x256x448xbf16, #tpu.memory_space<vmem>>, %arg3: memref<1x448xf32, #tpu.memory_space<vmem>>, %arg4: memref<1x14x448xf32, #tpu.memory_space<vmem>>) attributes {dimension_semantics = [#tpu.dimension_semantics<parallel>], iteration_bounds = array<i64: 2>, scalar_prefetch = 0 : i64, scratch_operands = 0 : i64, tpu.core_type = #tpu.core_type<tc>, window_params = [{transform_indices = @transform_0, window_bounds = array<i64: 1, 16, 256>}, {pipeline_mode = #tpu.pipeline_mode<synchronous>, transform_indices = @transform_1, window_bounds = array<i64: 3, 256, 448>}, {pipeline_mode = #tpu.pipeline_mode<synchronous>, transform_indices = @transform_2, window_bounds = array<i64: 1, 448>}, {transform_indices = @transform_3, window_bounds = array<i64: 1, 14, 448>}]} {
    %cst = arith.constant 0.000000e+00 : f32
    %0 = vector.broadcast %cst : f32 to vector<14x448xf32>
    %c0 = arith.constant 0 : index
    %c0_0 = arith.constant 0 : index
    %c0_1 = arith.constant 0 : index
    %1 = vector.load %arg1[%c0, %c0_0, %c0_1] : memref<1x16x256xf32, #tpu.memory_space<vmem>>, vector<1x14x256xf32>
    %2 = vector.shape_cast %1 : vector<1x14x256xf32> to vector<14x256xf32>
    %3 = arith.truncf %2 : vector<14x256xf32> to vector<14x256xbf16>
    %c0_2 = arith.constant 0 : index
    %c0_3 = arith.constant 0 : index
    %c0_4 = arith.constant 0 : index
    %4 = vector.load %arg2[%c0_2, %c0_3, %c0_4] : memref<3x256x448xbf16, #tpu.memory_space<vmem>>, vector<1x256x448xbf16>
    %5 = vector.shape_cast %4 : vector<1x256x448xbf16> to vector<256x448xbf16>
    %cst_5 = arith.constant dense<0.000000e+00> : vector<14x448xf32>
    %6 = tpu.matmul %3, %5, %cst_5 {dimension_numbers = #tpu.dot_dimension_numbers<[1], [0], [0], [1], [0, 0, 1, 1], [], []>} : vector<14x256xbf16>, vector<256x448xbf16>, vector<14x448xf32> -> vector<14x448xf32>
    %7 = arith.addf %0, %6 : vector<14x448xf32>
    %c0_6 = arith.constant 0 : index
    %c1 = arith.constant 1 : index
    %c0_7 = arith.constant 0 : index
    %8 = vector.load %arg1[%c0_6, %c1, %c0_7] : memref<1x16x256xf32, #tpu.memory_space<vmem>>, vector<1x14x256xf32>
    %9 = vector.shape_cast %8 : vector<1x14x256xf32> to vector<14x256xf32>
    %10 = arith.truncf %9 : vector<14x256xf32> to vector<14x256xbf16>
    %c1_8 = arith.constant 1 : index
    %c0_9 = arith.constant 0 : index
    %c0_10 = arith.constant 0 : index
    %11 = vector.load %arg2[%c1_8, %c0_9, %c0_10] : memref<3x256x448xbf16, #tpu.memory_space<vmem>>, vector<1x256x448xbf16>
    %12 = vector.shape_cast %11 : vector<1x256x448xbf16> to vector<256x448xbf16>
    %cst_11 = arith.constant dense<0.000000e+00> : vector<14x448xf32>
    %13 = tpu.matmul %10, %12, %cst_11 {dimension_numbers = #tpu.dot_dimension_numbers<[1], [0], [0], [1], [0, 0, 1, 1], [], []>} : vector<14x256xbf16>, vector<256x448xbf16>, vector<14x448xf32> -> vector<14x448xf32>
    %14 = arith.addf %7, %13 : vector<14x448xf32>
    %c0_12 = arith.constant 0 : index
    %c2 = arith.constant 2 : index
    %c0_13 = arith.constant 0 : index
    %15 = vector.load %arg1[%c0_12, %c2, %c0_13] : memref<1x16x256xf32, #tpu.memory_space<vmem>>, vector<1x14x256xf32>
    %16 = vector.shape_cast %15 : vector<1x14x256xf32> to vector<14x256xf32>
    %17 = arith.truncf %16 : vector<14x256xf32> to vector<14x256xbf16>
    %c2_14 = arith.constant 2 : index
    %c0_15 = arith.constant 0 : index
    %c0_16 = arith.constant 0 : index
    %18 = vector.load %arg2[%c2_14, %c0_15, %c0_16] : memref<3x256x448xbf16, #tpu.memory_space<vmem>>, vector<1x256x448xbf16>
    %19 = vector.shape_cast %18 : vector<1x256x448xbf16> to vector<256x448xbf16>
    %cst_17 = arith.constant dense<0.000000e+00> : vector<14x448xf32>
    %20 = tpu.matmul %17, %19, %cst_17 {dimension_numbers = #tpu.dot_dimension_numbers<[1], [0], [0], [1], [0, 0, 1, 1], [], []>} : vector<14x256xbf16>, vector<256x448xbf16>, vector<14x448xf32> -> vector<14x448xf32>
    %21 = arith.addf %14, %20 : vector<14x448xf32>
    %c0_18 = arith.constant 0 : index
    %c0_19 = arith.constant 0 : index
    %22 = vector.load %arg3[%c0_18, %c0_19] : memref<1x448xf32, #tpu.memory_space<vmem>>, vector<1x448xf32>
    %23 = vector.broadcast %22 : vector<1x448xf32> to vector<14x448xf32>
    %24 = arith.addf %21, %23 : vector<14x448xf32>
    %cst_20 = arith.constant 0.000000e+00 : f32
    %25 = vector.broadcast %cst_20 : f32 to vector<14x448xf32>
    %26 = arith.maximumf %24, %25 : vector<14x448xf32>
    %c0_21 = arith.constant 0 : index
    %c0_22 = arith.constant 0 : index
    %c0_23 = arith.constant 0 : index
    %27 = vector.load %arg4[%c0_21, %c0_22, %c0_23] : memref<1x14x448xf32, #tpu.memory_space<vmem>>, vector<1x14x448xf32>
    %28 = vector.shape_cast %27 : vector<1x14x448xf32> to vector<14x448xf32>
    %29 = vector.shape_cast %26 : vector<14x448xf32> to vector<1x14x448xf32>
    tpu.vector_store %arg4[%c0_21, %c0_22, %c0_23], %29 {strides = array<i32>} : memref<1x14x448xf32, #tpu.memory_space<vmem>>, vector<1x14x448xf32>,
    return
  }
  func.func @transform_0(%arg0: i32) -> (i32, i32, i32) {
    %c0_i32 = arith.constant 0 : i32
    %c0_i32_0 = arith.constant 0 : i32
    %c0_i32_1 = arith.constant 0 : i32
    return %arg0, %c0_i32, %c0_i32_0 : i32, i32, i32
  }
  func.func @transform_1(%arg0: i32) -> (i32, i32, i32) {
    %c0_i32 = arith.constant 0 : i32
    %c0_i32_0 = arith.constant 0 : i32
    %c0_i32_1 = arith.constant 0 : i32
    %c0_i32_2 = arith.constant 0 : i32
    return %c0_i32, %c0_i32_0, %c0_i32_1 : i32, i32, i32
  }
  func.func @transform_2(%arg0: i32) -> (i32, i32) {
    %c0_i32 = arith.constant 0 : i32
    %c0_i32_0 = arith.constant 0 : i32
    %c0_i32_1 = arith.constant 0 : i32
    return %c0_i32, %c0_i32_0 : i32, i32
  }
  func.func @transform_3(%arg0: i32) -> (i32, i32, i32) {
    %c0_i32 = arith.constant 0 : i32
    %c0_i32_0 = arith.constant 0 : i32
    %c0_i32_1 = arith.constant 0 : i32
    return %arg0, %c0_i32, %c0_i32_0 : i32, i32, i32
  }
}

module attributes {stable_mosaic.version = 11 : i64} {
  func.func @_maxpool2x2_kernel(%arg0: i32, %arg1: memref<1x7x2x7x64xf32, #tpu.memory_space<vmem>>, %arg2: memref<1x7x7x32xf32, #tpu.memory_space<vmem>>) attributes {dimension_semantics = [#tpu.dimension_semantics<parallel>], iteration_bounds = array<i64: 2>, scalar_prefetch = 0 : i64, scratch_operands = 0 : i64, tpu.core_type = #tpu.core_type<tc>, window_params = [{transform_indices = @transform_0, window_bounds = array<i64: 1, 7, 2, 7, 64>}, {transform_indices = @transform_1, window_bounds = array<i64: 1, 7, 7, 32>}]} {
    %c0 = arith.constant 0 : index
    %c0_0 = arith.constant 0 : index
    %c0_1 = arith.constant 0 : index
    %c0_2 = arith.constant 0 : index
    %c0_3 = arith.constant 0 : index
    %0 = vector.load %arg1[%c0, %c0_0, %c0_1, %c0_2, %c0_3] : memref<1x7x2x7x64xf32, #tpu.memory_space<vmem>>, vector<1x7x2x7x64xf32>
    %1 = vector.shape_cast %0 : vector<1x7x2x7x64xf32> to vector<7x2x7x64xf32>
    %2 = vector.extract_strided_slice %1 {offsets = [0, 0, 0, 0], sizes = [7, 1, 7, 64], strides = [1, 1, 1, 1]} : vector<7x2x7x64xf32> to vector<7x1x7x64xf32>
    %3 = vector.shape_cast %2 : vector<7x1x7x64xf32> to vector<7x7x64xf32>
    %4 = vector.extract_strided_slice %1 {offsets = [0, 1, 0, 0], sizes = [7, 1, 7, 64], strides = [1, 1, 1, 1]} : vector<7x2x7x64xf32> to vector<7x1x7x64xf32>
    %5 = vector.shape_cast %4 : vector<7x1x7x64xf32> to vector<7x7x64xf32>
    %6 = vector.extract_strided_slice %3 {offsets = [0, 0, 0], sizes = [7, 7, 32], strides = [1, 1, 1]} : vector<7x7x64xf32> to vector<7x7x32xf32>
    %7 = vector.extract_strided_slice %3 {offsets = [0, 0, 32], sizes = [7, 7, 32], strides = [1, 1, 1]} : vector<7x7x64xf32> to vector<7x7x32xf32>
    %8 = arith.maximumf %6, %7 : vector<7x7x32xf32>
    %9 = vector.extract_strided_slice %5 {offsets = [0, 0, 0], sizes = [7, 7, 32], strides = [1, 1, 1]} : vector<7x7x64xf32> to vector<7x7x32xf32>
    %10 = vector.extract_strided_slice %5 {offsets = [0, 0, 32], sizes = [7, 7, 32], strides = [1, 1, 1]} : vector<7x7x64xf32> to vector<7x7x32xf32>
    %11 = arith.maximumf %9, %10 : vector<7x7x32xf32>
    %12 = arith.maximumf %8, %11 : vector<7x7x32xf32>
    %c0_4 = arith.constant 0 : index
    %c0_5 = arith.constant 0 : index
    %c0_6 = arith.constant 0 : index
    %c0_7 = arith.constant 0 : index
    %13 = vector.load %arg2[%c0_4, %c0_5, %c0_6, %c0_7] : memref<1x7x7x32xf32, #tpu.memory_space<vmem>>, vector<1x7x7x32xf32>
    %14 = vector.shape_cast %13 : vector<1x7x7x32xf32> to vector<7x7x32xf32>
    %15 = vector.shape_cast %12 : vector<7x7x32xf32> to vector<1x7x7x32xf32>
    tpu.vector_store %arg2[%c0_4, %c0_5, %c0_6, %c0_7], %15 {strides = array<i32>} : memref<1x7x7x32xf32, #tpu.memory_space<vmem>>, vector<1x7x7x32xf32>,
    return
  }
  func.func @transform_0(%arg0: i32) -> (i32, i32, i32, i32, i32) {
    %c0_i32 = arith.constant 0 : i32
    %c0_i32_0 = arith.constant 0 : i32
    %c0_i32_1 = arith.constant 0 : i32
    %c0_i32_2 = arith.constant 0 : i32
    %c0_i32_3 = arith.constant 0 : i32
    return %arg0, %c0_i32, %c0_i32_0, %c0_i32_1, %c0_i32_2 : i32, i32, i32, i32, i32
  }
  func.func @transform_1(%arg0: i32) -> (i32, i32, i32, i32) {
    %c0_i32 = arith.constant 0 : i32
    %c0_i32_0 = arith.constant 0 : i32
    %c0_i32_1 = arith.constant 0 : i32
    %c0_i32_2 = arith.constant 0 : i32
    return %arg0, %c0_i32, %c0_i32_0, %c0_i32_1 : i32, i32, i32, i32
  }
}

module attributes {stable_mosaic.version = 11 : i64} {
  func.func @_conv_rowband_kernel(%arg0: i32, %arg1: memref<1x9x288xf32, #tpu.memory_space<vmem>>, %arg2: memref<3x288x448xbf16, #tpu.memory_space<vmem>>, %arg3: memref<1x448xf32, #tpu.memory_space<vmem>>, %arg4: memref<1x7x448xf32, #tpu.memory_space<vmem>>) attributes {dimension_semantics = [#tpu.dimension_semantics<parallel>], iteration_bounds = array<i64: 2>, scalar_prefetch = 0 : i64, scratch_operands = 0 : i64, tpu.core_type = #tpu.core_type<tc>, window_params = [{transform_indices = @transform_0, window_bounds = array<i64: 1, 9, 288>}, {pipeline_mode = #tpu.pipeline_mode<synchronous>, transform_indices = @transform_1, window_bounds = array<i64: 3, 288, 448>}, {pipeline_mode = #tpu.pipeline_mode<synchronous>, transform_indices = @transform_2, window_bounds = array<i64: 1, 448>}, {transform_indices = @transform_3, window_bounds = array<i64: 1, 7, 448>}]} {
    %cst = arith.constant 0.000000e+00 : f32
    %0 = vector.broadcast %cst : f32 to vector<7x448xf32>
    %c0 = arith.constant 0 : index
    %c0_0 = arith.constant 0 : index
    %c0_1 = arith.constant 0 : index
    %1 = vector.load %arg1[%c0, %c0_0, %c0_1] : memref<1x9x288xf32, #tpu.memory_space<vmem>>, vector<1x7x288xf32>
    %2 = vector.shape_cast %1 : vector<1x7x288xf32> to vector<7x288xf32>
    %3 = arith.truncf %2 : vector<7x288xf32> to vector<7x288xbf16>
    %c0_2 = arith.constant 0 : index
    %c0_3 = arith.constant 0 : index
    %c0_4 = arith.constant 0 : index
    %4 = vector.load %arg2[%c0_2, %c0_3, %c0_4] : memref<3x288x448xbf16, #tpu.memory_space<vmem>>, vector<1x288x448xbf16>
    %5 = vector.shape_cast %4 : vector<1x288x448xbf16> to vector<288x448xbf16>
    %cst_5 = arith.constant dense<0.000000e+00> : vector<7x448xf32>
    %6 = tpu.matmul %3, %5, %cst_5 {dimension_numbers = #tpu.dot_dimension_numbers<[1], [0], [0], [1], [0, 0, 1, 1], [], []>} : vector<7x288xbf16>, vector<288x448xbf16>, vector<7x448xf32> -> vector<7x448xf32>
    %7 = arith.addf %0, %6 : vector<7x448xf32>
    %c0_6 = arith.constant 0 : index
    %c1 = arith.constant 1 : index
    %c0_7 = arith.constant 0 : index
    %8 = vector.load %arg1[%c0_6, %c1, %c0_7] : memref<1x9x288xf32, #tpu.memory_space<vmem>>, vector<1x7x288xf32>
    %9 = vector.shape_cast %8 : vector<1x7x288xf32> to vector<7x288xf32>
    %10 = arith.truncf %9 : vector<7x288xf32> to vector<7x288xbf16>
    %c1_8 = arith.constant 1 : index
    %c0_9 = arith.constant 0 : index
    %c0_10 = arith.constant 0 : index
    %11 = vector.load %arg2[%c1_8, %c0_9, %c0_10] : memref<3x288x448xbf16, #tpu.memory_space<vmem>>, vector<1x288x448xbf16>
    %12 = vector.shape_cast %11 : vector<1x288x448xbf16> to vector<288x448xbf16>
    %cst_11 = arith.constant dense<0.000000e+00> : vector<7x448xf32>
    %13 = tpu.matmul %10, %12, %cst_11 {dimension_numbers = #tpu.dot_dimension_numbers<[1], [0], [0], [1], [0, 0, 1, 1], [], []>} : vector<7x288xbf16>, vector<288x448xbf16>, vector<7x448xf32> -> vector<7x448xf32>
    %14 = arith.addf %7, %13 : vector<7x448xf32>
    %c0_12 = arith.constant 0 : index
    %c2 = arith.constant 2 : index
    %c0_13 = arith.constant 0 : index
    %15 = vector.load %arg1[%c0_12, %c2, %c0_13] : memref<1x9x288xf32, #tpu.memory_space<vmem>>, vector<1x7x288xf32>
    %16 = vector.shape_cast %15 : vector<1x7x288xf32> to vector<7x288xf32>
    %17 = arith.truncf %16 : vector<7x288xf32> to vector<7x288xbf16>
    %c2_14 = arith.constant 2 : index
    %c0_15 = arith.constant 0 : index
    %c0_16 = arith.constant 0 : index
    %18 = vector.load %arg2[%c2_14, %c0_15, %c0_16] : memref<3x288x448xbf16, #tpu.memory_space<vmem>>, vector<1x288x448xbf16>
    %19 = vector.shape_cast %18 : vector<1x288x448xbf16> to vector<288x448xbf16>
    %cst_17 = arith.constant dense<0.000000e+00> : vector<7x448xf32>
    %20 = tpu.matmul %17, %19, %cst_17 {dimension_numbers = #tpu.dot_dimension_numbers<[1], [0], [0], [1], [0, 0, 1, 1], [], []>} : vector<7x288xbf16>, vector<288x448xbf16>, vector<7x448xf32> -> vector<7x448xf32>
    %21 = arith.addf %14, %20 : vector<7x448xf32>
    %c0_18 = arith.constant 0 : index
    %c0_19 = arith.constant 0 : index
    %22 = vector.load %arg3[%c0_18, %c0_19] : memref<1x448xf32, #tpu.memory_space<vmem>>, vector<1x448xf32>
    %23 = vector.broadcast %22 : vector<1x448xf32> to vector<7x448xf32>
    %24 = arith.addf %21, %23 : vector<7x448xf32>
    %cst_20 = arith.constant 0.000000e+00 : f32
    %25 = vector.broadcast %cst_20 : f32 to vector<7x448xf32>
    %26 = arith.maximumf %24, %25 : vector<7x448xf32>
    %c0_21 = arith.constant 0 : index
    %c0_22 = arith.constant 0 : index
    %c0_23 = arith.constant 0 : index
    %27 = vector.load %arg4[%c0_21, %c0_22, %c0_23] : memref<1x7x448xf32, #tpu.memory_space<vmem>>, vector<1x7x448xf32>
    %28 = vector.shape_cast %27 : vector<1x7x448xf32> to vector<7x448xf32>
    %29 = vector.shape_cast %26 : vector<7x448xf32> to vector<1x7x448xf32>
    tpu.vector_store %arg4[%c0_21, %c0_22, %c0_23], %29 {strides = array<i32>} : memref<1x7x448xf32, #tpu.memory_space<vmem>>, vector<1x7x448xf32>,
    return
  }
  func.func @transform_0(%arg0: i32) -> (i32, i32, i32) {
    %c0_i32 = arith.constant 0 : i32
    %c0_i32_0 = arith.constant 0 : i32
    %c0_i32_1 = arith.constant 0 : i32
    return %arg0, %c0_i32, %c0_i32_0 : i32, i32, i32
  }
  func.func @transform_1(%arg0: i32) -> (i32, i32, i32) {
    %c0_i32 = arith.constant 0 : i32
    %c0_i32_0 = arith.constant 0 : i32
    %c0_i32_1 = arith.constant 0 : i32
    %c0_i32_2 = arith.constant 0 : i32
    return %c0_i32, %c0_i32_0, %c0_i32_1 : i32, i32, i32
  }
  func.func @transform_2(%arg0: i32) -> (i32, i32) {
    %c0_i32 = arith.constant 0 : i32
    %c0_i32_0 = arith.constant 0 : i32
    %c0_i32_1 = arith.constant 0 : i32
    return %c0_i32, %c0_i32_0 : i32, i32
  }
  func.func @transform_3(%arg0: i32) -> (i32, i32, i32) {
    %c0_i32 = arith.constant 0 : i32
    %c0_i32_0 = arith.constant 0 : i32
    %c0_i32_1 = arith.constant 0 : i32
    return %arg0, %c0_i32, %c0_i32_0 : i32, i32, i32
  }
}

module attributes {stable_mosaic.version = 11 : i64} {
  func.func @_mlp_head_kernel(%arg0: i32, %arg1: memref<2x3136xf32, #tpu.memory_space<vmem>>, %arg2: memref<3136x128xbf16, #tpu.memory_space<vmem>>, %arg3: memref<1x128xf32, #tpu.memory_space<vmem>>, %arg4: memref<128x10xbf16, #tpu.memory_space<vmem>>, %arg5: memref<1x10xf32, #tpu.memory_space<vmem>>, %arg6: memref<2x10xf32, #tpu.memory_space<vmem>>) attributes {dimension_semantics = [#tpu.dimension_semantics<parallel>], iteration_bounds = array<i64: 1>, scalar_prefetch = 0 : i64, scratch_operands = 0 : i64, tpu.core_type = #tpu.core_type<tc>, window_params = [{transform_indices = @transform_0, window_bounds = array<i64: 2, 3136>}, {pipeline_mode = #tpu.pipeline_mode<synchronous>, transform_indices = @transform_1, window_bounds = array<i64: 3136, 128>}, {pipeline_mode = #tpu.pipeline_mode<synchronous>, transform_indices = @transform_2, window_bounds = array<i64: 1, 128>}, {pipeline_mode = #tpu.pipeline_mode<synchronous>, transform_indices = @transform_3, window_bounds = array<i64: 128, 10>}, {pipeline_mode = #tpu.pipeline_mode<synchronous>, transform_indices = @transform_4, window_bounds = array<i64: 1, 10>}, {transform_indices = @transform_5, window_bounds = array<i64: 2, 10>}]} {
    %c0 = arith.constant 0 : index
    %c0_0 = arith.constant 0 : index
    %0 = vector.load %arg1[%c0, %c0_0] : memref<2x3136xf32, #tpu.memory_space<vmem>>, vector<2x3136xf32>
    %1 = arith.truncf %0 : vector<2x3136xf32> to vector<2x3136xbf16>
    %c0_1 = arith.constant 0 : index
    %c0_2 = arith.constant 0 : index
    %2 = vector.load %arg2[%c0_1, %c0_2] : memref<3136x128xbf16, #tpu.memory_space<vmem>>, vector<3136x128xbf16>
    %cst = arith.constant dense<0.000000e+00> : vector<2x128xf32>
    %3 = tpu.matmul %1, %2, %cst {dimension_numbers = #tpu.dot_dimension_numbers<[1], [0], [0], [1], [0, 0, 1, 1], [], []>} : vector<2x3136xbf16>, vector<3136x128xbf16>, vector<2x128xf32> -> vector<2x128xf32>
    %c0_3 = arith.constant 0 : index
    %c0_4 = arith.constant 0 : index
    %4 = vector.load %arg3[%c0_3, %c0_4] : memref<1x128xf32, #tpu.memory_space<vmem>>, vector<1x128xf32>
    %5 = vector.broadcast %4 : vector<1x128xf32> to vector<2x128xf32>
    %6 = arith.addf %3, %5 : vector<2x128xf32>
    %cst_5 = arith.constant 0.000000e+00 : f32
    %7 = vector.broadcast %cst_5 : f32 to vector<2x128xf32>
    %8 = arith.maximumf %6, %7 : vector<2x128xf32>
    %9 = arith.truncf %8 : vector<2x128xf32> to vector<2x128xbf16>
    %c0_6 = arith.constant 0 : index
    %c0_7 = arith.constant 0 : index
    %10 = vector.load %arg4[%c0_6, %c0_7] : memref<128x10xbf16, #tpu.memory_space<vmem>>, vector<128x10xbf16>
    %cst_8 = arith.constant dense<0.000000e+00> : vector<2x10xf32>
    %11 = tpu.matmul %9, %10, %cst_8 {dimension_numbers = #tpu.dot_dimension_numbers<[1], [0], [0], [1], [0, 0, 1, 1], [], []>} : vector<2x128xbf16>, vector<128x10xbf16>, vector<2x10xf32> -> vector<2x10xf32>
    %c0_9 = arith.constant 0 : index
    %c0_10 = arith.constant 0 : index
    %12 = vector.load %arg5[%c0_9, %c0_10] : memref<1x10xf32, #tpu.memory_space<vmem>>, vector<1x10xf32>
    %13 = vector.broadcast %12 : vector<1x10xf32> to vector<2x10xf32>
    %14 = arith.addf %11, %13 : vector<2x10xf32>
    %c0_11 = arith.constant 0 : index
    %c0_12 = arith.constant 0 : index
    %15 = vector.load %arg6[%c0_11, %c0_12] : memref<2x10xf32, #tpu.memory_space<vmem>>, vector<2x10xf32>
    tpu.vector_store %arg6[%c0_11, %c0_12], %14 {strides = array<i32>} : memref<2x10xf32, #tpu.memory_space<vmem>>, vector<2x10xf32>,
    return
  }
  func.func @transform_0(%arg0: i32) -> (i32, i32) {
    %c0_i32 = arith.constant 0 : i32
    %c0_i32_0 = arith.constant 0 : i32
    return %arg0, %c0_i32 : i32, i32
  }
  func.func @transform_1(%arg0: i32) -> (i32, i32) {
    %c0_i32 = arith.constant 0 : i32
    %c0_i32_0 = arith.constant 0 : i32
    %c0_i32_1 = arith.constant 0 : i32
    return %c0_i32, %c0_i32_0 : i32, i32
  }
  func.func @transform_2(%arg0: i32) -> (i32, i32) {
    %c0_i32 = arith.constant 0 : i32
    %c0_i32_0 = arith.constant 0 : i32
    %c0_i32_1 = arith.constant 0 : i32
    return %c0_i32, %c0_i32_0 : i32, i32
  }
  func.func @transform_3(%arg0: i32) -> (i32, i32) {
    %c0_i32 = arith.constant 0 : i32
    %c0_i32_0 = arith.constant 0 : i32
    %c0_i32_1 = arith.constant 0 : i32
    return %c0_i32, %c0_i32_0 : i32, i32
  }
  func.func @transform_4(%arg0: i32) -> (i32, i32) {
    %c0_i32 = arith.constant 0 : i32
    %c0_i32_0 = arith.constant 0 : i32
    %c0_i32_1 = arith.constant 0 : i32
    return %c0_i32, %c0_i32_0 : i32, i32
  }
  func.func @transform_5(%arg0: i32) -> (i32, i32) {
    %c0_i32 = arith.constant 0 : i32
    %c0_i32_0 = arith.constant 0 : i32
    return %arg0, %c0_i32 : i32, i32
  }
}

</mosaic_0001>

<bundles_post_ra>
// kernel: cnn_forward.7
= control target key start
LH: loop header
LB: loop body
LE: loop exit
PB: predicated region body
PF: predicated region fallthrough
CT: control target
= control target key end

     0   :  { %s605_s6 = smov 0   ;;  %s1094_s0 = inlined_call_operand.vmem [shape: f32[2,14,2,14,32], index: 0, kind: input, shape index: {}]   ;;  %s1095_s1 = inlined_call_operand.vmem [shape: f32[2,14,14,16], index: 1, kind: output, shape index: {}]  }
   0x1 LB: > { %s566_s7 = sadd.s32 4294967295, %s592_s6   ;;  %p570_p0 = scmp.ge.s32.totalorder %s592_s6, 1  ;;  %s592_s6 = sphi %s605_s6, %s11_s6  }
   0x2   : > { %p87_p1 = scmp.lt.s32.totalorder %s592_s6, 3 }
   0x4   : > { %p88_p2 = pnand %p570_p0, %p87_p1 }
   0x6   : > { %91 = sbr.rel (%p88_p2) target bundleno = 284 (0x11c), region = 24 }
   0xb   : > { %p107_p3 = scmp.lt.s32.totalorder %s566_s7, 1  ;;  %s594_s12 = smov 112   ;;  %vm483_vm0 = vcmask 128000   ;;  %vm481_vm1 = vcmask 130048  }
   0xd   : > { %s1163_s7 = smov (!%p107_p3, %s566_s7), 1 }
   0xe   : > { %s575_s8 = smul.u32 448, %s1163_s7 }
   0xf   : > { %s576_s13 = smul.u32 224, %s1163_s7 }
  0x10   : > { %s619_s11 = scalar_lea.vmem %s1094_s0, %s575_s8 }
  0x11   : > { %v622_v0 = vld [vmem:[%s619_s11 + $0x40] sm:$0xff]  ;;  %v637_v3 = vld [vmem:[%s619_s11 + $0x48] sm:$0x3f]  ;;  %v757_v27 = vld [vmem:[%s619_s11 + $0x18] sm:$0x3f]  ;;  %s945_s16 = scalar_lea.vmem %s1095_s1, %s576_s13 }
  0x12   : > { %v625_v1 = vld [vmem:[%s619_s11 + $0x20] sm:$0xff]  ;;  %209 = vrot.lane.b32.xlu2 %v622_v0, %s594_s12  ;;  %v640_v4 = vld [vmem:[%s619_s11 + $0x28] sm:$0x3f]  ;;  %v760_v28 = vld [vmem:[%s619_s11 + $0x10] sm:$0xff] }
  0x13   : > { %v628_v2 = vld [vmem:[%s619_s11] sm:$0xff]  ;;  %205 = vrot.lane.b32.xlu1 %v625_v1, %s594_s12  ;;  %v643_v5 = vld [vmem:[%s619_s11 + $0x8] sm:$0x3f]  ;;  %v772_v30 = vld [vmem:[%s619_s11 + $0x50] sm:$0xff] }
  0x14   : > { %201 = vrot.lane.b32.xlu0 %v628_v2, %s594_s12  ;;  %v652_v6 = vld [vmem:[%s619_s11 + $0x80] sm:$0xff]  ;;  %v655_v7 = vld [vmem:[%s619_s11 + $0x68] sm:$0x3f]  ;;  %v775_v31 = vld [vmem:[%s619_s11 + $0x38] sm:$0x3f] }
  0x15   : > { %v658_v8 = vld [vmem:[%s619_s11 + $0x60] sm:$0xff]  ;;  %v667_v9 = vld [vmem:[%s619_s11 + $0xa8] sm:$0x3f]  ;;  %v778_v32 = vld [vmem:[%s619_s11 + $0x30] sm:$0xff] }
  0x16   : > { %v670_v10 = vld [vmem:[%s619_s11 + $0xa0] sm:$0xff]  ;;  %v673_v11 = vld [vmem:[%s619_s11 + $0x88] sm:$0x3f]  ;;  %v787_v33 = vld [vmem:[%s619_s11 + $0x78] sm:$0x3f] }
  0x17   : > { %v682_v12 = vld [vmem:[%s619_s11 + $0xe0] sm:$0xff]  ;;  %v685_v13 = vld [vmem:[%s619_s11 + $0xc8] sm:$0x3f]  ;;  %v790_v34 = vld [vmem:[%s619_s11 + $0x70] sm:$0xff] }
  0x18   : > { %1114 = vst [vmem:[#allocation2_spill] sm:$0xff] %v682_v12  ;;  %v688_v14 = vld [vmem:[%s619_s11 + $0xc0] sm:$0xff]  ;;  %v697_v15 = vld [vmem:[%s619_s11 + $0x108] sm:$0x3f]  ;;  %v793_v35 = vld [vmem:[%s619_s11 + $0x58] sm:$0x3f] }
  0x19   : > { %1115 = vst [vmem:[#allocation3_spill] sm:$0xff] %v697_v15  ;;  %v700_v16 = vld [vmem:[%s619_s11 + $0x100] sm:$0xff]  ;;  %v703_v17 = vld [vmem:[%s619_s11 + $0xe8] sm:$0x3f]  ;;  %v804_v37 = vld [vmem:[%s619_s11 + $0xb0] sm:$0xff] }
  0x1a   : > { %211 = vrot.lane.b32.xlu2 %v637_v3, %s594_s12  ;;  %v712_v18 = vld [vmem:[%s619_s11 + $0x140] sm:$0xff]  ;;  %v715_v19 = vld [vmem:[%s619_s11 + $0x128] sm:$0x3f]  ;;  %v807_v38 = vld [vmem:[%s619_s11 + $0x98] sm:$0x3f] }
  0x1b   : > { %207 = vrot.lane.b32.xlu1 %v640_v4, %s594_s12  ;;  %1116 = vst [vmem:[#allocation4_spill] sm:$0xff] %v712_v18  ;;  %v718_v20 = vld [vmem:[%s619_s11 + $0x120] sm:$0xff]  ;;  %v727_v21 = vld [vmem:[%s619_s11 + $0x168] sm:$0x3f]  ;;  %v810_v39 = vld [vmem:[%s619_s11 + $0x90] sm:$0xff] }
  0x1c   : > { %203 = vrot.lane.b32.xlu0 %v643_v5, %s594_s12  ;;  %1117 = vst [vmem:[#allocation5_spill] sm:$0xff] %v718_v20  ;;  %v730_v22 = vld [vmem:[%s619_s11 + $0x160] sm:$0xff]  ;;  %v733_v23 = vld [vmem:[%s619_s11 + $0x148] sm:$0x3f]  ;;  %v821_v41 = vld [vmem:[%s619_s11 + $0xd8] sm:$0x3f] }
  0x1d   : > { %1118 = vst [vmem:[#allocation6_spill] sm:$0xff] %v727_v21  ;;  %v742_v24 = vld [vmem:[%s619_s11 + $0x1a0] sm:$0xff]  ;;  %v745_v25 = vld [vmem:[%s619_s11 + $0x188] sm:$0x3f]  ;;  %v824_v42 = vld [vmem:[%s619_s11 + $0xd0] sm:$0xff] }
  0x1e   : > { %1119 = vst [vmem:[#allocation7_spill] sm:$0xff] %v733_v23  ;;  %v748_v26 = vld [vmem:[%s619_s11 + $0x180] sm:$0xff]  ;;  %v763_v29 = vld [vmem:[%s619_s11 + $0x1a8] sm:$0x3f]  ;;  %v827_v43 = vld [vmem:[%s619_s11 + $0xb8] sm:$0x3f] }
  0x1f   : > { %1120 = vst [vmem:[#allocation8_spill] sm:$0xff] %v742_v24  ;;  %v838_v45 = vld [vmem:[%s619_s11 + $0x110] sm:$0xff]  ;;  %v841_v46 = vld [vmem:[%s619_s11 + $0xf8] sm:$0x3f] }
  0x20   : > { %1121 = vst [vmem:[#allocation9_spill] sm:$0xff] %v748_v26  ;;  %v844_v47 = vld [vmem:[%s619_s11 + $0xf0] sm:$0xff]  ;;  %v859_v51 = vld [vmem:[%s619_s11 + $0x138] sm:$0x3f] }
  0x21   : > { %1122 = vst [vmem:[#allocation10_spill] sm:$0xff] %v763_v29  ;;  %v862_v52 = vld [vmem:[%s619_s11 + $0x130] sm:$0xff]  ;;  %v865_v53 = vld [vmem:[%s619_s11 + $0x118] sm:$0x3f] }
  0x22   : > { %217 = vrot.lane.b32.xlu2 %v652_v6, %s594_s12  ;;  %1123 = vst [vmem:[#allocation11_spill] sm:$0xff] %v844_v47  ;;  %v878_v57 = vld [vmem:[%s619_s11 + $0x170] sm:$0xff]  ;;  %v881_v58 = vld [vmem:[%s619_s11 + $0x158] sm:$0x3f] }
  0x23   : > { %215 = vrot.lane.b32.xlu1 %v655_v7, %s594_s12  ;;  %1124 = vst [vmem:[#allocation12_spill] sm:$0xff] %v862_v52  ;;  %v884_v59 = vld [vmem:[%s619_s11 + $0x150] sm:$0xff]  ;;  %v897_v63 = vld [vmem:[%s619_s11 + $0x198] sm:$0x3f] }
  0x24   : > { %213 = vrot.lane.b32.xlu0 %v658_v8, %s594_s12  ;;  %1125 = vst [vmem:[#allocation13_spill] sm:$0xff] %v865_v53 }
  0x25   : > { %1126 = vst [vmem:[#allocation14_spill] sm:$0xff] %v881_v58 }
  0x26   : > { %1127 = vst [vmem:[#allocation15_spill] sm:$0xff] %v884_v59 }
  0x2a   : > { %223 = vrot.lane.b32.xlu2 %v667_v9, %s594_s12 }
  0x2b   : > { %221 = vrot.lane.b32.xlu1 %v670_v10, %s594_s12 }
  0x2c   : > { %219 = vrot.lane.b32.xlu0 %v673_v11, %s594_s12 }
  0x32   : > { %229 = vrot.lane.b32.xlu2 %v682_v12, %s594_s12 }
  0x33   : > { %227 = vrot.lane.b32.xlu1 %v685_v13, %s594_s12 }
  0x34   : > { %225 = vrot.lane.b32.xlu0 %v688_v14, %s594_s12 }
  0x3a   : > { %235 = vrot.lane.b32.xlu2 %v697_v15, %s594_s12 }
  0x3b   : > { %233 = vrot.lane.b32.xlu1 %v700_v16, %s594_s12 }
  0x3c   : > { %231 = vrot.lane.b32.xlu0 %v703_v17, %s594_s12 }
  0x42   : > { %241 = vrot.lane.b32.xlu2 %v712_v18, %s594_s12  ;;  %v916_v18 = vld [vmem:[%s619_s11 + $0x1b8] sm:$0x3f] }
  0x43   : > { %239 = vrot.lane.b32.xlu1 %v715_v19, %s594_s12  ;;  %1132 = vst [vmem:[#allocation20_spill] sm:$0xff] %v916_v18 }
  0x44   : > { %237 = vrot.lane.b32.xlu0 %v718_v20, %s594_s12 }
  0x4a   : > { %247 = vrot.lane.b32.xlu2 %v727_v21, %s594_s12 }
  0x4b   : > { %245 = vrot.lane.b32.xlu1 %v730_v22, %s594_s12 }
  0x4c   : > { %243 = vrot.lane.b32.xlu0 %v733_v23, %s594_s12 }
  0x52   : > { %253 = vrot.lane.b32.xlu2 %v742_v24, %s594_s12  ;;  %v900_v24 = vld [vmem:[%s619_s11 + $0x190] sm:$0xff] }
  0x53   : > { %251 = vrot.lane.b32.xlu1 %v745_v25, %s594_s12  ;;  %1129 = vst [vmem:[#allocation17_spill] sm:$0xff] %v900_v24 }
  0x54   : > { %249 = vrot.lane.b32.xlu0 %v748_v26, %s594_s12 }
  0x5a   : > { %343 = vrot.lane.b32.xlu2 %v757_v27, %s594_s12 }
  0x5b   : > { %341 = vrot.lane.b32.xlu1 %v760_v28, %s594_s12 }
  0x5c   : > { %255 = vrot.lane.b32.xlu0 %v763_v29, %s594_s12  ;;  %v903_v29 = vld [vmem:[%s619_s11 + $0x178] sm:$0x3f] }
  0x5d   : > { %1130 = vst [vmem:[#allocation18_spill] sm:$0xff] %v903_v29 }
  0x62   : > { %349 = vrot.lane.b32.xlu2 %v772_v30, %s594_s12 }
  0x63   : > { %347 = vrot.lane.b32.xlu1 %v775_v31, %s594_s12 }
  0x64   : > { %345 = vrot.lane.b32.xlu0 %v778_v32, %s594_s12 }
  0x6a   : > { %355 = vrot.lane.b32.xlu2 %v787_v33, %s594_s12 }
  0x6b   : > { %353 = vrot.lane.b32.xlu1 %v790_v34, %s594_s12 }
  0x6c   : > { %351 = vrot.lane.b32.xlu0 %v793_v35, %s594_s12  ;;  %v801_v36 = vpop.permute.xlu2 %209 }
  0x72   : > { %361 = vrot.lane.b32.xlu2 %v804_v37, %s594_s12 }
  0x73   : > { %359 = vrot.lane.b32.xlu1 %v807_v38, %s594_s12 }
  0x74   : > { %357 = vrot.lane.b32.xlu0 %v810_v39, %s594_s12  ;;  %v818_v40 = vpop.permute.xlu2 %211 }
  0x7a   : > { %367 = vrot.lane.b32.xlu2 %v821_v41, %s594_s12 }
  0x7b   : > { %365 = vrot.lane.b32.xlu1 %v824_v42, %s594_s12 }
  0x7c   : > { %363 = vrot.lane.b32.xlu0 %v827_v43, %s594_s12  ;;  %v835_v44 = vpop.permute.xlu2 %217 }
  0x82   : > { %373 = vrot.lane.b32.xlu2 %v838_v45, %s594_s12 }
  0x83   : > { %371 = vrot.lane.b32.xlu1 %v841_v46, %s594_s12 }
  0x84   : > { %369 = vrot.lane.b32.xlu0 %v844_v47, %s594_s12  ;;  %v852_v48 = vpop.permute.xlu2 %223 }
  0x85   : > { %v854_v49 = vpop.permute.xlu1 %205 }
  0x86   : > { %v856_v50 = vpop.permute.xlu0 %201 }
  0x8a   : > { %379 = vrot.lane.b32.xlu2 %v859_v51, %s594_s12 }
  0x8b   : > { %377 = vrot.lane.b32.xlu1 %v862_v52, %s594_s12 }
  0x8c   : > { %375 = vrot.lane.b32.xlu0 %v865_v53, %s594_s12  ;;  %v873_v54 = vpop.permute.xlu2 %229 }
  0x8d   : > { %v875_v55 = vpop.permute.xlu1 %207 }
  0x8e   : > { %v204_v56 = vpop.permute.xlu0 %203 }
  0x92   : > { %385 = vrot.lane.b32.xlu2 %v878_v57, %s594_s12 }
  0x93   : > { %383 = vrot.lane.b32.xlu1 %v881_v58, %s594_s12  ;;  %v919_v58 = vld [vmem:[%s619_s11 + $0x1b0] sm:$0xff] }
  0x94   : > { %381 = vrot.lane.b32.xlu0 %v884_v59, %s594_s12  ;;  %v892_v60 = vpop.permute.xlu2 %235  ;;  %1133 = vst [vmem:[#allocation21_spill] sm:$0xff] %v919_v58 }
  0x95   : > { %1128 = vst [vmem:[#allocation16_spill] sm:$0xff] %v892_v60  ;;  %v216_v61 = vpop.permute.xlu1 %215 }
  0x96   : > { %v894_v62 = vpop.permute.xlu0 %213 }
  0x9a   : > { %391 = vrot.lane.b32.xlu2 %v897_v63, %s594_s12 }
  0x9b   : > { %389 = vrot.lane.b32.xlu1 %v900_v24, %s594_s12 }
  0x9c   : > { %387 = vrot.lane.b32.xlu0 %v903_v29, %s594_s12  ;;  %v911_v21 = vpop.permute.xlu2 %241 }
  0x9d   : > { %1131 = vst [vmem:[#allocation19_spill] sm:$0xff] %v911_v21  ;;  %v222_v26 = vpop.permute.xlu1 %221 }
  0x9e   : > { %v913_v59 = vpop.permute.xlu0 %219 }
  0xa3   : > { %395 = vrot.lane.b32.xlu1 %v916_v18, %s594_s12  ;;  %v286_v18 = vmax.f32 %v643_v5, %v204_v56  ;;  %v289_v5 = vmax.f32 %v622_v0, %v801_v36 }
  0xa4   : > { %393 = vrot.lane.b32.xlu0 %v919_v58, %s594_s12  ;;  %v925_v23 = vpop.permute.xlu2 %247 }
  0xa5   : > { %1134 = vst [vmem:[#allocation22_spill] sm:$0xff] %v925_v23  ;;  %v228_v24 = vpop.permute.xlu1 %227 }
  0xa6   : > { %v927_v53 = vpop.permute.xlu0 %225 }
  0xac   : > { %v929_v29 = vpop.permute.xlu2 %253 }
  0xad   : > { %1135 = vst [vmem:[#allocation23_spill] sm:$0xff] %v929_v29  ;;  %v931_v21 = vpop.permute.xlu1 %233 }
  0xae   : > { %v933_v15 = vpop.permute.xlu0 %231 }
  0xb4   : > { %v344_v52 = vpop.permute.xlu2 %343 }
  0xb5   : > { %v936_v60 = vpop.permute.xlu1 %239  ;;  %v426_v20 = vmax.f32 %v757_v27, %v344_v52 }
  0xb6   : > { %v940_v58 = vpop.permute.xlu0 %237 }
  0xb7   : > { %1136 = vst [vmem:[#allocation24_spill] sm:$0xff] %v940_v58  ;;  %v454_v29 = vmax.f32 %v286_v18, %v426_v20  ;;  %v292_v20 = vmax.f32 %v655_v7, %v216_v61 }
  0xb9   : > { %484 = vst.msk [vmem:[%s945_s16 + $0x8] sm:$0x3f] %vm483_vm0, %v454_v29 }
  0xbc   : > { %v350_v47 = vpop.permute.xlu2 %349 }
  0xbd   : > { %v949_v23 = vpop.permute.xlu1 %245  ;;  %v429_v27 = vmax.f32 %v772_v30, %v350_v47  ;;  %v285_v47 = vmax.f32 %v628_v2, %v856_v50  ;;  %v288_v2 = vmax.f32 %v640_v4, %v875_v55  ;;  %v287_v50 = vmax.f32 %v625_v1, %v854_v49 }
  0xbe   : > { %v954_v52 = vpop.permute.xlu0 %243  ;;  %v301_v1 = vmax.f32 %v700_v16, %v931_v21  ;;  %v290_v49 = vmax.f32 %v637_v3, %v818_v40  ;;  %v294_v21 = vmax.f32 %v673_v11, %v913_v59  ;;  %v304_v3 = vmax.f32 %v715_v19, %v936_v60 }
  0xbf   : > { %1137 = vst [vmem:[#allocation25_spill] sm:$0xff] %v954_v52  ;;  %v457_v56 = vmax.f32 %v289_v5, %v429_v27  ;;  %v295_v5 = vmax.f32 %v670_v10, %v222_v26  ;;  %v298_v10 = vmax.f32 %v685_v13, %v228_v24  ;;  %v291_v24 = vmax.f32 %v658_v8, %v894_v62 }
  0xc0   : > { %v296_v59 = vmax.f32 %v667_v9, %v852_v48 }
  0xc1   : > { %487 = vst.msk [vmem:[%s945_s16 + $0x20] sm:$0xff] %vm481_vm1, %v457_v56 }
  0xc4   : > { %v356_v18 = vpop.permute.xlu2 %355 }
  0xc5   : > { %v958_v58 = vpop.permute.xlu1 %251  ;;  %v432_v29 = vmax.f32 %v787_v33, %v356_v18 }
  0xc6   : > { %v962_v12 = vpop.permute.xlu0 %249  ;;  %v310_v9 = vmax.f32 %v745_v25, %v958_v58  ;;  %v1141_v25 = vld [vmem:[#allocation5_spill] sm:$0xff]  ;;  %v1142_v58 = vld [vmem:[#allocation12_spill] sm:$0xff] }
  0xc7   : > { %v460_v0 = vmax.f32 %v292_v20, %v432_v29 }
  0xc9   : > { %490 = vst.msk [vmem:[%s945_s16 + $0x38] sm:$0x3f] %vm483_vm0, %v460_v0 }
  0xcc   : > { %v362_v30 = vpop.permute.xlu2 %361 }
  0xcd   : > { %v342_v36 = vpop.permute.xlu1 %341  ;;  %v435_v27 = vmax.f32 %v804_v37, %v362_v30 }
  0xce   : > { %v425_v56 = vmax.f32 %v760_v28, %v342_v36  ;;  %v971_v52 = vpop.permute.xlu0 %255 }
  0xcf   : > { %v463_v7 = vmax.f32 %v295_v5, %v435_v27 }
  0xd0   : > { %v453_v33 = vmax.f32 %v285_v47, %v425_v56 }
  0xd1   : > { %493 = vst.msk [vmem:[%s945_s16 + $0x50] sm:$0xff] %vm481_vm1, %v463_v7 }
  0xd2   : > { %482 = vst.msk [vmem:[%s945_s16] sm:$0xff] %vm481_vm1, %v453_v33 }
  0xd4   : > { %v368_v61 = vpop.permute.xlu2 %367 }
  0xd5   : > { %v348_v18 = vpop.permute.xlu1 %347  ;;  %v438_v26 = vmax.f32 %v821_v41, %v368_v61 }
  0xd6   : > { %v428_v28 = vmax.f32 %v775_v31, %v348_v18  ;;  %v346_v37 = vpop.permute.xlu0 %345 }
  0xd7   : > { %v427_v20 = vmax.f32 %v778_v32, %v346_v37  ;;  %v466_v29 = vmax.f32 %v298_v10, %v438_v26 }
  0xd8   : > { %v456_v0 = vmax.f32 %v288_v2, %v428_v28  ;;  %v1139_v2 = vld [vmem:[#allocation11_spill] sm:$0xff] }
  0xd9   : > { %v455_v30 = vmax.f32 %v287_v50, %v427_v20  ;;  %496 = vst.msk [vmem:[%s945_s16 + $0x68] sm:$0x3f] %vm483_vm0, %v466_v29  ;;  %v1143_v50 = vld [vmem:[#allocation16_spill] sm:$0xff]  ;;  %v1144_v20 = vld [vmem:[#allocation3_spill] sm:$0xff] }
  0xda   : > { %486 = vst.msk [vmem:[%s945_s16 + $0x18] sm:$0x3f] %vm483_vm0, %v456_v0  ;;  %v302_v29 = vmax.f32 %v1144_v20, %v1143_v50  ;;  %v1145_v0 = vld [vmem:[#allocation13_spill] sm:$0xff] }
  0xdb   : > { %485 = vst.msk [vmem:[%s945_s16 + $0x10] sm:$0xff] %vm481_vm1, %v455_v30 }
  0xdc   : > { %v374_v4 = vpop.permute.xlu2 %373 }
  0xdd   : > { %v354_v13 = vpop.permute.xlu1 %353  ;;  %v441_v31 = vmax.f32 %v838_v45, %v374_v4  ;;  %v293_v45 = vmax.f32 %v652_v6, %v835_v44  ;;  %v307_v6 = vmax.f32 %v730_v22, %v949_v23  ;;  %v300_v23 = vmax.f32 %v703_v17, %v933_v15  ;;  %v1140_v17 = vld [vmem:[#allocation24_spill] sm:$0xff] }
  0xde   : > { %v431_v32 = vmax.f32 %v790_v34, %v354_v13  ;;  %v352_v41 = vpop.permute.xlu0 %351 }
  0xdf   : > { %v430_v55 = vmax.f32 %v793_v35, %v352_v41  ;;  %v469_v36 = vmax.f32 %v301_v1, %v441_v31  ;;  %v1146_v1 = vld [vmem:[#allocation25_spill] sm:$0xff]  ;;  %v1147_v31 = vld [vmem:[#allocation7_spill] sm:$0xff]  ;;  %v1148_v41 = vld [vmem:[#allocation14_spill] sm:$0xff] }
  0xe0   : > { %v459_v47 = vmax.f32 %v291_v24, %v431_v32  ;;  %v306_v32 = vmax.f32 %v1147_v31, %v1146_v1 }
  0xe1   : > { %v458_v5 = vmax.f32 %v290_v49, %v430_v55  ;;  %499 = vst.msk [vmem:[%s945_s16 + $0x80] sm:$0xff] %vm481_vm1, %v469_v36  ;;  %v1149_v36 = vld [vmem:[#allocation19_spill] sm:$0xff] }
  0xe2   : > { %489 = vst.msk [vmem:[%s945_s16 + $0x30] sm:$0xff] %vm481_vm1, %v459_v47  ;;  %v1150_v47 = vld [vmem:[#allocation4_spill] sm:$0xff] }
  0xe3   : > { %488 = vst.msk [vmem:[%s945_s16 + $0x28] sm:$0x3f] %vm483_vm0, %v458_v5  ;;  %v305_v5 = vmax.f32 %v1150_v47, %v1149_v36 }
  0xe4   : > { %v380_v8 = vpop.permute.xlu2 %379 }
  0xe5   : > { %v360_v16 = vpop.permute.xlu1 %359  ;;  %v444_v34 = vmax.f32 %v859_v51, %v380_v8  ;;  %v1151_v8 = vld [vmem:[#allocation15_spill] sm:$0xff] }
  0xe6   : > { %v434_v35 = vmax.f32 %v807_v38, %v360_v16  ;;  %v358_v40 = vpop.permute.xlu0 %357  ;;  %v297_v38 = vmax.f32 %v688_v14, %v927_v53  ;;  %v1138_v53 = vld [vmem:[#allocation2_spill] sm:$0xff] }
  0xe7   : > { %v433_v62 = vmax.f32 %v810_v39, %v358_v40  ;;  %v472_v27 = vmax.f32 %v304_v3, %v444_v34 }
  0xe8   : > { %v462_v56 = vmax.f32 %v294_v21, %v434_v35  ;;  %v1152_v35 = vld [vmem:[#allocation9_spill] sm:$0xff] }
  0xe9   : > { %v461_v7 = vmax.f32 %v293_v45, %v433_v62  ;;  %502 = vst.msk [vmem:[%s945_s16 + $0x98] sm:$0x3f] %vm483_vm0, %v472_v27  ;;  %v309_v40 = vmax.f32 %v1152_v35, %v962_v12  ;;  %v1153_v45 = vld [vmem:[#allocation17_spill] sm:$0xff] }
  0xea   : > { %492 = vst.msk [vmem:[%s945_s16 + $0x48] sm:$0x3f] %vm483_vm0, %v462_v56  ;;  %v1154_v56 = vld [vmem:[#allocation22_spill] sm:$0xff] }
  0xeb   : > { %491 = vst.msk [vmem:[%s945_s16 + $0x40] sm:$0xff] %vm481_vm1, %v461_v7  ;;  %v1155_v7 = vld [vmem:[#allocation6_spill] sm:$0xff] }
  0xec   : > { %v386_v11 = vpop.permute.xlu2 %385 }
  0xed   : > { %v366_v19 = vpop.permute.xlu1 %365  ;;  %v447_v39 = vmax.f32 %v878_v57, %v386_v11  ;;  %v299_v57 = vmax.f32 %v1138_v53, %v873_v54  ;;  %v308_v11 = vmax.f32 %v1155_v7, %v1154_v56 }
  0xee   : > { %v437_v44 = vmax.f32 %v824_v42, %v366_v19  ;;  %v364_v51 = vpop.permute.xlu0 %363  ;;  %v1156_v19 = vld [vmem:[#allocation18_spill] sm:$0xff] }
  0xef   : > { %v436_v60 = vmax.f32 %v827_v43, %v364_v51  ;;  %v475_v33 = vmax.f32 %v307_v6, %v447_v39  ;;  %v1157_v51 = vld [vmem:[#allocation10_spill] sm:$0xff] }
  0xf0   : > { %v465_v61 = vmax.f32 %v297_v38, %v437_v44  ;;  %v312_v12 = vmax.f32 %v1157_v51, %v971_v52 }
  0xf1   : > { %v464_v18 = vmax.f32 %v296_v59, %v436_v60  ;;  %505 = vst.msk [vmem:[%s945_s16 + $0xb0] sm:$0xff] %vm481_vm1, %v475_v33  ;;  %v1158_v59 = vld [vmem:[#allocation20_spill] sm:$0xff] }
  0xf2   : > { %495 = vst.msk [vmem:[%s945_s16 + $0x60] sm:$0xff] %vm481_vm1, %v465_v61  ;;  %v1159_v61 = vld [vmem:[#allocation23_spill] sm:$0xff] }
  0xf3   : > { %494 = vst.msk [vmem:[%s945_s16 + $0x58] sm:$0x3f] %vm483_vm0, %v464_v18  ;;  %v1160_v18 = vld [vmem:[#allocation8_spill] sm:$0xff] }
  0xf4   : > { %v392_v14 = vpop.permute.xlu2 %391 }
  0xf5   : > { %v372_v22 = vpop.permute.xlu1 %371  ;;  %v450_v42 = vmax.f32 %v897_v63, %v392_v14  ;;  %v311_v14 = vmax.f32 %v1160_v18, %v1159_v61 }
  0xf6   : > { %v440_v43 = vmax.f32 %v841_v46, %v372_v22  ;;  %v370_v48 = vpop.permute.xlu0 %369  ;;  %v303_v46 = vmax.f32 %v1141_v25, %v1140_v17  ;;  %v1161_v22 = vld [vmem:[#allocation21_spill] sm:$0xff] }
  0xf7   : > { %v439_v10 = vmax.f32 %v1139_v2, %v370_v48  ;;  %v478_v26 = vmax.f32 %v310_v9, %v450_v42 }
  0xf8   : > { %v468_v28 = vmax.f32 %v300_v23, %v440_v43 }
  0xf9   : > { %v467_v37 = vmax.f32 %v299_v57, %v439_v10  ;;  %508 = vst.msk [vmem:[%s945_s16 + $0xc8] sm:$0x3f] %vm483_vm0, %v478_v26 }
  0xfa   : > { %498 = vst.msk [vmem:[%s945_s16 + $0x78] sm:$0x3f] %vm483_vm0, %v468_v28 }
  0xfb   : > { %497 = vst.msk [vmem:[%s945_s16 + $0x70] sm:$0xff] %vm481_vm1, %v467_v37 }
  0xfd   : > { %v378_v15 = vpop.permute.xlu1 %377 }
  0xfe   : > { %v443_v63 = vmax.f32 %v1142_v58, %v378_v15  ;;  %v376_v54 = vpop.permute.xlu0 %375 }
  0xff   : > { %v442_v30 = vmax.f32 %v1145_v0, %v376_v54 }
 0x100   : > { %v471_v4 = vmax.f32 %v303_v46, %v443_v63 }
 0x101   : > { %v470_v13 = vmax.f32 %v302_v29, %v442_v30 }
 0x102   : > { %501 = vst.msk [vmem:[%s945_s16 + $0x90] sm:$0xff] %vm481_vm1, %v471_v4 }
 0x103   : > { %500 = vst.msk [vmem:[%s945_s16 + $0x88] sm:$0x3f] %vm483_vm0, %v470_v13 }
 0x105   : > { %v384_v24 = vpop.permute.xlu1 %383 }
 0x106   : > { %v446_v49 = vmax.f32 %v1148_v41, %v384_v24  ;;  %v382_v55 = vpop.permute.xlu0 %381 }
 0x107   : > { %v445_v16 = vmax.f32 %v1151_v8, %v382_v55 }
 0x108   : > { %v474_v21 = vmax.f32 %v306_v32, %v446_v49 }
 0x109   : > { %v473_v3 = vmax.f32 %v305_v5, %v445_v16 }
 0x10a   : > { %504 = vst.msk [vmem:[%s945_s16 + $0xa8] sm:$0x3f] %vm483_vm0, %v474_v21 }
 0x10b   : > { %503 = vst.msk [vmem:[%s945_s16 + $0xa0] sm:$0xff] %vm481_vm1, %v473_v3 }
 0x10d   : > { %v390_v34 = vpop.permute.xlu1 %389 }
 0x10e   : > { %v449_v62 = vmax.f32 %v1153_v45, %v390_v34  ;;  %v388_v27 = vpop.permute.xlu0 %387 }
 0x10f   : > { %v448_v38 = vmax.f32 %v1156_v19, %v388_v27 }
 0x110   : > { %v477_v6 = vmax.f32 %v309_v40, %v449_v62 }
 0x111   : > { %v476_v39 = vmax.f32 %v308_v11, %v448_v38 }
 0x112   : > { %507 = vst.msk [vmem:[%s945_s16 + $0xc0] sm:$0xff] %vm481_vm1, %v477_v6 }
 0x113   : > { %506 = vst.msk [vmem:[%s945_s16 + $0xb8] sm:$0x3f] %vm483_vm0, %v476_v39 }
 0x115   : > { %v396_v44 = vpop.permute.xlu1 %395 }
 0x116   : > { %v452_v60 = vmax.f32 %v1158_v59, %v396_v44  ;;  %v394_v33 = vpop.permute.xlu0 %393 }
 0x117   : > { %v451_v23 = vmax.f32 %v1161_v22, %v394_v33 }
 0x118   : > { %v480_v9 = vmax.f32 %v312_v12, %v452_v60 }
 0x119   : > { %v479_v42 = vmax.f32 %v311_v14, %v451_v23 }
 0x11a   : > { %510 = vst.msk [vmem:[%s945_s16 + $0xd8] sm:$0x3f] %vm483_vm0, %v480_v9 }
 0x11b   : > { %509 = vst.msk [vmem:[%s945_s16 + $0xd0] sm:$0xff] %vm481_vm1, %v479_v42 }
 0x11c PF: > { %s11_s6 = sadd.s32 1, %s592_s6  }
 0x11d   : > { %p8_p4 = scmp.ge.s32.totalorder %s11_s6, 4  }
 0x11f   :  { %10 = sbr.rel (!%p8_p4) target bundleno = 1 (0x1), region = 54 }

// kernel: cnn_forward.6
= control target key start
LH: loop header
LB: loop body
LE: loop exit
PB: predicated region body
PF: predicated region fallthrough
CT: control target
= control target key end

     0   :  { %s948_s12 = smov 0   ;;  %s1265_s0 = inlined_call_operand.vmem [shape: f32[2,30,30], index: 0, kind: input, shape index: {}]   ;;  %s1266_s1 = inlined_call_operand.vmem [shape: bf16[3,30,448], index: 1, kind: input, shape index: {}]   ;;  %s1267_s2 = inlined_call_operand.vmem [shape: f32[1,448], index: 2, kind: input, shape index: {}]   ;;  %s1268_s3 = inlined_call_operand.vmem [shape: f32[2,28,448], index: 3, kind: output, shape index: {}]  }
   0x1 LB: > { %s739_s13 = sadd.s32 4294967295, %s926_s12   ;;  %p743_p0 = scmp.ge.s32.totalorder %s926_s12, 1  ;;  %s926_s12 = sphi %s948_s12, %s13_s12  }
   0x2   : > { %p137_p1 = scmp.lt.s32.totalorder %s926_s12, 3 }
   0x4   : > { %p138_p2 = pnand %p743_p0, %p137_p1 }
   0x5   : > { %p962_p3 = scmp.lt.s32.totalorder (!%p138_p2), %s739_s13, 1 }
   0x6   : > { %141 = sbr.rel (%p138_p2) target bundleno = 252 (0xfc), region = 32 }
   0xb   : > { %v774_v0 = vld [vmem:[%s1266_s1 + $0x60] sm:$0xf]  ;;  %v902_v1 = vld [vmem:[%s1266_s1 + $0x6c] sm:$0x70]  ;;  %vm244_vm0 = vcmask 1046528   ;;  %s1271_s13 = smov (!%p962_p3, %s739_s13), 1 }
   0xc   : > { %v775_v2 = vor.u32 %v902_v1, %v774_v0  ;;  %v900_v3 = vld [vmem:[%s1266_s1 + $0x64] sm:$0xf]  ;;  %v776_v4 = vld [vmem:[%s1266_s1 + $0x70] sm:$0x70]  ;;  %v782_v5 = vld [vmem:[%s1266_s1 + $0x68] sm:$0xf] }
   0xd   : > { %v779_v6 = vor.u32 %v900_v3, %v776_v4  ;;  %v903_v7 = vld [vmem:[%s1266_s1 + $0x74] sm:$0x70]  ;;  %v901_v8 = vld [vmem:[%s1266_s1 + $0x6c] sm:$0xf]  ;;  %v784_v9 = vld [vmem:[%s1266_s1 + $0x78] sm:$0x70] }
   0xe   : > { %v246_v10 = vsel %vm244_vm0, %v775_v2, 0  ;;  %v783_v11 = vor.u32 %v903_v7, %v782_v5  ;;  %v787_v12 = vor.u32 %v901_v8, %v784_v9  ;;  %v758_v13 = vld [vmem:[%s1266_s1 + $0x40] sm:$0xf]  ;;  %v898_v14 = vld [vmem:[%s1266_s1 + $0x4c] sm:$0xf0]  ;;  %s886_s22 = sshll.u32 %s1271_s13, 5 }
   0xf   : > { %263 = vmatpush.bf16.msra.mxu0 %v246_v10  ;;  %v249_v15 = vsel %vm244_vm0, %v779_v6, 0  ;;  %v759_v16 = vor.u32 %v898_v14, %v758_v13  ;;  %v896_v17 = vld [vmem:[%s1266_s1 + $0x44] sm:$0xf]  ;;  %v760_v18 = vld [vmem:[%s1266_s1 + $0x50] sm:$0xf0]  ;;  %s1020_s25 = scalar_lea.vmem %s1265_s0, %s886_s22  ;;  %vm237_vm1 = vcmask 244736  }
  0x10   : > { %282 = vmatpush.bf16.msra.mxu1 %v249_v15  ;;  %v252_v19 = vsel %vm244_vm0, %v783_v11, 0  ;;  %v255_v20 = vsel %vm244_vm0, %v787_v12, 0  ;;  %v763_v21 = vor.u32 %v896_v17, %v760_v18  ;;  %v766_v22 = vld [vmem:[%s1266_s1 + $0x48] sm:$0xf]  ;;  %v899_v23 = vld [vmem:[%s1266_s1 + $0x54] sm:$0xf0] }
  0x11   : > { %301 = vmatpush.bf16.msra.mxu2 %v252_v19  ;;  %320 = vmatpush.bf16.msra.mxu3 %v255_v20  ;;  %v767_v24 = vor.u32 %v899_v23, %v766_v22  ;;  %v897_v25 = vld [vmem:[%s1266_s1 + $0x4c] sm:$0xf]  ;;  %v768_v26 = vld [vmem:[%s1266_s1 + $0x58] sm:$0xf0]  ;;  %v822_v28 = vld [vmem:[%s1266_s1 + $0x28] sm:$0xf] }
  0x12   : > { %v771_v27 = vor.u32 %v897_v25, %v768_v26  ;;  %v895_v29 = vld [vmem:[%s1266_s1 + $0x34] sm:$0x70]  ;;  %v893_v30 = vld [vmem:[%s1266_s1 + $0x2c] sm:$0xf]  ;;  %v186_v31 = vld [vmem:[%s1020_s25 + $0x1] sm:$0xff]  ;;  %s887_s18 = sshll.u32 %s1271_s13, 7 }
  0x13   : > { %264 = vmatpush.bf16.msra.mxu0 %v759_v16  ;;  %v187_v32 = vld [vmem:[%s1020_s25 + $0x9] sm:$0xff]  ;;  %v823_v33 = vor.u32 %v895_v29, %v822_v28  ;;  %v824_v34 = vld [vmem:[%s1266_s1 + $0x38] sm:$0x70]  ;;  %v814_v37 = vld [vmem:[%s1266_s1 + $0x20] sm:$0xf]  ;;  %s1207_s21 = scalar_lea.vmem %s1268_s3, %s887_s18  ;;  %vm669_vm2 = vcmask 523264  }
  0x14   : > { %283 = vmatpush.bf16.msra.mxu1 %v763_v21  ;;  %v190_v35 = vpack.c.bf16 %v187_v32, %v186_v31  ;;  %v827_v36 = vor.u32 %v893_v30, %v824_v34  ;;  %v894_v38 = vld [vmem:[%s1266_s1 + $0x2c] sm:$0x70]  ;;  %v892_v39 = vld [vmem:[%s1266_s1 + $0x24] sm:$0xf]  ;;  %v816_v42 = vld [vmem:[%s1266_s1 + $0x30] sm:$0x70] }
  0x15   : > { %302 = vmatpush.bf16.msra.mxu2 %v767_v24  ;;  %321 = vmatpush.bf16.msra.mxu3 %v771_v27  ;;  %v382_v40 = vsel %vm244_vm0, %v823_v33, 0  ;;  %v815_v41 = vor.u32 %v894_v38, %v814_v37  ;;  %v819_v44 = vor.u32 %v892_v39, %v816_v42  ;;  %v806_v45 = vld [vmem:[%s1266_s1 + $0x8] sm:$0xf]  ;;  %v891_v46 = vld [vmem:[%s1266_s1 + $0x14] sm:$0xf0]  ;;  %v172_v26 = vld [vmem:[%s1020_s25] sm:$0xff] }
  0x16   : > { %788 = vmatmul.msk.bf16.vlgmr.msra.gmra.mxu0 %vm237_vm1, %v190_v35  ;;  %v385_v43 = vsel %vm244_vm0, %v827_v36, 0  ;;  %v807_v48 = vor.u32 %v891_v46, %v806_v45  ;;  %v889_v49 = vld [vmem:[%s1266_s1 + $0xc] sm:$0xf]  ;;  %v808_v50 = vld [vmem:[%s1266_s1 + $0x18] sm:$0xf0]  ;;  %v188_v10 = vld [vmem:[%s1020_s25 + $0x11] sm:$0xff] }
  0x17   : > { %790 = vmatmul.msk.bf16.vlgmr.msra.gmra.mxu1 %vm237_vm1, %v190_v35  ;;  %v376_v47 = vsel %vm244_vm0, %v815_v41, 0  ;;  %v379_v51 = vsel %vm244_vm0, %v819_v44, 0  ;;  %v811_v52 = vor.u32 %v889_v49, %v808_v50  ;;  %v798_v53 = vld [vmem:[%s1266_s1] sm:$0xf]  ;;  %v890_v54 = vld [vmem:[%s1266_s1 + $0xc] sm:$0xf0] }
  0x18   : > { %792 = vmatmul.msk.bf16.vlgmr.msra.gmra.mxu2 %vm237_vm1, %v190_v35  ;;  %794 = vmatmul.msk.bf16.vlgmr.msra.gmra.mxu3 %vm237_vm1, %v190_v35  ;;  %v799_v55 = vor.u32 %v890_v54, %v798_v53  ;;  %v888_v56 = vld [vmem:[%s1266_s1 + $0x4] sm:$0xf]  ;;  %v800_v57 = vld [vmem:[%s1266_s1 + $0x10] sm:$0xf0]  ;;  %v870_v58 = vld [vmem:[%s1266_s1 + $0xa8] sm:$0xf] }
  0x19   : > { %431 = vmatpush.bf16.msrb.mxu2 %v382_v40  ;;  %450 = vmatpush.bf16.msrb.mxu3 %v385_v43  ;;  %v803_v59 = vor.u32 %v888_v56, %v800_v57  ;;  %v911_v60 = vld [vmem:[%s1266_s1 + $0xb4] sm:$0x70]  ;;  %v909_v61 = vld [vmem:[%s1266_s1 + $0xac] sm:$0xf]  ;;  %v872_v62 = vld [vmem:[%s1266_s1 + $0xb8] sm:$0x70] }
  0x1a   : > { %393 = vmatpush.bf16.msrb.mxu0 %v376_v47  ;;  %412 = vmatpush.bf16.msrb.mxu1 %v379_v51  ;;  %v871_v63 = vor.u32 %v911_v60, %v870_v58  ;;  %v875_v0 = vor.u32 %v909_v61, %v872_v62  ;;  %v862_v1 = vld [vmem:[%s1266_s1 + $0xa0] sm:$0xf]  ;;  %v910_v2 = vld [vmem:[%s1266_s1 + $0xac] sm:$0x70]  ;;  %v908_v3 = vld [vmem:[%s1266_s1 + $0xa4] sm:$0xf] }
  0x1b   : > { %v863_v4 = vor.u32 %v910_v2, %v862_v1  ;;  %v864_v5 = vld [vmem:[%s1266_s1 + $0xb0] sm:$0x70]  ;;  %v189_v11 = vld [vmem:[%s1020_s25 + $0x19] sm:$0xf]  ;;  %v854_v14 = vld [vmem:[%s1266_s1 + $0x88] sm:$0xf] }
  0x1c   : > { %v527_v6 = vsel %vm244_vm0, %v871_v63, 0  ;;  %v530_v7 = vsel %vm244_vm0, %v875_v0, 0  ;;  %v867_v8 = vor.u32 %v908_v3, %v864_v5  ;;  %v191_v13 = vpack.c.bf16 %v189_v11, %v188_v10  ;;  %v907_v15 = vld [vmem:[%s1266_s1 + $0x94] sm:$0xf0]  ;;  %v905_v16 = vld [vmem:[%s1266_s1 + $0x8c] sm:$0xf] }
  0x1d   : > { %432 = vmatpush.bf16.msrb.mxu2 %v807_v48  ;;  %451 = vmatpush.bf16.msrb.mxu3 %v811_v52  ;;  %v521_v9 = vsel %vm244_vm0, %v863_v4, 0  ;;  %v855_v17 = vor.u32 %v907_v15, %v854_v14  ;;  %v856_v18 = vld [vmem:[%s1266_s1 + $0x98] sm:$0xf0]  ;;  %v846_v19 = vld [vmem:[%s1266_s1 + $0x80] sm:$0xf]  ;;  %v173_v27 = vld [vmem:[%s1020_s25 + $0x8] sm:$0xff] }
  0x1e   : > { %394 = vmatpush.bf16.msrb.mxu0 %v799_v55  ;;  %413 = vmatpush.bf16.msrb.mxu1 %v803_v59  ;;  %v524_v12 = vsel %vm244_vm0, %v867_v8, 0  ;;  %v906_v20 = vld [vmem:[%s1266_s1 + $0x8c] sm:$0xf0]  ;;  %v859_v21 = vor.u32 %v905_v16, %v856_v18  ;;  %v904_v23 = vld [vmem:[%s1266_s1 + $0x84] sm:$0xf]  ;;  %v176_v28 = vpack.c.bf16 %v173_v27, %v172_v26  ;;  %vm682_vm3 = vcmask 519168  }
  0x1f   : > { %v847_v22 = vor.u32 %v906_v20, %v846_v19  ;;  %v848_v24 = vld [vmem:[%s1266_s1 + $0x90] sm:$0xf0]  ;;  %v175_v30 = vld [vmem:[%s1020_s25 + $0x18] sm:$0xf]  ;;  %v463_v32 = vld [vmem:[%s1020_s25 + $0x2] sm:$0xff] }
  0x20   : > { %v851_v25 = vor.u32 %v904_v23, %v848_v24  ;;  %v174_v29 = vld [vmem:[%s1020_s25 + $0x10] sm:$0xff]  ;;  %v466_v36 = vld [vmem:[%s1020_s25 + $0x1a] sm:$0xf]  ;;  %v624_v4 = vld [vmem:[%s1267_s2] sm:$0xf] }
  0x21   : > { %576 = vmatpush.bf16.msra.mxu2 %v527_v6  ;;  %595 = vmatpush.bf16.msra.mxu3 %v530_v7  ;;  %v177_v31 = vpack.c.bf16 %v175_v30, %v174_v29  ;;  %v464_v33 = vld [vmem:[%s1020_s25 + $0xa] sm:$0xff]  ;;  %v465_v35 = vld [vmem:[%s1020_s25 + $0x12] sm:$0xff]  ;;  %v1199_v10 = vperm.slane %v624_v4, 1 }
  0x22   : > { %538 = vmatpush.bf16.msra.mxu0 %v521_v9  ;;  %557 = vmatpush.bf16.msra.mxu1 %v524_v12  ;;  %v467_v34 = vpack.c.bf16 %v464_v33, %v463_v32  ;;  %v468_v37 = vpack.c.bf16 %v466_v36, %v465_v35  ;;  %v1197_v9 = vperm.slane %v624_v4, 0 }
  0x25   : > { %577 = vmatpush.bf16.msra.mxu2 %v855_v17  ;;  %596 = vmatpush.bf16.msra.mxu3 %v859_v21  ;;  %v1209_v21 = vperm.slane %v624_v4, 2 }
  0x26   : > { %789 = vmatmul.msk.bf16.gmra.mxu0 %vm237_vm1, %v191_v13  ;;  %558 = vmatpush.bf16.msra.mxu1 %v851_v25 }
  0x27   : > { %791 = vmatmul.msk.bf16.gmra.mxu1 %vm237_vm1, %v191_v13  ;;  %539 = vmatpush.bf16.msra.mxu0 %v847_v22  ;;  %v1211_v22 = vperm.slane %v624_v4, 3 }
  0x28   : > { %793 = vmatmul.msk.bf16.gmra.mxu2 %vm237_vm1, %v191_v13  ;;  %795 = vmatmul.msk.bf16.gmra.mxu3 %vm237_vm1, %v191_v13 }
  0x36   : > { %828 = vmatmul.msk.bf16.vlgmr.msrb.gmra.mxu0 %vm237_vm1, %v176_v28 }
  0x37   : > { %830 = vmatmul.msk.bf16.vlgmr.msrb.gmra.mxu1 %vm237_vm1, %v176_v28 }
  0x38   : > { %832 = vmatmul.msk.bf16.vlgmr.msrb.gmra.mxu2 %vm237_vm1, %v176_v28  ;;  %834 = vmatmul.msk.bf16.vlgmr.msrb.gmra.mxu3 %vm237_vm1, %v176_v28 }
  0x46   : > { %829 = vmatmul.msk.bf16.gmra.mxu0 %vm237_vm1, %v177_v31 }
  0x47   : > { %831 = vmatmul.msk.bf16.gmra.mxu1 %vm237_vm1, %v177_v31 }
  0x48   : > { %833 = vmatmul.msk.bf16.gmra.mxu2 %vm237_vm1, %v177_v31  ;;  %835 = vmatmul.msk.bf16.gmra.mxu3 %vm237_vm1, %v177_v31 }
  0x56   : > { %876 = vmatmul.msk.bf16.vlgmr.msra.gmra.mxu0 %vm237_vm1, %v467_v34 }
  0x57   : > { %878 = vmatmul.msk.bf16.vlgmr.msra.gmra.mxu1 %vm237_vm1, %v467_v34 }
  0x58   : > { %880 = vmatmul.msk.bf16.vlgmr.msra.gmra.mxu2 %vm237_vm1, %v467_v34  ;;  %882 = vmatmul.msk.bf16.vlgmr.msra.gmra.mxu3 %vm237_vm1, %v467_v34 }
  0x66   : > { %877 = vmatmul.msk.bf16.gmra.mxu0 %vm237_vm1, %v468_v37 }
  0x67   : > { %879 = vmatmul.msk.bf16.gmra.mxu1 %vm237_vm1, %v468_v37 }
  0x68   : > { %881 = vmatmul.msk.bf16.gmra.mxu2 %vm237_vm1, %v468_v37  ;;  %883 = vmatmul.msk.bf16.gmra.mxu3 %vm237_vm1, %v468_v37 }
  0x93   : > { %v266_v38 = vpop.f32.mrf.mxu0 }
  0x94   : > { %v285_v39 = vpop.f32.mrf.mxu1 }
  0x9b   : > { %v304_v40 = vpop.f32.mrf.mxu2  ;;  %v323_v41 = vpop.f32.mrf.mxu3 }
  0x9c   : > { %v268_v42 = vpop.f32.mrf.mxu0  ;;  %v287_v43 = vpop.f32.mrf.mxu1 }
  0xa3   : > { %v1162_v44 = vpop.f32.mrf.mxu2  ;;  %v1164_v45 = vpop.f32.mrf.mxu3 }
  0xa4   : > { %v1166_v46 = vpop.f32.mrf.mxu0  ;;  %v1168_v47 = vpop.f32.mrf.mxu1 }
  0xab   : > { %v1170_v48 = vpop.f32.mrf.mxu2  ;;  %v1172_v49 = vpop.f32.mrf.mxu3 }
  0xac   : > { %v1174_v50 = vpop.f32.mrf.mxu0  ;;  %v1176_v51 = vpop.f32.mrf.mxu1 }
  0xb3   : > { %v1178_v52 = vpop.f32.mrf.mxu2  ;;  %v1180_v53 = vpop.f32.mrf.mxu3 }
  0xb4   : > { %v396_v54 = vpop.f32.mrf.mxu0  ;;  %v415_v55 = vpop.f32.mrf.mxu1 }
  0xb5   : > { %v397_v5 = vadd.f32 %v396_v54, %v266_v38  ;;  %v416_v6 = vadd.f32 %v415_v55, %v285_v39 }
  0xbb   : > { %v434_v56 = vpop.f32.mrf.mxu2  ;;  %v453_v57 = vpop.f32.mrf.mxu3 }
  0xbc   : > { %v398_v58 = vpop.f32.mrf.mxu0  ;;  %v417_v59 = vpop.f32.mrf.mxu1  ;;  %v435_v19 = vadd.f32 %v434_v56, %v304_v40  ;;  %v454_v20 = vadd.f32 %v453_v57, %v323_v41 }
  0xbd   : > { %v399_v23 = vadd.f32 %v398_v58, %v268_v42  ;;  %v418_v24 = vadd.f32 %v417_v59, %v287_v43 }
  0xc3   : > { %v436_v60 = vpop.f32.mrf.mxu2  ;;  %v455_v61 = vpop.f32.mrf.mxu3 }
  0xc4   : > { %v401_v62 = vpop.f32.mrf.mxu0  ;;  %v420_v63 = vpop.f32.mrf.mxu1  ;;  %v437_v41 = vadd.f32 %v436_v60, %v1162_v44  ;;  %v456_v42 = vadd.f32 %v455_v61, %v1164_v45 }
  0xc5   : > { %v402_v43 = vadd.f32 %v401_v62, %v1166_v46  ;;  %v421_v54 = vadd.f32 %v420_v63, %v1168_v47 }
  0xcb   : > { %v1182_v0 = vpop.f32.mrf.mxu2  ;;  %v1184_v1 = vpop.f32.mrf.mxu3 }
  0xcc   : > { %v1186_v2 = vpop.f32.mrf.mxu0  ;;  %v1188_v3 = vpop.f32.mrf.mxu1 }
  0xd3   : > { %v1193_v7 = vpop.f32.mrf.mxu2  ;;  %v1195_v8 = vpop.f32.mrf.mxu3 }
  0xd4   : > { %v541_v11 = vpop.f32.mrf.mxu0  ;;  %v560_v12 = vpop.f32.mrf.mxu1 }
  0xd5   : > { %v608_v13 = vadd.f32 %v541_v11, %v397_v5  ;;  %v609_v14 = vadd.f32 %v560_v12, %v416_v6  ;;  %v440_v11 = vadd.f32 %v1182_v0, %v1170_v48  ;;  %v459_v12 = vadd.f32 %v1184_v1, %v1172_v49 }
  0xd7   : > { %v634_v15 = vadd.f32 %v1197_v9, %v608_v13  ;;  %v635_v16 = vadd.f32 %v1199_v10, %v609_v14  ;;  %v404_v13 = vadd.f32 %v1186_v2, %v1174_v50  ;;  %v423_v14 = vadd.f32 %v1188_v3, %v1176_v51 }
  0xd9   : > { %v650_v17 = vmax.f32 %v634_v15, 0.0  ;;  %v651_v18 = vmax.f32 %v635_v16, 0.0 }
  0xdb   : > { %666 = vst [vmem:[%s1207_s21] sm:$0xff] %v650_v17  ;;  %v579_v25 = vpop.f32.mrf.mxu2  ;;  %v598_v26 = vpop.f32.mrf.mxu3 }
  0xdc   : > { %667 = vst [vmem:[%s1207_s21 + $0x8] sm:$0xff] %v651_v18  ;;  %v610_v27 = vadd.f32 %v579_v25, %v435_v19  ;;  %v611_v28 = vadd.f32 %v598_v26, %v454_v20  ;;  %v543_v29 = vpop.f32.mrf.mxu0  ;;  %v562_v30 = vpop.f32.mrf.mxu1  ;;  %v442_v25 = vadd.f32 %v1193_v7, %v1178_v52  ;;  %v461_v26 = vadd.f32 %v1195_v8, %v1180_v53 }
  0xdd   : > { %v612_v31 = vadd.f32 %v543_v29, %v399_v23  ;;  %v613_v32 = vadd.f32 %v562_v30, %v418_v24 }
  0xde   : > { %v636_v33 = vadd.f32 %v1209_v21, %v610_v27  ;;  %v637_v34 = vadd.f32 %v1211_v22, %v611_v28 }
  0xdf   : > { %v638_v35 = vadd.f32 %v1197_v9, %v612_v31  ;;  %v639_v36 = vadd.f32 %v1199_v10, %v613_v32 }
  0xe0   : > { %v652_v37 = vmax.f32 %v636_v33, 0.0  ;;  %v653_v38 = vmax.f32 %v637_v34, 0.0 }
  0xe1   : > { %v654_v39 = vmax.f32 %v638_v35, 0.0  ;;  %v655_v40 = vmax.f32 %v639_v36, 0.0 }
  0xe2   : > { %668 = vst [vmem:[%s1207_s21 + $0x10] sm:$0xff] %v652_v37 }
  0xe3   : > { %670 = vst.msk [vmem:[%s1207_s21 + $0x18] sm:$0xff] %vm669_vm2, %v653_v38  ;;  %v581_v55 = vpop.f32.mrf.mxu2  ;;  %v600_v56 = vpop.f32.mrf.mxu3 }
  0xe4   : > { %671 = vst [vmem:[%s1207_s21 + $0x20] sm:$0xff] %v654_v39  ;;  %v614_v57 = vadd.f32 %v581_v55, %v437_v41  ;;  %v615_v58 = vadd.f32 %v600_v56, %v456_v42  ;;  %v546_v59 = vpop.f32.mrf.mxu0  ;;  %v565_v4 = vpop.f32.mrf.mxu1 }
  0xe5   : > { %672 = vst [vmem:[%s1207_s21 + $0x28] sm:$0xff] %v655_v40  ;;  %v616_v44 = vadd.f32 %v546_v59, %v402_v43  ;;  %v617_v60 = vadd.f32 %v565_v4, %v421_v54 }
  0xe6   : > { %v640_v45 = vadd.f32 %v1209_v21, %v614_v57  ;;  %v641_v46 = vadd.f32 %v1211_v22, %v615_v58 }
  0xe7   : > { %v642_v47 = vadd.f32 %v1197_v9, %v616_v44  ;;  %v643_v61 = vadd.f32 %v1199_v10, %v617_v60 }
  0xe8   : > { %v656_v62 = vmax.f32 %v640_v45, 0.0  ;;  %v657_v63 = vmax.f32 %v641_v46, 0.0 }
  0xe9   : > { %v658_v5 = vmax.f32 %v642_v47, 0.0  ;;  %v659_v6 = vmax.f32 %v643_v61, 0.0 }
  0xea   : > { %673 = vst [vmem:[%s1207_s21 + $0x30] sm:$0xff] %v656_v62 }
  0xeb   : > { %674 = vst.msk [vmem:[%s1207_s21 + $0x38] sm:$0xff] %vm669_vm2, %v657_v63  ;;  %v584_v15 = vpop.f32.mrf.mxu2  ;;  %v603_v16 = vpop.f32.mrf.mxu3 }
  0xec   : > { %675 = vst [vmem:[%s1207_s21 + $0x40] sm:$0xff] %v658_v5  ;;  %v618_v17 = vadd.f32 %v584_v15, %v440_v11  ;;  %v619_v18 = vadd.f32 %v603_v16, %v459_v12  ;;  %v548_v19 = vpop.f32.mrf.mxu0  ;;  %v567_v48 = vpop.f32.mrf.mxu1 }
  0xed   : > { %676 = vst [vmem:[%s1207_s21 + $0x48] sm:$0xff] %v659_v6  ;;  %v620_v49 = vadd.f32 %v548_v19, %v404_v13  ;;  %v621_v0 = vadd.f32 %v567_v48, %v423_v14 }
  0xee   : > { %v644_v50 = vadd.f32 %v1209_v21, %v618_v17  ;;  %v645_v1 = vadd.f32 %v1211_v22, %v619_v18 }
  0xef   : > { %v646_v51 = vadd.f32 %v1197_v9, %v620_v49  ;;  %v647_v2 = vadd.f32 %v1199_v10, %v621_v0 }
  0xf0   : > { %v660_v3 = vmax.f32 %v644_v50, 0.0  ;;  %v661_v20 = vmax.f32 %v645_v1, 0.0 }
  0xf1   : > { %v662_v23 = vmax.f32 %v646_v51, 0.0  ;;  %v663_v24 = vmax.f32 %v647_v2, 0.0 }
  0xf2   : > { %677 = vst [vmem:[%s1207_s21 + $0x50] sm:$0xff] %v660_v3 }
  0xf3   : > { %678 = vst.msk [vmem:[%s1207_s21 + $0x58] sm:$0xff] %vm669_vm2, %v661_v20  ;;  %v586_v27 = vpop.f32.mrf.mxu2  ;;  %v605_v28 = vpop.f32.mrf.mxu3 }
  0xf4   : > { %679 = vst [vmem:[%s1207_s21 + $0x60] sm:$0xf] %v662_v23  ;;  %v622_v9 = vadd.f32 %v586_v27, %v442_v25  ;;  %v623_v10 = vadd.f32 %v605_v28, %v461_v26 }
  0xf5   : > { %680 = vst [vmem:[%s1207_s21 + $0x68] sm:$0xf] %v663_v24 }
  0xf6   : > { %v648_v29 = vadd.f32 %v1209_v21, %v622_v9  ;;  %v649_v30 = vadd.f32 %v1211_v22, %v623_v10 }
  0xf8   : > { %v664_v31 = vmax.f32 %v648_v29, 0.0  ;;  %v665_v32 = vmax.f32 %v649_v30, 0.0 }
  0xfa   : > { %681 = vst [vmem:[%s1207_s21 + $0x70] sm:$0xf] %v664_v31 }
  0xfb   : > { %683 = vst.msk [vmem:[%s1207_s21 + $0x78] sm:$0xf] %vm682_vm3, %v665_v32 }
  0xfc PF: > { %s13_s12 = sadd.s32 1, %s926_s12  }
  0xfd   : > { %p10_p4 = scmp.ge.s32.totalorder %s13_s12, 4  }
  0xff   :  { %12 = sbr.rel (!%p10_p4) target bundleno = 1 (0x1), region = 64 }

// kernel: cnn_forward.9
= control target key start
LH: loop header
LB: loop body
LE: loop exit
PB: predicated region body
PF: predicated region fallthrough
CT: control target
= control target key end

     0   :  { %s310_s6 = smov 0   ;;  %s351_s0 = inlined_call_operand.vmem [shape: f32[2,7,2,7,64], index: 0, kind: input, shape index: {}]   ;;  %s352_s1 = inlined_call_operand.vmem [shape: f32[2,7,7,32], index: 1, kind: output, shape index: {}]  }
   0x1 LB: > { %s271_s7 = sadd.s32 4294967295, %s297_s6   ;;  %p275_p0 = scmp.ge.s32.totalorder %s297_s6, 1  ;;  %s297_s6 = sphi %s310_s6, %s11_s6  }
   0x2   : > { %p87_p1 = scmp.lt.s32.totalorder %s297_s6, 3 }
   0x4   : > { %p88_p2 = pnand %p275_p0, %p87_p1 }
   0x5   : > { %p107_p3 = scmp.lt.s32.totalorder (!%p88_p2), %s271_s7, 1  ;;  %s299_s12 = smov (!%p88_p2), 96  }
   0x6   : > { %91 = sbr.rel (%p88_p2) target bundleno = 169 (0xa9), region = 24 }
   0xb   : > { %s354_s7 = smov (!%p107_p3, %s271_s7), 1  ;;  %vm208_vm0 = vcmask 260096  }
   0xc   : > { %s280_s8 = smul.u32 112, %s354_s7 }
   0xd   : > { %s281_s13 = smul.u32 56, %s354_s7 }
   0xe   : > { %s111_s11 = scalar_lea.vmem %s351_s0, %s280_s8 }
   0xf   : > { %v121_v0 = vld [vmem:[%s111_s11 + $0x20] sm:$0x7f]  ;;  %v123_v3 = vld [vmem:[%s111_s11 + $0x30] sm:$0x7f]  ;;  %v118_v6 = vld [vmem:[%s111_s11 + $0x8] sm:$0x7f]  ;;  %s331_s16 = scalar_lea.vmem %s352_s1, %s281_s13 }
  0x10   : > { %v117_v1 = vld [vmem:[%s111_s11] sm:$0x7f]  ;;  %142 = vrot.lane.b32.xlu1 %v121_v0, %s299_s12  ;;  %v119_v4 = vld [vmem:[%s111_s11 + $0x10] sm:$0x7f]  ;;  %v120_v8 = vld [vmem:[%s111_s11 + $0x18] sm:$0x7f] }
  0x11   : > { %v125_v2 = vld [vmem:[%s111_s11 + $0x40] sm:$0x7f]  ;;  %138 = vrot.lane.b32.xlu0 %v117_v1, %s299_s12  ;;  %v324_v5 = vld [vmem:[%s111_s11 + $0x50] sm:$0x7f]  ;;  %v124_v9 = vld [vmem:[%s111_s11 + $0x38] sm:$0x7f] }
  0x12   : > { %146 = vrot.lane.b32.xlu2 %v125_v2, %s299_s12  ;;  %v129_v7 = vld [vmem:[%s111_s11 + $0x60] sm:$0x7f]  ;;  %v122_v10 = vld [vmem:[%s111_s11 + $0x28] sm:$0x7f]  ;;  %v128_v13 = vld [vmem:[%s111_s11 + $0x58] sm:$0x7f] }
  0x13   : > { %v126_v11 = vld [vmem:[%s111_s11 + $0x48] sm:$0x7f] }
  0x14   : > { %v130_v12 = vld [vmem:[%s111_s11 + $0x68] sm:$0x7f] }
  0x18   : > { %144 = vrot.lane.b32.xlu1 %v123_v3, %s299_s12 }
  0x19   : > { %140 = vrot.lane.b32.xlu0 %v119_v4, %s299_s12 }
  0x1a   : > { %148 = vrot.lane.b32.xlu2 %v324_v5, %s299_s12 }
  0x20   : > { %173 = vrot.lane.b32.xlu1 %v118_v6, %s299_s12 }
  0x21   : > { %150 = vrot.lane.b32.xlu0 %v129_v7, %s299_s12 }
  0x22   : > { %175 = vrot.lane.b32.xlu2 %v120_v8, %s299_s12 }
  0x28   : > { %179 = vrot.lane.b32.xlu1 %v124_v9, %s299_s12 }
  0x29   : > { %177 = vrot.lane.b32.xlu0 %v122_v10, %s299_s12 }
  0x2a   : > { %181 = vrot.lane.b32.xlu2 %v126_v11, %s299_s12 }
  0x30   : > { %185 = vrot.lane.b32.xlu1 %v130_v12, %s299_s12 }
  0x31   : > { %183 = vrot.lane.b32.xlu0 %v128_v13, %s299_s12 }
  0x6c   : > { %v147_v14 = vpop.permute.xlu2 %146 }
  0x6d   : > { %v163_v17 = vmax.f32 %v125_v2, %v147_v14 }
  0x74   : > { %v149_v15 = vpop.permute.xlu2 %148 }
  0x75   : > { %v164_v43 = vmax.f32 %v324_v5, %v149_v15 }
  0x7c   : > { %v176_v16 = vpop.permute.xlu2 %175 }
  0x7d   : > { %v195_v23 = vmax.f32 %v120_v8, %v176_v16 }
  0x82   : > { %v143_v18 = vpop.permute.xlu1 %142 }
  0x83   : > { %v139_v19 = vpop.permute.xlu0 %138  ;;  %v161_v35 = vmax.f32 %v121_v0, %v143_v18 }
  0x84   : > { %v182_v20 = vpop.permute.xlu2 %181  ;;  %v159_v30 = vmax.f32 %v117_v1, %v139_v19 }
  0x85   : > { %v198_v21 = vmax.f32 %v126_v11, %v182_v20 }
  0x87   : > { %v205_v22 = vmax.f32 %v163_v17, %v198_v21 }
  0x89   : > { %213 = vst.msk [vmem:[%s331_s16 + $0x20] sm:$0x7f] %vm208_vm0, %v205_v22 }
  0x8a   : > { %v145_v24 = vpop.permute.xlu1 %144 }
  0x8b   : > { %v141_v25 = vpop.permute.xlu0 %140  ;;  %v162_v36 = vmax.f32 %v123_v3, %v145_v24 }
  0x8c   : > { %v160_v26 = vmax.f32 %v119_v4, %v141_v25 }
  0x8e   : > { %v202_v27 = vmax.f32 %v160_v26, %v195_v23 }
  0x90   : > { %210 = vst.msk [vmem:[%s331_s16 + $0x8] sm:$0x7f] %vm208_vm0, %v202_v27 }
  0x92   : > { %v174_v28 = vpop.permute.xlu1 %173 }
  0x93   : > { %v151_v29 = vpop.permute.xlu0 %150  ;;  %v194_v31 = vmax.f32 %v118_v6, %v174_v28 }
  0x94   : > { %v165_v44 = vmax.f32 %v129_v7, %v151_v29 }
  0x95   : > { %v201_v32 = vmax.f32 %v159_v30, %v194_v31 }
  0x97   : > { %209 = vst.msk [vmem:[%s331_s16] sm:$0x7f] %vm208_vm0, %v201_v32 }
  0x9a   : > { %v180_v33 = vpop.permute.xlu1 %179 }
  0x9b   : > { %v178_v34 = vpop.permute.xlu0 %177  ;;  %v197_v37 = vmax.f32 %v124_v9, %v180_v33 }
  0x9c   : > { %v196_v38 = vmax.f32 %v122_v10, %v178_v34 }
  0x9d   : > { %v204_v39 = vmax.f32 %v162_v36, %v197_v37 }
  0x9e   : > { %v203_v40 = vmax.f32 %v161_v35, %v196_v38 }
  0x9f   : > { %212 = vst.msk [vmem:[%s331_s16 + $0x18] sm:$0x7f] %vm208_vm0, %v204_v39 }
  0xa0   : > { %211 = vst.msk [vmem:[%s331_s16 + $0x10] sm:$0x7f] %vm208_vm0, %v203_v40 }
  0xa2   : > { %v186_v41 = vpop.permute.xlu1 %185 }
  0xa3   : > { %v184_v42 = vpop.permute.xlu0 %183  ;;  %v200_v45 = vmax.f32 %v130_v12, %v186_v41 }
  0xa4   : > { %v199_v46 = vmax.f32 %v128_v13, %v184_v42 }
  0xa5   : > { %v207_v47 = vmax.f32 %v165_v44, %v200_v45 }
  0xa6   : > { %v206_v48 = vmax.f32 %v164_v43, %v199_v46 }
  0xa7   : > { %215 = vst.msk [vmem:[%s331_s16 + $0x30] sm:$0x7f] %vm208_vm0, %v207_v47 }
  0xa8   : > { %214 = vst.msk [vmem:[%s331_s16 + $0x28] sm:$0x7f] %vm208_vm0, %v206_v48 }
  0xa9 PF: > { %s11_s6 = sadd.s32 1, %s297_s6  }
  0xaa   : > { %p8_p4 = scmp.ge.s32.totalorder %s11_s6, 4  }
  0xac   :  { %10 = sbr.rel (!%p8_p4) target bundleno = 1 (0x1), region = 54 }

// kernel: cnn_forward.8
= control target key start
LH: loop header
LB: loop body
LE: loop exit
PB: predicated region body
PF: predicated region fallthrough
CT: control target
= control target key end

     0   :  { %s2937_s12 = smov 0   ;;  %s4207_s0 = inlined_call_operand.vmem [shape: f32[2,16,256], index: 0, kind: input, shape index: {}]   ;;  %s4208_s1 = inlined_call_operand.vmem [shape: bf16[3,256,448], index: 1, kind: input, shape index: {}]   ;;  %s4209_s2 = inlined_call_operand.vmem [shape: f32[1,448], index: 2, kind: input, shape index: {}]   ;;  %s4210_s3 = inlined_call_operand.vmem [shape: f32[2,14,448], index: 3, kind: output, shape index: {}]  }
   0x1 LB: > { %s1800_s13 = sadd.s32 4294967295, %s2915_s12   ;;  %p1804_p0 = scmp.ge.s32.totalorder %s2915_s12, 1  ;;  %s2915_s12 = sphi %s2937_s12, %s13_s12  }
   0x2   : > { %p137_p1 = scmp.lt.s32.totalorder %s2915_s12, 3 }
   0x4   : > { %p138_p2 = pnand %p1804_p0, %p137_p1 }
   0x5   : > { %p161_p3 = scmp.lt.s32.totalorder (!%p138_p2), %s1800_s13, 1 }
   0x6   : > { %141 = sbr.rel (%p138_p2) target bundleno = 356 (0x164), region = 32 }
   0xb   : > { %v1987_v0 = vld [vmem:[%s4208_s1 + $0x2e0] sm:$0xf]  ;;  %v2803_v1 = vld [vmem:[%s4208_s1 + $0x2ec] sm:$0xf0]  ;;  %v2801_v5 = vld [vmem:[%s4208_s1 + $0x2e4] sm:$0xf] }
   0xc   : > { %v2115_v2 = vld [vmem:[%s4208_s1 + $0x3e0] sm:$0xf]  ;;  %v1988_v3 = vor.u32 %v2803_v1, %v1987_v0  ;;  %v2835_v4 = vld [vmem:[%s4208_s1 + $0x3ec] sm:$0xf0]  ;;  %v1989_v6 = vld [vmem:[%s4208_s1 + $0x2f0] sm:$0xf0] }
   0xd   : > { %v2116_v7 = vor.u32 %v2835_v4, %v2115_v2  ;;  %v1992_v8 = vor.u32 %v2801_v5, %v1989_v6  ;;  %v2833_v9 = vld [vmem:[%s4208_s1 + $0x3e4] sm:$0xf]  ;;  %v2117_v10 = vld [vmem:[%s4208_s1 + $0x3f0] sm:$0xf0]  ;;  %v1971_v11 = vld [vmem:[%s4208_s1 + $0x2c0] sm:$0xf] }
   0xe   : > { %648 = vmatpush.bf16.msra.mxu0 %v1988_v3  ;;  %v2120_v12 = vor.u32 %v2833_v9, %v2117_v10  ;;  %v2799_v13 = vld [vmem:[%s4208_s1 + $0x2cc] sm:$0xf0]  ;;  %v2099_v14 = vld [vmem:[%s4208_s1 + $0x3c0] sm:$0xf]  ;;  %v2797_v18 = vld [vmem:[%s4208_s1 + $0x2c4] sm:$0xf] }
   0xf   : > { %v2831_v15 = vld [vmem:[%s4208_s1 + $0x3cc] sm:$0xf0]  ;;  %662 = vmatpush.bf16.msra.mxu1 %v2116_v7  ;;  %676 = vmatpush.bf16.msra.mxu2 %v1992_v8  ;;  %v1972_v16 = vor.u32 %v2799_v13, %v1971_v11  ;;  %v1973_v19 = vld [vmem:[%s4208_s1 + $0x2d0] sm:$0xf0]  ;;  %v2829_v20 = vld [vmem:[%s4208_s1 + $0x3c4] sm:$0xf] }
  0x10   : > { %v2100_v17 = vor.u32 %v2831_v15, %v2099_v14  ;;  %690 = vmatpush.bf16.msra.mxu3 %v2120_v12  ;;  %v1976_v21 = vor.u32 %v2797_v18, %v1973_v19  ;;  %v2101_v22 = vld [vmem:[%s4208_s1 + $0x3d0] sm:$0xf0]  ;;  %v1955_v23 = vld [vmem:[%s4208_s1 + $0x2a0] sm:$0xf]  ;;  %v2795_v24 = vld [vmem:[%s4208_s1 + $0x2ac] sm:$0xf0] }
  0x11   : > { %v2104_v25 = vor.u32 %v2829_v20, %v2101_v22  ;;  %v2083_v26 = vld [vmem:[%s4208_s1 + $0x3a0] sm:$0xf]  ;;  %v2827_v27 = vld [vmem:[%s4208_s1 + $0x3ac] sm:$0xf0]  ;;  %v2793_v28 = vld [vmem:[%s4208_s1 + $0x2a4] sm:$0xf]  ;;  %v1956_v29 = vor.u32 %v2795_v24, %v1955_v23 }
  0x12   : > { %649 = vmatpush.bf16.msra.mxu0 %v1972_v16  ;;  %v1957_v30 = vld [vmem:[%s4208_s1 + $0x2b0] sm:$0xf0]  ;;  %v2825_v31 = vld [vmem:[%s4208_s1 + $0x3a4] sm:$0xf]  ;;  %v2084_v33 = vor.u32 %v2827_v27, %v2083_v26  ;;  %v1939_v35 = vld [vmem:[%s4208_s1 + $0x280] sm:$0xf] }
  0x13   : > { %v2085_v32 = vld [vmem:[%s4208_s1 + $0x3b0] sm:$0xf0]  ;;  %663 = vmatpush.bf16.msra.mxu1 %v2100_v17  ;;  %677 = vmatpush.bf16.msra.mxu2 %v1976_v21  ;;  %v1960_v34 = vor.u32 %v2793_v28, %v1957_v30  ;;  %v2791_v36 = vld [vmem:[%s4208_s1 + $0x28c] sm:$0xf0]  ;;  %v2067_v37 = vld [vmem:[%s4208_s1 + $0x380] sm:$0xf] }
  0x14   : > { %691 = vmatpush.bf16.msra.mxu3 %v2104_v25  ;;  %v2088_v38 = vor.u32 %v2825_v31, %v2085_v32  ;;  %v2823_v39 = vld [vmem:[%s4208_s1 + $0x38c] sm:$0xf0]  ;;  %v2789_v40 = vld [vmem:[%s4208_s1 + $0x284] sm:$0xf]  ;;  %v1941_v41 = vld [vmem:[%s4208_s1 + $0x290] sm:$0xf0]  ;;  %v1940_v44 = vor.u32 %v2791_v36, %v1939_v35 }
  0x15   : > { %v2821_v42 = vld [vmem:[%s4208_s1 + $0x384] sm:$0xf]  ;;  %v2069_v43 = vld [vmem:[%s4208_s1 + $0x390] sm:$0xf0]  ;;  %v2068_v45 = vor.u32 %v2823_v39, %v2067_v37  ;;  %v1944_v46 = vor.u32 %v2789_v40, %v1941_v41  ;;  %v1923_v47 = vld [vmem:[%s4208_s1 + $0x260] sm:$0xf] }
  0x16   : > { %650 = vmatpush.bf16.msra.mxu0 %v1956_v29  ;;  %v2787_v48 = vld [vmem:[%s4208_s1 + $0x26c] sm:$0xf0]  ;;  %v2051_v49 = vld [vmem:[%s4208_s1 + $0x360] sm:$0xf]  ;;  %v2072_v50 = vor.u32 %v2821_v42, %v2069_v43  ;;  %v2785_v52 = vld [vmem:[%s4208_s1 + $0x264] sm:$0xf] }
  0x17   : > { %664 = vmatpush.bf16.msra.mxu1 %v2084_v33  ;;  %678 = vmatpush.bf16.msra.mxu2 %v1960_v34  ;;  %v2819_v51 = vld [vmem:[%s4208_s1 + $0x36c] sm:$0xf0]  ;;  %v1925_v53 = vld [vmem:[%s4208_s1 + $0x270] sm:$0xf0]  ;;  %v2817_v54 = vld [vmem:[%s4208_s1 + $0x364] sm:$0xf]  ;;  %v1924_v56 = vor.u32 %v2787_v48, %v1923_v47 }
  0x18   : > { %692 = vmatpush.bf16.msra.mxu3 %v2088_v38  ;;  %v2053_v55 = vld [vmem:[%s4208_s1 + $0x370] sm:$0xf0]  ;;  %v2052_v57 = vor.u32 %v2819_v51, %v2051_v49  ;;  %v1928_v58 = vor.u32 %v2785_v52, %v1925_v53  ;;  %v1907_v59 = vld [vmem:[%s4208_s1 + $0x240] sm:$0xf]  ;;  %v2783_v60 = vld [vmem:[%s4208_s1 + $0x24c] sm:$0xf0] }
  0x19   : > { %v2035_v61 = vld [vmem:[%s4208_s1 + $0x340] sm:$0xf]  ;;  %v2056_v62 = vor.u32 %v2817_v54, %v2053_v55  ;;  %v2815_v63 = vld [vmem:[%s4208_s1 + $0x34c] sm:$0xf0]  ;;  %v2781_v0 = vld [vmem:[%s4208_s1 + $0x244] sm:$0xf]  ;;  %v1908_v4 = vor.u32 %v2783_v60, %v1907_v59 }
  0x1a   : > { %651 = vmatpush.bf16.msra.mxu0 %v1940_v44  ;;  %v1909_v1 = vld [vmem:[%s4208_s1 + $0x250] sm:$0xf0]  ;;  %v2813_v2 = vld [vmem:[%s4208_s1 + $0x344] sm:$0xf]  ;;  %v2036_v5 = vor.u32 %v2815_v63, %v2035_v61  ;;  %v1891_v7 = vld [vmem:[%s4208_s1 + $0x220] sm:$0xf] }
  0x1b   : > { %665 = vmatpush.bf16.msra.mxu1 %v2068_v45  ;;  %679 = vmatpush.bf16.msra.mxu2 %v1944_v46  ;;  %v2037_v3 = vld [vmem:[%s4208_s1 + $0x350] sm:$0xf0]  ;;  %v1912_v6 = vor.u32 %v2781_v0, %v1909_v1  ;;  %v2779_v8 = vld [vmem:[%s4208_s1 + $0x22c] sm:$0xf0]  ;;  %v2019_v9 = vld [vmem:[%s4208_s1 + $0x320] sm:$0xf] }
  0x1c   : > { %693 = vmatpush.bf16.msra.mxu3 %v2072_v50  ;;  %v2040_v10 = vor.u32 %v2813_v2, %v2037_v3  ;;  %v2811_v11 = vld [vmem:[%s4208_s1 + $0x32c] sm:$0xf0]  ;;  %v2777_v12 = vld [vmem:[%s4208_s1 + $0x224] sm:$0xf]  ;;  %v1893_v13 = vld [vmem:[%s4208_s1 + $0x230] sm:$0xf0]  ;;  %v1892_v16 = vor.u32 %v2779_v8, %v1891_v7 }
  0x1d   : > { %v2809_v14 = vld [vmem:[%s4208_s1 + $0x324] sm:$0xf]  ;;  %v2021_v15 = vld [vmem:[%s4208_s1 + $0x330] sm:$0xf0]  ;;  %v1875_v17 = vld [vmem:[%s4208_s1 + $0x200] sm:$0xf]  ;;  %v2020_v19 = vor.u32 %v2811_v11, %v2019_v9  ;;  %v1896_v20 = vor.u32 %v2777_v12, %v1893_v13 }
  0x1e   : > { %652 = vmatpush.bf16.msra.mxu0 %v1924_v56  ;;  %v2775_v18 = vld [vmem:[%s4208_s1 + $0x20c] sm:$0xf0]  ;;  %v2003_v21 = vld [vmem:[%s4208_s1 + $0x300] sm:$0xf]  ;;  %v2773_v23 = vld [vmem:[%s4208_s1 + $0x204] sm:$0xf]  ;;  %v2024_v24 = vor.u32 %v2809_v14, %v2021_v15 }
  0x1f   : > { %666 = vmatpush.bf16.msra.mxu1 %v2052_v57  ;;  %680 = vmatpush.bf16.msra.mxu2 %v1928_v58  ;;  %v2807_v22 = vld [vmem:[%s4208_s1 + $0x30c] sm:$0xf0]  ;;  %v1877_v25 = vld [vmem:[%s4208_s1 + $0x210] sm:$0xf0]  ;;  %v2805_v26 = vld [vmem:[%s4208_s1 + $0x304] sm:$0xf]  ;;  %v1876_v31 = vor.u32 %v2775_v18, %v1875_v17 }
  0x20   : > { %694 = vmatpush.bf16.msra.mxu3 %v2056_v62  ;;  %v2005_v27 = vld [vmem:[%s4208_s1 + $0x310] sm:$0xf0]  ;;  %v1995_v28 = vld [vmem:[%s4208_s1 + $0x2e8] sm:$0xf]  ;;  %v2804_v29 = vld [vmem:[%s4208_s1 + $0x2f4] sm:$0xf0]  ;;  %v2004_v35 = vor.u32 %v2807_v22, %v2003_v21  ;;  %v1880_v36 = vor.u32 %v2773_v23, %v1877_v25 }
  0x21   : > { %v2123_v30 = vld [vmem:[%s4208_s1 + $0x3e8] sm:$0xf]  ;;  %v2836_v32 = vld [vmem:[%s4208_s1 + $0x3f4] sm:$0xf0]  ;;  %v2802_v33 = vld [vmem:[%s4208_s1 + $0x2ec] sm:$0xf]  ;;  %v2008_v39 = vor.u32 %v2805_v26, %v2005_v27  ;;  %v1996_v40 = vor.u32 %v2804_v29, %v1995_v28 }
  0x22   : > { %653 = vmatpush.bf16.msra.mxu0 %v1908_v4  ;;  %v1997_v34 = vld [vmem:[%s4208_s1 + $0x2f8] sm:$0xf0]  ;;  %v2834_v37 = vld [vmem:[%s4208_s1 + $0x3ec] sm:$0xf]  ;;  %v2124_v41 = vor.u32 %v2836_v32, %v2123_v30  ;;  %v1979_v43 = vld [vmem:[%s4208_s1 + $0x2c8] sm:$0xf] }
  0x23   : > { %667 = vmatpush.bf16.msra.mxu1 %v2036_v5  ;;  %681 = vmatpush.bf16.msra.mxu2 %v1912_v6  ;;  %v2125_v38 = vld [vmem:[%s4208_s1 + $0x3f8] sm:$0xf0]  ;;  %v2000_v42 = vor.u32 %v2802_v33, %v1997_v34  ;;  %v2800_v44 = vld [vmem:[%s4208_s1 + $0x2d4] sm:$0xf0]  ;;  %v2107_v45 = vld [vmem:[%s4208_s1 + $0x3c8] sm:$0xf] }
  0x24   : > { %695 = vmatpush.bf16.msra.mxu3 %v2040_v10  ;;  %v2128_v46 = vor.u32 %v2834_v37, %v2125_v38  ;;  %v2832_v47 = vld [vmem:[%s4208_s1 + $0x3d4] sm:$0xf0]  ;;  %v2798_v48 = vld [vmem:[%s4208_s1 + $0x2cc] sm:$0xf]  ;;  %v1981_v49 = vld [vmem:[%s4208_s1 + $0x2d8] sm:$0xf0]  ;;  %v1980_v52 = vor.u32 %v2800_v44, %v1979_v43 }
  0x25   : > { %v2830_v50 = vld [vmem:[%s4208_s1 + $0x3cc] sm:$0xf]  ;;  %v2109_v51 = vld [vmem:[%s4208_s1 + $0x3d8] sm:$0xf0]  ;;  %v2108_v53 = vor.u32 %v2832_v47, %v2107_v45  ;;  %v1984_v54 = vor.u32 %v2798_v48, %v1981_v49  ;;  %v1963_v55 = vld [vmem:[%s4208_s1 + $0x2a8] sm:$0xf] }
  0x26   : > { %654 = vmatpush.bf16.msra.mxu0 %v1892_v16  ;;  %v2796_v56 = vld [vmem:[%s4208_s1 + $0x2b4] sm:$0xf0]  ;;  %v2091_v57 = vld [vmem:[%s4208_s1 + $0x3a8] sm:$0xf]  ;;  %v2112_v58 = vor.u32 %v2830_v50, %v2109_v51  ;;  %v2794_v60 = vld [vmem:[%s4208_s1 + $0x2ac] sm:$0xf] }
  0x27   : > { %668 = vmatpush.bf16.msra.mxu1 %v2020_v19  ;;  %682 = vmatpush.bf16.msra.mxu2 %v1896_v20  ;;  %v2828_v59 = vld [vmem:[%s4208_s1 + $0x3b4] sm:$0xf0]  ;;  %v1965_v61 = vld [vmem:[%s4208_s1 + $0x2b8] sm:$0xf0]  ;;  %v2826_v62 = vld [vmem:[%s4208_s1 + $0x3ac] sm:$0xf]  ;;  %v1964_v0 = vor.u32 %v2796_v56, %v1963_v55 }
  0x28   : > { %696 = vmatpush.bf16.msra.mxu3 %v2024_v24  ;;  %v2093_v63 = vld [vmem:[%s4208_s1 + $0x3b8] sm:$0xf0]  ;;  %v1947_v1 = vld [vmem:[%s4208_s1 + $0x288] sm:$0xf]  ;;  %v2092_v2 = vor.u32 %v2828_v59, %v2091_v57  ;;  %v1968_v3 = vor.u32 %v2794_v60, %v1965_v61  ;;  %v2792_v4 = vld [vmem:[%s4208_s1 + $0x294] sm:$0xf0] }
  0x29   : > { %v2075_v5 = vld [vmem:[%s4208_s1 + $0x388] sm:$0xf]  ;;  %v2824_v6 = vld [vmem:[%s4208_s1 + $0x394] sm:$0xf0]  ;;  %v2096_v7 = vor.u32 %v2826_v62, %v2093_v63  ;;  %v2790_v8 = vld [vmem:[%s4208_s1 + $0x28c] sm:$0xf]  ;;  %v1948_v13 = vor.u32 %v2792_v4, %v1947_v1 }
  0x2a   : > { %655 = vmatpush.bf16.msra.mxu0 %v1876_v31  ;;  %v1949_v9 = vld [vmem:[%s4208_s1 + $0x298] sm:$0xf0]  ;;  %s4212_s13 = smov (!%p161_p3, %s1800_s13), 1  ;;  %v2822_v10 = vld [vmem:[%s4208_s1 + $0x38c] sm:$0xf]  ;;  %v2076_v16 = vor.u32 %v2824_v6, %v2075_v5  ;;  %vm1738_vm0 = vcmask 523264  }
  0x2b   : > { %669 = vmatpush.bf16.msra.mxu1 %v2004_v35  ;;  %683 = vmatpush.bf16.msra.mxu2 %v1880_v36  ;;  %v2077_v11 = vld [vmem:[%s4208_s1 + $0x398] sm:$0xf0]  ;;  %v1931_v12 = vld [vmem:[%s4208_s1 + $0x268] sm:$0xf]  ;;  %v2788_v14 = vld [vmem:[%s4208_s1 + $0x274] sm:$0xf0]  ;;  %v1952_v17 = vor.u32 %v2790_v8, %v1949_v9 }
  0x2c   : > { %697 = vmatpush.bf16.msra.mxu3 %v2008_v39  ;;  %v2059_v15 = vld [vmem:[%s4208_s1 + $0x368] sm:$0xf]  ;;  %s2707_s10 = sshll.u32 %s4212_s13, 5  ;;  %v2820_v18 = vld [vmem:[%s4208_s1 + $0x374] sm:$0xf0]  ;;  %v2080_v21 = vor.u32 %v2822_v10, %v2077_v11  ;;  %v1932_v29 = vor.u32 %v2788_v14, %v1931_v12  ;;  %s2708_s4 = sshll.u32 %s4212_s13, 6 }
  0x2d   : > { %v2786_v19 = vld [vmem:[%s4208_s1 + $0x26c] sm:$0xf]  ;;  %v1933_v20 = vld [vmem:[%s4208_s1 + $0x278] sm:$0xf0]  ;;  %s3261_s21 = scalar_lea.vmem %s4207_s0, %s2707_s10  ;;  %v1915_v30 = vld [vmem:[%s4208_s1 + $0x248] sm:$0xf]  ;;  %v2060_v33 = vor.u32 %v2820_v18, %v2059_v15  ;;  %s4183_s7 = scalar_lea.vmem %s4210_s3, %s2708_s4 }
  0x2e   : > { %704 = vmatpush.bf16.msrb.mxu0 %v1996_v40  ;;  %v241_v22 = vld [vmem:[%s3261_s21] sm:$0xfe]  ;;  %v243_v23 = vld [vmem:[%s3261_s21 + $0x10] sm:$0x7f]  ;;  %v242_v24 = vld [vmem:[%s3261_s21 + $0x8] sm:$0xfe]  ;;  %v1936_v34 = vor.u32 %v2786_v19, %v1933_v20 }
  0x2f   : > { %718 = vmatpush.bf16.msrb.mxu1 %v2124_v41  ;;  %732 = vmatpush.bf16.msrb.mxu2 %v2000_v42  ;;  %v2818_v25 = vld [vmem:[%s4208_s1 + $0x36c] sm:$0xf]  ;;  %v2061_v26 = vld [vmem:[%s4208_s1 + $0x378] sm:$0xf0]  ;;  %v245_v27 = vpack.c.bf16 %v243_v23, %v241_v22  ;;  %v2784_v31 = vld [vmem:[%s4208_s1 + $0x254] sm:$0xf0] }
  0x30   : > { %746 = vmatpush.bf16.msrb.mxu3 %v2128_v46  ;;  %v244_v28 = vld [vmem:[%s3261_s21 + $0x18] sm:$0x7f]  ;;  %v2043_v35 = vld [vmem:[%s4208_s1 + $0x348] sm:$0xf]  ;;  %v2064_v39 = vor.u32 %v2818_v25, %v2061_v26  ;;  %v2782_v40 = vld [vmem:[%s4208_s1 + $0x24c] sm:$0xf]  ;;  %v1916_v47 = vor.u32 %v2784_v31, %v1915_v30 }
  0x31   : > { %v246_v32 = vpack.c.bf16 %v244_v28, %v242_v24  ;;  %v2816_v36 = vld [vmem:[%s4208_s1 + $0x354] sm:$0xf0]  ;;  %v313_v37 = vshrl.u32 %v245_v27, 16  ;;  %v315_v38 = vshll.u32 %v245_v27, 16  ;;  %v1917_v41 = vld [vmem:[%s4208_s1 + $0x258] sm:$0xf0] }
  0x32   : > { %705 = vmatpush.bf16.msrb.mxu0 %v1980_v52  ;;  %v2814_v44 = vld [vmem:[%s4208_s1 + $0x34c] sm:$0xf]  ;;  %v2045_v45 = vld [vmem:[%s4208_s1 + $0x358] sm:$0xf0]  ;;  %v2044_v49 = vor.u32 %v2816_v36, %v2043_v35  ;;  %v1920_v50 = vor.u32 %v2782_v40, %v1917_v41  ;;  %v1899_v52 = vld [vmem:[%s4208_s1 + $0x228] sm:$0xf] }
  0x33   : > { %719 = vmatpush.bf16.msrb.mxu1 %v2108_v53  ;;  %733 = vmatpush.bf16.msrb.mxu2 %v1984_v54  ;;  %v320_v42 = vshrl.u32 %v246_v32, 16  ;;  %v322_v43 = vshll.u32 %v246_v32, 16  ;;  %v317_v46 = vrot.slane %v315_v38, 1  ;;  %v2780_v53 = vld [vmem:[%s4208_s1 + $0x234] sm:$0xf0]  ;;  %v2048_v55 = vor.u32 %v2814_v44, %v2045_v45 }
  0x34   : > { %747 = vmatpush.bf16.msrb.mxu3 %v2112_v58  ;;  %v2027_v54 = vld [vmem:[%s4208_s1 + $0x328] sm:$0xf]  ;;  %v2812_v57 = vld [vmem:[%s4208_s1 + $0x334] sm:$0xf0]  ;;  %v2778_v58 = vld [vmem:[%s4208_s1 + $0x22c] sm:$0xf]  ;;  %v1900_v62 = vor.u32 %v2780_v53, %v1899_v52 }
  0x35   : > { %v324_v48 = vrot.slane %v322_v43, 1  ;;  %v3297_v51 = vor.u32 %v317_v46, %v313_v37  ;;  %v1901_v59 = vld [vmem:[%s4208_s1 + $0x238] sm:$0xf0]  ;;  %v2810_v60 = vld [vmem:[%s4208_s1 + $0x32c] sm:$0xf]  ;;  %v2028_v1 = vor.u32 %v2812_v57, %v2027_v54  ;;  %vm1743_vm1 = vcmask 521216  }
  0x36   : > { %706 = vmatpush.bf16.msrb.mxu0 %v1964_v0  ;;  %v2029_v61 = vld [vmem:[%s4208_s1 + $0x338] sm:$0xf0]  ;;  %v1883_v63 = vld [vmem:[%s4208_s1 + $0x208] sm:$0xf]  ;;  %v2776_v0 = vld [vmem:[%s4208_s1 + $0x214] sm:$0xf0] }
  0x37   : > { %720 = vmatpush.bf16.msrb.mxu1 %v2092_v2  ;;  %734 = vmatpush.bf16.msrb.mxu2 %v1968_v3  ;;  %v3308_v56 = vor.u32 %v324_v48, %v320_v42  ;;  %v1904_v2 = vor.u32 %v2778_v58, %v1901_v59  ;;  %v2011_v3 = vld [vmem:[%s4208_s1 + $0x308] sm:$0xf]  ;;  %v2808_v4 = vld [vmem:[%s4208_s1 + $0x314] sm:$0xf0]  ;;  %v2774_v5 = vld [vmem:[%s4208_s1 + $0x20c] sm:$0xf]  ;;  %v2032_v6 = vor.u32 %v2810_v60, %v2029_v61 }
  0x38   : > { %748 = vmatpush.bf16.msrb.mxu3 %v2096_v7  ;;  %684 = vmatmul.bf16.vlgmr.msra.gmra.mxu2 %v3297_v51  ;;  %v1885_v7 = vld [vmem:[%s4208_s1 + $0x218] sm:$0xf0]  ;;  %v2806_v8 = vld [vmem:[%s4208_s1 + $0x30c] sm:$0xf]  ;;  %v2243_v10 = vld [vmem:[%s4208_s1 + $0xe0] sm:$0xf] }
  0x39   : > { %656 = vmatmul.bf16.vlgmr.msra.gmra.mxu0 %v3297_v51  ;;  %698 = vmatmul.bf16.vlgmr.msra.gmra.mxu3 %v3308_v56  ;;  %v2013_v9 = vld [vmem:[%s4208_s1 + $0x318] sm:$0xf0]  ;;  %v2739_v11 = vld [vmem:[%s4208_s1 + $0xec] sm:$0xf0]  ;;  %v2371_v12 = vld [vmem:[%s4208_s1 + $0x1e0] sm:$0xf]  ;;  %v1888_v18 = vor.u32 %v2774_v5, %v1885_v7 }
  0x3a   : > { %707 = vmatpush.bf16.msrb.mxu0 %v1948_v13  ;;  %670 = vmatmul.bf16.vlgmr.msra.gmra.mxu1 %v3308_v56  ;;  %v1884_v13 = vor.u32 %v2776_v0, %v1883_v63  ;;  %v2771_v14 = vld [vmem:[%s4208_s1 + $0x1ec] sm:$0xf0]  ;;  %v2737_v15 = vld [vmem:[%s4208_s1 + $0xe4] sm:$0xf]  ;;  %v2373_v20 = vld [vmem:[%s4208_s1 + $0x1f0] sm:$0xf0]  ;;  %v2244_v22 = vor.u32 %v2739_v11, %v2243_v10 }
  0x3b   : > { %721 = vmatpush.bf16.msrb.mxu1 %v2076_v16  ;;  %735 = vmatpush.bf16.msrb.mxu2 %v1952_v17  ;;  %v2245_v16 = vld [vmem:[%s4208_s1 + $0xf0] sm:$0xf0]  ;;  %v2012_v17 = vor.u32 %v2808_v4, %v2011_v3  ;;  %v2769_v19 = vld [vmem:[%s4208_s1 + $0x1e4] sm:$0xf]  ;;  %v2372_v23 = vor.u32 %v2771_v14, %v2371_v12  ;;  %v2227_v25 = vld [vmem:[%s4208_s1 + $0xc0] sm:$0xf] }
  0x3c   : > { %749 = vmatpush.bf16.msrb.mxu3 %v2080_v21  ;;  %v2016_v21 = vor.u32 %v2806_v8, %v2013_v9  ;;  %v2248_v24 = vor.u32 %v2737_v15, %v2245_v16  ;;  %v2735_v26 = vld [vmem:[%s4208_s1 + $0xcc] sm:$0xf0]  ;;  %v2355_v27 = vld [vmem:[%s4208_s1 + $0x1c0] sm:$0xf]  ;;  %v2376_v28 = vor.u32 %v2769_v19, %v2373_v20  ;;  %v2733_v30 = vld [vmem:[%s4208_s1 + $0xc4] sm:$0xf] }
  0x3d   : > { %v2229_v31 = vld [vmem:[%s4208_s1 + $0xd0] sm:$0xf0]  ;;  %v2765_v32 = vld [vmem:[%s4208_s1 + $0x1c4] sm:$0xf]  ;;  %v2211_v37 = vld [vmem:[%s4208_s1 + $0xa0] sm:$0xf] }
  0x3e   : > { %708 = vmatpush.bf16.msrb.mxu0 %v1932_v29  ;;  %v2767_v29 = vld [vmem:[%s4208_s1 + $0x1cc] sm:$0xf0]  ;;  %v2232_v36 = vor.u32 %v2733_v30, %v2229_v31  ;;  %v2729_v42 = vld [vmem:[%s4208_s1 + $0xa4] sm:$0xf]  ;;  %v2213_v43 = vld [vmem:[%s4208_s1 + $0xb0] sm:$0xf0] }
  0x3f   : > { %722 = vmatpush.bf16.msrb.mxu1 %v2060_v33  ;;  %736 = vmatpush.bf16.msrb.mxu2 %v1936_v34  ;;  %v2357_v33 = vld [vmem:[%s4208_s1 + $0x1d0] sm:$0xf0]  ;;  %v2228_v34 = vor.u32 %v2735_v26, %v2227_v25  ;;  %v2356_v35 = vor.u32 %v2767_v29, %v2355_v27  ;;  %v2731_v38 = vld [vmem:[%s4208_s1 + $0xac] sm:$0xf0]  ;;  %v2761_v44 = vld [vmem:[%s4208_s1 + $0x1a4] sm:$0xf]  ;;  %v2216_v48 = vor.u32 %v2729_v42, %v2213_v43 }
  0x40   : > { %750 = vmatpush.bf16.msrb.mxu3 %v2064_v39  ;;  %v2339_v39 = vld [vmem:[%s4208_s1 + $0x1a0] sm:$0xf]  ;;  %v2360_v40 = vor.u32 %v2765_v32, %v2357_v33  ;;  %v2763_v41 = vld [vmem:[%s4208_s1 + $0x1ac] sm:$0xf0]  ;;  %v2341_v45 = vld [vmem:[%s4208_s1 + $0x1b0] sm:$0xf0]  ;;  %v2212_v46 = vor.u32 %v2731_v38, %v2211_v37 }
  0x41   : > { %v2323_v52 = vld [vmem:[%s4208_s1 + $0x180] sm:$0xf]  ;;  %v2344_v53 = vor.u32 %v2761_v44, %v2341_v45  ;;  %v2759_v54 = vld [vmem:[%s4208_s1 + $0x18c] sm:$0xf0]  ;;  %v2197_v57 = vld [vmem:[%s4208_s1 + $0x90] sm:$0xf0] }
  0x42   : > { %709 = vmatpush.bf16.msrb.mxu0 %v1916_v47  ;;  %v2340_v47 = vor.u32 %v2763_v41, %v2339_v39  ;;  %v2757_v58 = vld [vmem:[%s4208_s1 + $0x184] sm:$0xf]  ;;  %v2325_v59 = vld [vmem:[%s4208_s1 + $0x190] sm:$0xf0]  ;;  %v2324_v61 = vor.u32 %v2759_v54, %v2323_v52  ;;  %v2179_v63 = vld [vmem:[%s4208_s1 + $0x60] sm:$0xf] }
  0x43   : > { %723 = vmatpush.bf16.msrb.mxu1 %v2044_v49  ;;  %737 = vmatpush.bf16.msrb.mxu2 %v1920_v50  ;;  %v2195_v49 = vld [vmem:[%s4208_s1 + $0x80] sm:$0xf]  ;;  %v2727_v50 = vld [vmem:[%s4208_s1 + $0x8c] sm:$0xf0]  ;;  %v2181_v3 = vld [vmem:[%s4208_s1 + $0x70] sm:$0xf0] }
  0x44   : > { %751 = vmatpush.bf16.msrb.mxu3 %v2048_v55  ;;  %v2725_v55 = vld [vmem:[%s4208_s1 + $0x84] sm:$0xf]  ;;  %v2196_v60 = vor.u32 %v2727_v50, %v2195_v49  ;;  %v2723_v0 = vld [vmem:[%s4208_s1 + $0x6c] sm:$0xf0]  ;;  %v2309_v5 = vld [vmem:[%s4208_s1 + $0x170] sm:$0xf0] }
  0x45   : > { %v2753_v4 = vld [vmem:[%s4208_s1 + $0x164] sm:$0xf]  ;;  %v2163_v9 = vld [vmem:[%s4208_s1 + $0x40] sm:$0xf]  ;;  %v2719_v10 = vld [vmem:[%s4208_s1 + $0x4c] sm:$0xf0] }
  0x46   : > { %710 = vmatpush.bf16.msrb.mxu0 %v1900_v62  ;;  %v2200_v62 = vor.u32 %v2725_v55, %v2197_v57  ;;  %v2291_v11 = vld [vmem:[%s4208_s1 + $0x140] sm:$0xf]  ;;  %v2312_v12 = vor.u32 %v2753_v4, %v2309_v5  ;;  %v2717_v14 = vld [vmem:[%s4208_s1 + $0x44] sm:$0xf]  ;;  %v2165_v15 = vld [vmem:[%s4208_s1 + $0x50] sm:$0xf0] }
  0x47   : > { %724 = vmatpush.bf16.msrb.mxu1 %v2028_v1  ;;  %738 = vmatpush.bf16.msrb.mxu2 %v1904_v2  ;;  %v2328_v1 = vor.u32 %v2757_v58, %v2325_v59  ;;  %v2721_v2 = vld [vmem:[%s4208_s1 + $0x64] sm:$0xf]  ;;  %v2168_v20 = vor.u32 %v2717_v14, %v2165_v15  ;;  %v2747_v25 = vld [vmem:[%s4208_s1 + $0x12c] sm:$0xf0]  ;;  %v2149_v27 = vld [vmem:[%s4208_s1 + $0x30] sm:$0xf0] }
  0x48   : > { %752 = vmatpush.bf16.msrb.mxu3 %v2032_v6  ;;  %v2180_v6 = vor.u32 %v2723_v0, %v2179_v63  ;;  %v2184_v8 = vor.u32 %v2721_v2, %v2181_v3  ;;  %v2749_v16 = vld [vmem:[%s4208_s1 + $0x144] sm:$0xf]  ;;  %v2277_v29 = vld [vmem:[%s4208_s1 + $0x130] sm:$0xf0]  ;;  %v2131_v31 = vld [vmem:[%s4208_s1] sm:$0xf] }
  0x49   : > { %v2713_v26 = vld [vmem:[%s4208_s1 + $0x24] sm:$0xf]  ;;  %v2711_v32 = vld [vmem:[%s4208_s1 + $0xc] sm:$0xf0]  ;;  %v2259_v33 = vld [vmem:[%s4208_s1 + $0x100] sm:$0xf] }
  0x4a   : > { %711 = vmatpush.bf16.msrb.mxu0 %v1884_v13  ;;  %v2751_v13 = vld [vmem:[%s4208_s1 + $0x14c] sm:$0xf0]  ;;  %v2709_v37 = vld [vmem:[%s4208_s1 + $0x4] sm:$0xf]  ;;  %v2133_v38 = vld [vmem:[%s4208_s1 + $0x10] sm:$0xf0] }
  0x4b   : > { %725 = vmatpush.bf16.msrb.mxu1 %v2012_v17  ;;  %739 = vmatpush.bf16.msrb.mxu2 %v1888_v18  ;;  %v2293_v17 = vld [vmem:[%s4208_s1 + $0x150] sm:$0xf0]  ;;  %v2164_v18 = vor.u32 %v2719_v10, %v2163_v9  ;;  %v2292_v19 = vor.u32 %v2751_v13, %v2291_v11  ;;  %v2251_v42 = vld [vmem:[%s4208_s1 + $0xe8] sm:$0xf]  ;;  %v2740_v43 = vld [vmem:[%s4208_s1 + $0xf4] sm:$0xf0]  ;;  %v2136_v52 = vor.u32 %v2709_v37, %v2133_v38 }
  0x4c   : > { %753 = vmatpush.bf16.msrb.mxu3 %v2016_v21  ;;  %v2147_v21 = vld [vmem:[%s4208_s1 + $0x20] sm:$0xf]  ;;  %v2261_v41 = vld [vmem:[%s4208_s1 + $0x110] sm:$0xf0]  ;;  %v2379_v44 = vld [vmem:[%s4208_s1 + $0x1e8] sm:$0xf]  ;;  %v2252_v58 = vor.u32 %v2740_v43, %v2251_v42 }
  0x4d   : > { %712 = vmatmul.bf16.vlgmr.msrb.gmra.mxu0 %v3297_v51  ;;  %v2772_v45 = vld [vmem:[%s4208_s1 + $0x1f4] sm:$0xf0]  ;;  %v2770_v49 = vld [vmem:[%s4208_s1 + $0x1ec] sm:$0xf]  ;;  %v171_v54 = vld [vmem:[%s3261_s21] sm:$0xff] }
  0x4e   : > { %1080 = vmatpush.bf16.msra.mxu0 %v2244_v22  ;;  %740 = vmatmul.bf16.vlgmr.msrb.gmra.mxu2 %v3297_v51  ;;  %v2307_v51 = vld [vmem:[%s4208_s1 + $0x160] sm:$0xf]  ;;  %v2715_v22 = vld [vmem:[%s4208_s1 + $0x2c] sm:$0xf0]  ;;  %v172_v59 = vld [vmem:[%s3261_s21 + $0x8] sm:$0xff] }
  0x4f   : > { %1094 = vmatpush.bf16.msra.mxu1 %v2372_v23  ;;  %1108 = vmatpush.bf16.msra.mxu2 %v2248_v24  ;;  %v2275_v23 = vld [vmem:[%s4208_s1 + $0x120] sm:$0xf]  ;;  %v2296_v24 = vor.u32 %v2749_v16, %v2293_v17  ;;  %v2148_v30 = vor.u32 %v2715_v22, %v2147_v21  ;;  %v173_v55 = vld [vmem:[%s3261_s21 + $0x10] sm:$0x3f]  ;;  %v2235_v63 = vld [vmem:[%s4208_s1 + $0xc8] sm:$0xf] }
  0x50   : > { %1122 = vmatpush.bf16.msra.mxu3 %v2376_v28  ;;  %726 = vmatmul.bf16.vlgmr.msrb.gmra.mxu1 %v3308_v56  ;;  %v2745_v28 = vld [vmem:[%s4208_s1 + $0x124] sm:$0xf]  ;;  %v2736_v0 = vld [vmem:[%s4208_s1 + $0xd4] sm:$0xf0]  ;;  %v2734_v3 = vld [vmem:[%s4208_s1 + $0xcc] sm:$0xf] }
  0x51   : > { %754 = vmatmul.bf16.vlgmr.msrb.gmra.mxu3 %v3308_v56  ;;  %v2755_v56 = vld [vmem:[%s4208_s1 + $0x16c] sm:$0xf0]  ;;  %v2280_v39 = vor.u32 %v2745_v28, %v2277_v29  ;;  %v2768_v2 = vld [vmem:[%s4208_s1 + $0x1d4] sm:$0xf0]  ;;  %v2237_v4 = vld [vmem:[%s4208_s1 + $0xd8] sm:$0xf0] }
  0x52   : > { %1081 = vmatpush.bf16.msra.mxu0 %v2228_v34  ;;  %v2308_v7 = vor.u32 %v2755_v56, %v2307_v51  ;;  %v2276_v34 = vor.u32 %v2747_v25, %v2275_v23  ;;  %v2363_v51 = vld [vmem:[%s4208_s1 + $0x1c8] sm:$0xf]  ;;  %v3586_v56 = vpack.c.bf16 %v173_v55, %v171_v54  ;;  %v2240_v10 = vor.u32 %v2734_v3, %v2237_v4  ;;  %v2764_v15 = vld [vmem:[%s4208_s1 + $0x1b4] sm:$0xf0]  ;;  %v2730_v16 = vld [vmem:[%s4208_s1 + $0xac] sm:$0xf] }
  0x53   : > { %1095 = vmatpush.bf16.msra.mxu1 %v2356_v35  ;;  %1109 = vmatpush.bf16.msra.mxu2 %v2232_v36  ;;  %v2152_v35 = vor.u32 %v2713_v26, %v2149_v27  ;;  %v2743_v36 = vld [vmem:[%s4208_s1 + $0x10c] sm:$0xf0]  ;;  %v2364_v9 = vor.u32 %v2768_v2, %v2363_v51  ;;  %v2219_v11 = vld [vmem:[%s4208_s1 + $0xa8] sm:$0xf]  ;;  %v2221_v17 = vld [vmem:[%s4208_s1 + $0xb8] sm:$0xf0] }
  0x54   : > { %1123 = vmatpush.bf16.msra.mxu3 %v2360_v40  ;;  %v2741_v40 = vld [vmem:[%s4208_s1 + $0x104] sm:$0xf]  ;;  %v2260_v50 = vor.u32 %v2743_v36, %v2259_v33  ;;  %v2347_v13 = vld [vmem:[%s4208_s1 + $0x1a8] sm:$0xf]  ;;  %v2224_v22 = vor.u32 %v2730_v16, %v2221_v17  ;;  %v2760_v27 = vld [vmem:[%s4208_s1 + $0x194] sm:$0xf0] }
  0x55   : > { %v2264_v57 = vor.u32 %v2741_v40, %v2261_v41  ;;  %v2348_v21 = vor.u32 %v2764_v15, %v2347_v13  ;;  %v2203_v23 = vld [vmem:[%s4208_s1 + $0x88] sm:$0xf]  ;;  %v2726_v28 = vld [vmem:[%s4208_s1 + $0x8c] sm:$0xf]  ;;  %v2205_v29 = vld [vmem:[%s4208_s1 + $0x98] sm:$0xf0] }
  0x56   : > { %1082 = vmatpush.bf16.msra.mxu0 %v2212_v46  ;;  %v2132_v46 = vor.u32 %v2711_v32, %v2131_v31  ;;  %v2331_v25 = vld [vmem:[%s4208_s1 + $0x188] sm:$0xf]  ;;  %v2333_v31 = vld [vmem:[%s4208_s1 + $0x198] sm:$0xf0]  ;;  %v2724_v36 = vld [vmem:[%s4208_s1 + $0x74] sm:$0xf0] }
  0x57   : > { %1096 = vmatpush.bf16.msra.mxu1 %v2340_v47  ;;  %1110 = vmatpush.bf16.msra.mxu2 %v2216_v48  ;;  %v2738_v47 = vld [vmem:[%s4208_s1 + $0xec] sm:$0xf]  ;;  %v2253_v48 = vld [vmem:[%s4208_s1 + $0xf8] sm:$0xf0]  ;;  %v2332_v33 = vor.u32 %v2760_v27, %v2331_v25  ;;  %v2315_v37 = vld [vmem:[%s4208_s1 + $0x168] sm:$0xf] }
  0x58   : > { %1124 = vmatpush.bf16.msra.mxu3 %v2344_v53  ;;  %v2381_v53 = vld [vmem:[%s4208_s1 + $0x1f8] sm:$0xf0]  ;;  %v2722_v40 = vld [vmem:[%s4208_s1 + $0x6c] sm:$0xf]  ;;  %v2748_v51 = vld [vmem:[%s4208_s1 + $0x134] sm:$0xf0] }
  0x59   : > { %v2189_v41 = vld [vmem:[%s4208_s1 + $0x78] sm:$0xf0]  ;;  %v2754_v42 = vld [vmem:[%s4208_s1 + $0x16c] sm:$0xf]  ;;  %v2897_v27 = vld [vmem:[%s4208_s1 + $0x5e4] sm:$0xf] }
  0x5a   : > { %1083 = vmatpush.bf16.msra.mxu0 %v2196_v60  ;;  %v174_v60 = vld [vmem:[%s3261_s21 + $0x18] sm:$0x3f]  ;;  %v2750_v55 = vld [vmem:[%s4208_s1 + $0x14c] sm:$0xf] }
  0x5b   : > { %1097 = vmatpush.bf16.msra.mxu1 %v2324_v61  ;;  %1111 = vmatpush.bf16.msra.mxu2 %v2200_v62  ;;  %v2380_v61 = vor.u32 %v2772_v45, %v2379_v44  ;;  %v2256_v62 = vor.u32 %v2738_v47, %v2253_v48  ;;  %v3597_v5 = vpack.c.bf16 %v174_v60, %v172_v59  ;;  %v2317_v43 = vld [vmem:[%s4208_s1 + $0x178] sm:$0xf0]  ;;  %v2171_v47 = vld [vmem:[%s4208_s1 + $0x48] sm:$0xf]  ;;  %v2720_v48 = vld [vmem:[%s4208_s1 + $0x54] sm:$0xf0] }
  0x5c   : > { %1125 = vmatpush.bf16.msra.mxu3 %v2328_v1  ;;  %v2384_v1 = vor.u32 %v2770_v49, %v2381_v53  ;;  %v2299_v49 = vld [vmem:[%s4208_s1 + $0x148] sm:$0xf]  ;;  %v2718_v53 = vld [vmem:[%s4208_s1 + $0x4c] sm:$0xf]  ;;  %v2173_v54 = vld [vmem:[%s4208_s1 + $0x58] sm:$0xf0] }
  0x5d   : > { %v2176_v60 = vor.u32 %v2718_v53, %v2173_v54  ;;  %v2157_v2 = vld [vmem:[%s4208_s1 + $0x38] sm:$0xf0]  ;;  %v2746_v3 = vld [vmem:[%s4208_s1 + $0x12c] sm:$0xf]  ;;  %v2889_v53 = vld [vmem:[%s4208_s1 + $0x5a4] sm:$0xf] }
  0x5e   : > { %1084 = vmatpush.bf16.msra.mxu0 %v2180_v6  ;;  %v2766_v6 = vld [vmem:[%s4208_s1 + $0x1cc] sm:$0xf]  ;;  %v2285_v4 = vld [vmem:[%s4208_s1 + $0x138] sm:$0xf0]  ;;  %v2661_v54 = vld [vmem:[%s4208_s1 + $0x5b0] sm:$0xf0] }
  0x5f   : > { %1098 = vmatpush.bf16.msra.mxu1 %v2308_v7  ;;  %1112 = vmatpush.bf16.msra.mxu2 %v2184_v8  ;;  %v2365_v7 = vld [vmem:[%s4208_s1 + $0x1d8] sm:$0xf0]  ;;  %v2236_v8 = vor.u32 %v2736_v0, %v2235_v63  ;;  %v2283_v63 = vld [vmem:[%s4208_s1 + $0x128] sm:$0xf]  ;;  %v2710_v13 = vld [vmem:[%s4208_s1 + $0xc] sm:$0xf] }
  0x60   : > { %1126 = vmatpush.bf16.msra.mxu3 %v2312_v12  ;;  %v2732_v12 = vld [vmem:[%s4208_s1 + $0xb4] sm:$0xf0]  ;;  %v2368_v14 = vor.u32 %v2766_v6, %v2365_v7  ;;  %v2139_v7 = vld [vmem:[%s4208_s1 + $0x8] sm:$0xf]  ;;  %v2141_v15 = vld [vmem:[%s4208_s1 + $0x18] sm:$0xf0] }
  0x61   : > { %v2742_v16 = vld [vmem:[%s4208_s1 + $0x10c] sm:$0xf]  ;;  %v2269_v17 = vld [vmem:[%s4208_s1 + $0x118] sm:$0xf0] }
  0x62   : > { %1085 = vmatpush.bf16.msra.mxu0 %v2164_v18  ;;  %v2762_v18 = vld [vmem:[%s4208_s1 + $0x1ac] sm:$0xf] }
  0x63   : > { %1099 = vmatpush.bf16.msra.mxu1 %v2292_v19  ;;  %1113 = vmatpush.bf16.msra.mxu2 %v2168_v20  ;;  %v2349_v19 = vld [vmem:[%s4208_s1 + $0x1b8] sm:$0xf0]  ;;  %v2220_v20 = vor.u32 %v2732_v12, %v2219_v11  ;;  %v2267_v11 = vld [vmem:[%s4208_s1 + $0x108] sm:$0xf]  ;;  %v2744_v12 = vld [vmem:[%s4208_s1 + $0x114] sm:$0xf0] }
  0x64   : > { %1127 = vmatpush.bf16.msra.mxu3 %v2296_v24  ;;  %v2728_v24 = vld [vmem:[%s4208_s1 + $0x94] sm:$0xf0]  ;;  %v2352_v26 = vor.u32 %v2762_v18, %v2349_v19  ;;  %v2563_v18 = vld [vmem:[%s4208_s1 + $0x4e0] sm:$0xf]  ;;  %v2867_v19 = vld [vmem:[%s4208_s1 + $0x4ec] sm:$0xf0]  ;;  %v2268_v25 = vor.u32 %v2744_v12, %v2267_v11 }
  0x65   : > { %v2204_v32 = vor.u32 %v2728_v24, %v2203_v23  ;;  %v2865_v23 = vld [vmem:[%s4208_s1 + $0x4e4] sm:$0xf]  ;;  %v2565_v24 = vld [vmem:[%s4208_s1 + $0x4f0] sm:$0xf0] }
  0x66   : > { %1086 = vmatpush.bf16.msra.mxu0 %v2148_v30  ;;  %v2758_v30 = vld [vmem:[%s4208_s1 + $0x18c] sm:$0xf]  ;;  %v2501_v11 = vld [vmem:[%s4208_s1 + $0x470] sm:$0xf0]  ;;  %v2881_v12 = vld [vmem:[%s4208_s1 + $0x564] sm:$0xf] }
  0x67   : > { %1100 = vmatpush.bf16.msra.mxu1 %v2276_v34  ;;  %1114 = vmatpush.bf16.msra.mxu2 %v2152_v35  ;;  %v2208_v34 = vor.u32 %v2726_v28, %v2205_v29  ;;  %v2187_v35 = vld [vmem:[%s4208_s1 + $0x68] sm:$0xf]  ;;  %v2336_v38 = vor.u32 %v2758_v30, %v2333_v31  ;;  %v2693_v28 = vld [vmem:[%s4208_s1 + $0x5f0] sm:$0xf0]  ;;  %v2272_v29 = vor.u32 %v2742_v16, %v2269_v17  ;;  %v2483_v17 = vld [vmem:[%s4208_s1 + $0x440] sm:$0xf] }
  0x68   : > { %1128 = vmatpush.bf16.msra.mxu3 %v2280_v39  ;;  %v2756_v39 = vld [vmem:[%s4208_s1 + $0x174] sm:$0xf0]  ;;  %v2188_v44 = vor.u32 %v2724_v36, %v2187_v35  ;;  %v2564_v30 = vor.u32 %v2867_v19, %v2563_v18  ;;  %v2675_v35 = vld [vmem:[%s4208_s1 + $0x5c0] sm:$0xf]  ;;  %v2696_v36 = vor.u32 %v2897_v27, %v2693_v28  ;;  %v2847_v18 = vld [vmem:[%s4208_s1 + $0x44c] sm:$0xf0] }
  0x69   : > { %v2316_v45 = vor.u32 %v2756_v39, %v2315_v37  ;;  %v2895_v37 = vld [vmem:[%s4208_s1 + $0x5cc] sm:$0xf0]  ;;  %v2549_v39 = vld [vmem:[%s4208_s1 + $0x4d0] sm:$0xf0]  ;;  %v2611_v19 = vld [vmem:[%s4208_s1 + $0x540] sm:$0xf] }
  0x6a   : > { %1087 = vmatpush.bf16.msra.mxu0 %v2132_v46  ;;  %v2192_v46 = vor.u32 %v2722_v40, %v2189_v41  ;;  %v2893_v40 = vld [vmem:[%s4208_s1 + $0x5c4] sm:$0xf]  ;;  %v2677_v41 = vld [vmem:[%s4208_s1 + $0x5d0] sm:$0xf0]  ;;  %v2467_v27 = vld [vmem:[%s4208_s1 + $0x420] sm:$0xf] }
  0x6b   : > { %1101 = vmatpush.bf16.msra.mxu1 %v2260_v50  ;;  %1115 = vmatpush.bf16.msra.mxu2 %v2136_v52  ;;  %v2320_v50 = vor.u32 %v2754_v42, %v2317_v43  ;;  %v2752_v52 = vld [vmem:[%s4208_s1 + $0x154] sm:$0xf0]  ;;  %v2676_v43 = vor.u32 %v2895_v37, %v2675_v35  ;;  %v2469_v35 = vld [vmem:[%s4208_s1 + $0x430] sm:$0xf0] }
  0x6c   : > { %1129 = vmatpush.bf16.msra.mxu3 %v2264_v57  ;;  %v2301_v57 = vld [vmem:[%s4208_s1 + $0x158] sm:$0xf0]  ;;  %v2300_v59 = vor.u32 %v2752_v52, %v2299_v49  ;;  %v2891_v49 = vld [vmem:[%s4208_s1 + $0x5ac] sm:$0xf0]  ;;  %v2533_v52 = vld [vmem:[%s4208_s1 + $0x4b0] sm:$0xf0] }
  0x6d   : > { %1088 = vmatmul.bf16.vlgmr.msra.gmra.mxu0 %v3586_v56  ;;  %v2304_v0 = vor.u32 %v2750_v55, %v2301_v57  ;;  %v2597_v37 = vld [vmem:[%s4208_s1 + $0x530] sm:$0xf0] }
  0x6e   : > { %1136 = vmatpush.bf16.msrb.mxu0 %v2252_v58  ;;  %1116 = vmatmul.bf16.vlgmr.msra.gmra.mxu2 %v3586_v56  ;;  %v2172_v58 = vor.u32 %v2720_v48, %v2171_v47  ;;  %v2659_v47 = vld [vmem:[%s4208_s1 + $0x5a0] sm:$0xf]  ;;  %v2680_v48 = vor.u32 %v2893_v40, %v2677_v41 }
  0x6f   : > { %1150 = vmatpush.bf16.msrb.mxu1 %v2380_v61  ;;  %1164 = vmatpush.bf16.msrb.mxu2 %v2256_v62  ;;  %v2155_v61 = vld [vmem:[%s4208_s1 + $0x28] sm:$0xf]  ;;  %v2716_v62 = vld [vmem:[%s4208_s1 + $0x34] sm:$0xf0]  ;;  %v2660_v57 = vor.u32 %v2891_v49, %v2659_v47  ;;  %v2579_v41 = vld [vmem:[%s4208_s1 + $0x500] sm:$0xf] }
  0x70   : > { %1178 = vmatpush.bf16.msrb.mxu3 %v2384_v1  ;;  %1102 = vmatmul.bf16.vlgmr.msra.gmra.mxu1 %v3597_v5  ;;  %v2714_v1 = vld [vmem:[%s4208_s1 + $0x2c] sm:$0xf]  ;;  %v2156_v6 = vor.u32 %v2716_v62, %v2155_v61  ;;  %v2887_v61 = vld [vmem:[%s4208_s1 + $0x58c] sm:$0xf0]  ;;  %v2853_v62 = vld [vmem:[%s4208_s1 + $0x484] sm:$0xf] }
  0x71   : > { %1130 = vmatmul.bf16.vlgmr.msra.gmra.mxu3 %v3597_v5  ;;  %v2869_v47 = vld [vmem:[%s4208_s1 + $0x504] sm:$0xf]  ;;  %v1194_v49 = vld [vmem:[%s3261_s21 + $0x10] sm:$0xff] }
  0x72   : > { %1137 = vmatpush.bf16.msrb.mxu0 %v2236_v8  ;;  %v2712_v8 = vld [vmem:[%s4208_s1 + $0x14] sm:$0xf0] }
  0x73   : > { %1151 = vmatpush.bf16.msrb.mxu1 %v2364_v9  ;;  %1165 = vmatpush.bf16.msrb.mxu2 %v2240_v10  ;;  %v2284_v9 = vor.u32 %v2748_v51, %v2283_v63  ;;  %v2160_v10 = vor.u32 %v2714_v1, %v2157_v2  ;;  %v2517_v63 = vld [vmem:[%s4208_s1 + $0x490] sm:$0xf0] }
  0x74   : > { %1179 = vmatpush.bf16.msrb.mxu3 %v2368_v14  ;;  %v2288_v14 = vor.u32 %v2746_v3, %v2285_v4  ;;  %v2645_v51 = vld [vmem:[%s4208_s1 + $0x590] sm:$0xf0]  ;;  %v2520_v3 = vor.u32 %v2853_v62, %v2517_v63  ;;  %v2499_v4 = vld [vmem:[%s4208_s1 + $0x460] sm:$0xf] }
  0x76   : > { %1138 = vmatpush.bf16.msrb.mxu0 %v2220_v20  ;;  %v2691_v20 = vld [vmem:[%s4208_s1 + $0x5e0] sm:$0xf] }
  0x77   : > { %1152 = vmatpush.bf16.msrb.mxu1 %v2348_v21  ;;  %1166 = vmatpush.bf16.msrb.mxu2 %v2224_v22  ;;  %v2140_v21 = vor.u32 %v2712_v8, %v2139_v7  ;;  %v2899_v22 = vld [vmem:[%s4208_s1 + $0x5ec] sm:$0xf0]  ;;  %v2627_v7 = vld [vmem:[%s4208_s1 + $0x560] sm:$0xf] }
  0x78   : > { %1180 = vmatpush.bf16.msrb.mxu3 %v2352_v26  ;;  %v2144_v26 = vor.u32 %v2710_v13, %v2141_v15  ;;  %v2692_v31 = vor.u32 %v2899_v22, %v2691_v20  ;;  %v2629_v13 = vld [vmem:[%s4208_s1 + $0x570] sm:$0xf0]  ;;  %v2845_v22 = vld [vmem:[%s4208_s1 + $0x444] sm:$0xf] }
  0x79   : > { %v2632_v20 = vor.u32 %v2881_v12, %v2629_v13  ;;  %v2862_v13 = vld [vmem:[%s4208_s1 + $0x4cc] sm:$0xf] }
  0x7a   : > { %1139 = vmatpush.bf16.msrb.mxu0 %v2204_v32  ;;  %v2568_v32 = vor.u32 %v2865_v23, %v2565_v24  ;;  %v2485_v23 = vld [vmem:[%s4208_s1 + $0x450] sm:$0xf0]  ;;  %v2877_v24 = vld [vmem:[%s4208_s1 + $0x544] sm:$0xf] }
  0x7b   : > { %1153 = vmatpush.bf16.msrb.mxu1 %v2332_v33  ;;  %1167 = vmatpush.bf16.msrb.mxu2 %v2208_v34  ;;  %v2547_v33 = vld [vmem:[%s4208_s1 + $0x4c0] sm:$0xf]  ;;  %v2863_v34 = vld [vmem:[%s4208_s1 + $0x4cc] sm:$0xf0] }
  0x7c   : > { %1181 = vmatpush.bf16.msrb.mxu3 %v2336_v38  ;;  %v2861_v38 = vld [vmem:[%s4208_s1 + $0x4c4] sm:$0xf]  ;;  %v2548_v42 = vor.u32 %v2863_v34, %v2547_v33 }
  0x7d   : > { %v2841_v34 = vld [vmem:[%s4208_s1 + $0x424] sm:$0xf] }
  0x7e   : > { %1140 = vmatpush.bf16.msrb.mxu0 %v2188_v44  ;;  %v2552_v44 = vor.u32 %v2861_v38, %v2549_v39  ;;  %v2451_v38 = vld [vmem:[%s4208_s1 + $0x400] sm:$0xf]  ;;  %v2839_v39 = vld [vmem:[%s4208_s1 + $0x40c] sm:$0xf0] }
  0x7f   : > { %1154 = vmatpush.bf16.msrb.mxu1 %v2316_v45  ;;  %1168 = vmatpush.bf16.msrb.mxu2 %v2192_v46  ;;  %v2531_v45 = vld [vmem:[%s4208_s1 + $0x4a0] sm:$0xf]  ;;  %v2859_v46 = vld [vmem:[%s4208_s1 + $0x4ac] sm:$0xf0] }
  0x80   : > { %1182 = vmatpush.bf16.msrb.mxu3 %v2320_v50  ;;  %v2857_v50 = vld [vmem:[%s4208_s1 + $0x4a4] sm:$0xf]  ;;  %v2532_v55 = vor.u32 %v2859_v46, %v2531_v45  ;;  %v2472_v46 = vor.u32 %v2841_v34, %v2469_v35  ;;  %v2856_v34 = vld [vmem:[%s4208_s1 + $0x494] sm:$0xf0]  ;;  %v2651_v35 = vld [vmem:[%s4208_s1 + $0x588] sm:$0xf] }
  0x82   : > { %1141 = vmatpush.bf16.msrb.mxu0 %v2172_v58  ;;  %v2536_v58 = vor.u32 %v2857_v50, %v2533_v52  ;;  %v2581_v52 = vld [vmem:[%s4208_s1 + $0x510] sm:$0xf0] }
  0x83   : > { %1155 = vmatpush.bf16.msrb.mxu1 %v2300_v59  ;;  %1169 = vmatpush.bf16.msrb.mxu2 %v2176_v60  ;;  %v2855_v59 = vld [vmem:[%s4208_s1 + $0x48c] sm:$0xf0]  ;;  %v2643_v60 = vld [vmem:[%s4208_s1 + $0x580] sm:$0xf] }
  0x84   : > { %1183 = vmatpush.bf16.msrb.mxu3 %v2304_v0  ;;  %v2885_v0 = vld [vmem:[%s4208_s1 + $0x584] sm:$0xf]  ;;  %v2644_v2 = vor.u32 %v2887_v61, %v2643_v60  ;;  %v2866_v60 = vld [vmem:[%s4208_s1 + $0x4ec] sm:$0xf] }
  0x85   : > { %v2648_v8 = vor.u32 %v2885_v0, %v2645_v51  ;;  %v2898_v0 = vld [vmem:[%s4208_s1 + $0x5ec] sm:$0xf]  ;;  %v2701_v51 = vld [vmem:[%s4208_s1 + $0x5f8] sm:$0xf0] }
  0x86   : > { %1142 = vmatpush.bf16.msrb.mxu0 %v2156_v6  ;;  %v2851_v6 = vld [vmem:[%s4208_s1 + $0x46c] sm:$0xf0] }
  0x87   : > { %1156 = vmatpush.bf16.msrb.mxu1 %v2284_v9  ;;  %1170 = vmatpush.bf16.msrb.mxu2 %v2160_v10  ;;  %v2883_v9 = vld [vmem:[%s4208_s1 + $0x56c] sm:$0xf0]  ;;  %v2849_v10 = vld [vmem:[%s4208_s1 + $0x464] sm:$0xf] }
  0x88   : > { %1184 = vmatpush.bf16.msrb.mxu3 %v2288_v14  ;;  %v2500_v14 = vor.u32 %v2851_v6, %v2499_v4  ;;  %v2628_v15 = vor.u32 %v2883_v9, %v2627_v7  ;;  %v2504_v16 = vor.u32 %v2849_v10, %v2501_v11  ;;  %v2555_v4 = vld [vmem:[%s4208_s1 + $0x4c8] sm:$0xf]  ;;  %v2896_v10 = vld [vmem:[%s4208_s1 + $0x5d4] sm:$0xf0]  ;;  %v2704_v11 = vor.u32 %v2898_v0, %v2701_v51  ;;  %v2878_v0 = vld [vmem:[%s4208_s1 + $0x54c] sm:$0xf] }
  0x89   : > { %v2683_v9 = vld [vmem:[%s4208_s1 + $0x5c8] sm:$0xf]  ;;  %v2621_v51 = vld [vmem:[%s4208_s1 + $0x558] sm:$0xf0] }
  0x8a   : > { %1143 = vmatpush.bf16.msrb.mxu0 %v2140_v21  ;;  %v2879_v21 = vld [vmem:[%s4208_s1 + $0x54c] sm:$0xf0] }
  0x8b   : > { %1157 = vmatpush.bf16.msrb.mxu1 %v2268_v25  ;;  %1171 = vmatpush.bf16.msrb.mxu2 %v2144_v26  ;;  %v2613_v25 = vld [vmem:[%s4208_s1 + $0x550] sm:$0xf0]  ;;  %v2484_v26 = vor.u32 %v2847_v18, %v2483_v17  ;;  %v2612_v28 = vor.u32 %v2879_v21, %v2611_v19  ;;  %v2685_v17 = vld [vmem:[%s4208_s1 + $0x5d8] sm:$0xf0]  ;;  %v2684_v19 = vor.u32 %v2896_v10, %v2683_v9  ;;  %v2539_v21 = vld [vmem:[%s4208_s1 + $0x4a8] sm:$0xf] }
  0x8c   : > { %1185 = vmatpush.bf16.msrb.mxu3 %v2272_v29  ;;  %v2488_v29 = vor.u32 %v2845_v22, %v2485_v23  ;;  %v2616_v33 = vor.u32 %v2877_v24, %v2613_v25  ;;  %v2860_v22 = vld [vmem:[%s4208_s1 + $0x4b4] sm:$0xf0]  ;;  %v2667_v23 = vld [vmem:[%s4208_s1 + $0x5a8] sm:$0xf]  ;;  %v2842_v10 = vld [vmem:[%s4208_s1 + $0x42c] sm:$0xf] }
  0x8d   : > { %1144 = vmatmul.bf16.vlgmr.msrb.gmra.mxu0 %v3586_v56  ;;  %v2892_v25 = vld [vmem:[%s4208_s1 + $0x5b4] sm:$0xf0] }
  0x8e   : > { %1589 = vmatpush.bf16.msra.mxu0 %v2564_v30  ;;  %1172 = vmatmul.bf16.vlgmr.msrb.gmra.mxu2 %v3586_v56  ;;  %v2515_v56 = vld [vmem:[%s4208_s1 + $0x480] sm:$0xf]  ;;  %v2843_v30 = vld [vmem:[%s4208_s1 + $0x42c] sm:$0xf0]  ;;  %v2876_v9 = vld [vmem:[%s4208_s1 + $0x534] sm:$0xf0] }
  0x8f   : > { %1603 = vmatpush.bf16.msra.mxu1 %v2692_v31  ;;  %1617 = vmatpush.bf16.msra.mxu2 %v2568_v32  ;;  %v2516_v1 = vor.u32 %v2855_v59, %v2515_v56  ;;  %v2595_v31 = vld [vmem:[%s4208_s1 + $0x520] sm:$0xf]  ;;  %v2875_v32 = vld [vmem:[%s4208_s1 + $0x52c] sm:$0xf0]  ;;  %v2468_v40 = vor.u32 %v2843_v30, %v2467_v27  ;;  %v2452_v56 = vor.u32 %v2839_v39, %v2451_v38  ;;  %v2900_v59 = vld [vmem:[%s4208_s1 + $0x5f4] sm:$0xf0] }
  0x90   : > { %1631 = vmatpush.bf16.msra.mxu3 %v2696_v36  ;;  %1158 = vmatmul.bf16.vlgmr.msrb.gmra.mxu1 %v3597_v5  ;;  %v2873_v36 = vld [vmem:[%s4208_s1 + $0x524] sm:$0xf]  ;;  %v2596_v45 = vor.u32 %v2875_v32, %v2595_v31  ;;  %v2541_v27 = vld [vmem:[%s4208_s1 + $0x4b8] sm:$0xf0]  ;;  %v2540_v30 = vor.u32 %v2860_v22, %v2539_v21  ;;  %v2668_v31 = vor.u32 %v2892_v25, %v2667_v23  ;;  %v2854_v38 = vld [vmem:[%s4208_s1 + $0x48c] sm:$0xf] }
  0x91   : > { %1186 = vmatmul.bf16.vlgmr.msrb.gmra.mxu3 %v3597_v5  ;;  %v2664_v5 = vor.u32 %v2889_v53, %v2661_v54  ;;  %v2600_v50 = vor.u32 %v2873_v36, %v2597_v37  ;;  %v1193_v53 = vld [vmem:[%s3261_s21 + $0x8] sm:$0xfc]  ;;  %v1195_v54 = vld [vmem:[%s3261_s21 + $0x18] sm:$0xff] }
  0x92   : > { %1590 = vmatpush.bf16.msra.mxu0 %v2548_v42  ;;  %v2871_v42 = vld [vmem:[%s4208_s1 + $0x50c] sm:$0xf0]  ;;  %v2888_v37 = vld [vmem:[%s4208_s1 + $0x594] sm:$0xf0]  ;;  %v2525_v39 = vld [vmem:[%s4208_s1 + $0x498] sm:$0xf0] }
  0x93   : > { %1604 = vmatpush.bf16.msra.mxu1 %v2676_v43  ;;  %1618 = vmatpush.bf16.msra.mxu2 %v2552_v44  ;;  %v2837_v43 = vld [vmem:[%s4208_s1 + $0x404] sm:$0xf]  ;;  %v2453_v44 = vld [vmem:[%s4208_s1 + $0x410] sm:$0xf0]  ;;  %v2580_v62 = vor.u32 %v2871_v42, %v2579_v41  ;;  %v2653_v41 = vld [vmem:[%s4208_s1 + $0x598] sm:$0xf0] }
  0x94   : > { %1632 = vmatpush.bf16.msra.mxu3 %v2680_v48  ;;  %v1192_v48 = vld [vmem:[%s3261_s21] sm:$0xfc]  ;;  %v2456_v63 = vor.u32 %v2837_v43, %v2453_v44  ;;  %v2652_v43 = vor.u32 %v2888_v37, %v2651_v35  ;;  %v2528_v44 = vor.u32 %v2854_v38, %v2525_v39  ;;  %v2587_v21 = vld [vmem:[%s4208_s1 + $0x508] sm:$0xf]  ;;  %v2872_v23 = vld [vmem:[%s4208_s1 + $0x514] sm:$0xf0] }
  0x95   : > { %v1196_v61 = vpack.c.bf16 %v1194_v49, %v1192_v48  ;;  %v2884_v49 = vld [vmem:[%s4208_s1 + $0x574] sm:$0xf0]  ;;  %v2461_v25 = vld [vmem:[%s4208_s1 + $0x418] sm:$0xf0] }
  0x96   : > { %1591 = vmatpush.bf16.msra.mxu0 %v2532_v55  ;;  %v2571_v55 = vld [vmem:[%s4208_s1 + $0x4e8] sm:$0xf] }
  0x97   : > { %1605 = vmatpush.bf16.msra.mxu1 %v2660_v57  ;;  %1619 = vmatpush.bf16.msra.mxu2 %v2536_v58  ;;  %v2868_v57 = vld [vmem:[%s4208_s1 + $0x4f4] sm:$0xf0]  ;;  %v2699_v58 = vld [vmem:[%s4208_s1 + $0x5e8] sm:$0xf]  ;;  %v3989_v12 = vrot.slane %v1196_v61, 1 }
  0x98   : > { %1633 = vmatpush.bf16.msra.mxu3 %v2664_v5  ;;  %v2573_v5 = vld [vmem:[%s4208_s1 + $0x4f8] sm:$0xf0]  ;;  %v2700_v6 = vor.u32 %v2900_v59, %v2699_v58  ;;  %v2848_v59 = vld [vmem:[%s4208_s1 + $0x454] sm:$0xf0] }
  0x99   : > { %v2576_v7 = vor.u32 %v2866_v60, %v2573_v5  ;;  %v2619_v60 = vld [vmem:[%s4208_s1 + $0x548] sm:$0xf]  ;;  %v2880_v61 = vld [vmem:[%s4208_s1 + $0x554] sm:$0xf0] }
  0x9a   : > { %1592 = vmatpush.bf16.msra.mxu0 %v2516_v1  ;;  %v1197_v1 = vpack.c.bf16 %v1195_v54, %v1193_v53  ;;  %v2882_v53 = vld [vmem:[%s4208_s1 + $0x56c] sm:$0xf]  ;;  %v2637_v54 = vld [vmem:[%s4208_s1 + $0x578] sm:$0xf0] }
  0x9b   : > { %1606 = vmatpush.bf16.msra.mxu1 %v2644_v2  ;;  %1620 = vmatpush.bf16.msra.mxu2 %v2520_v3  ;;  %v2584_v2 = vor.u32 %v2869_v47, %v2581_v52  ;;  %v2572_v3 = vor.u32 %v2868_v57, %v2571_v55  ;;  %v2635_v47 = vld [vmem:[%s4208_s1 + $0x568] sm:$0xf]  ;;  %v2509_v52 = vld [vmem:[%s4208_s1 + $0x478] sm:$0xf0]  ;;  %v2640_v5 = vor.u32 %v2882_v53, %v2637_v54 }
  0x9c   : > { %1634 = vmatpush.bf16.msra.mxu3 %v2648_v8  ;;  %v2864_v8 = vld [vmem:[%s4208_s1 + $0x4d4] sm:$0xf0]  ;;  %v2636_v57 = vor.u32 %v2884_v49, %v2635_v47 }
  0x9d   : > { %v2556_v18 = vor.u32 %v2864_v8, %v2555_v4  ;;  %v2475_v4 = vld [vmem:[%s4208_s1 + $0x428] sm:$0xf]  ;;  %v2624_v8 = vor.u32 %v2878_v0, %v2621_v51 }
  0x9e   : > { %1593 = vmatpush.bf16.msra.mxu0 %v2500_v14  ;;  %v2557_v14 = vld [vmem:[%s4208_s1 + $0x4d8] sm:$0xf0] }
  0x9f   : > { %1607 = vmatpush.bf16.msra.mxu1 %v2628_v15  ;;  %1621 = vmatpush.bf16.msra.mxu2 %v2504_v16  ;;  %v3997_v15 = vrot.slane %v1197_v1, 1  ;;  %v2894_v16 = vld [vmem:[%s4208_s1 + $0x5cc] sm:$0xf] }
  0xa0   : > { %1635 = vmatpush.bf16.msra.mxu3 %v2632_v20  ;;  %v2560_v20 = vor.u32 %v2862_v13, %v2557_v14  ;;  %v2688_v24 = vor.u32 %v2894_v16, %v2685_v17  ;;  %v2874_v13 = vld [vmem:[%s4208_s1 + $0x52c] sm:$0xf]  ;;  %v2605_v14 = vld [vmem:[%s4208_s1 + $0x538] sm:$0xf0] }
  0xa1   : > { %v2608_v22 = vor.u32 %v2874_v13, %v2605_v14 }
  0xa2   : > { %1594 = vmatpush.bf16.msra.mxu0 %v2484_v26  ;;  %v2858_v26 = vld [vmem:[%s4208_s1 + $0x4ac] sm:$0xf] }
  0xa3   : > { %1608 = vmatpush.bf16.msra.mxu1 %v2612_v28  ;;  %1622 = vmatpush.bf16.msra.mxu2 %v2488_v29  ;;  %v2890_v28 = vld [vmem:[%s4208_s1 + $0x5ac] sm:$0xf]  ;;  %v2669_v29 = vld [vmem:[%s4208_s1 + $0x5b8] sm:$0xf0]  ;;  %v2544_v32 = vor.u32 %v2858_v26, %v2541_v27 }
  0xa4   : > { %1636 = vmatpush.bf16.msra.mxu3 %v2616_v33  ;;  %v2523_v33 = vld [vmem:[%s4208_s1 + $0x488] sm:$0xf]  ;;  %v2672_v36 = vor.u32 %v2890_v28, %v2669_v29  ;;  %v2870_v26 = vld [vmem:[%s4208_s1 + $0x50c] sm:$0xf]  ;;  %v2589_v27 = vld [vmem:[%s4208_s1 + $0x518] sm:$0xf0] }
  0xa5   : > { %v2524_v42 = vor.u32 %v2856_v34, %v2523_v33 }
  0xa6   : > { %1595 = vmatpush.bf16.msra.mxu0 %v2468_v40  ;;  %v2886_v40 = vld [vmem:[%s4208_s1 + $0x58c] sm:$0xf] }
  0xa7   : > { %1609 = vmatpush.bf16.msra.mxu1 %v2596_v45  ;;  %1623 = vmatpush.bf16.msra.mxu2 %v2472_v46  ;;  %v2507_v45 = vld [vmem:[%s4208_s1 + $0x468] sm:$0xf]  ;;  %v2852_v46 = vld [vmem:[%s4208_s1 + $0x474] sm:$0xf0]  ;;  %v2656_v48 = vor.u32 %v2886_v40, %v2653_v41 }
  0xa8   : > { %1637 = vmatpush.bf16.msra.mxu3 %v2600_v50  ;;  %v2850_v50 = vld [vmem:[%s4208_s1 + $0x46c] sm:$0xf]  ;;  %v2508_v55 = vor.u32 %v2852_v46, %v2507_v45 }
  0xa9   : > { %v2512_v58 = vor.u32 %v2850_v50, %v2509_v52 }
  0xaa   : > { %1596 = vmatpush.bf16.msra.mxu0 %v2452_v56  ;;  %v2491_v56 = vld [vmem:[%s4208_s1 + $0x448] sm:$0xf] }
  0xab   : > { %1610 = vmatpush.bf16.msra.mxu1 %v2580_v62  ;;  %1624 = vmatpush.bf16.msra.mxu2 %v2456_v63  ;;  %v2846_v62 = vld [vmem:[%s4208_s1 + $0x44c] sm:$0xf]  ;;  %v2493_v63 = vld [vmem:[%s4208_s1 + $0x458] sm:$0xf0]  ;;  %v2492_v1 = vor.u32 %v2848_v59, %v2491_v56 }
  0xac   : > { %1638 = vmatpush.bf16.msra.mxu3 %v2584_v2  ;;  %v2620_v2 = vor.u32 %v2880_v61, %v2619_v60 }
  0xad   : > { %1597 = vmatmul.bf16.vlgmr.msra.gmra.mxu0 %v3989_v12 }
  0xae   : > { %1645 = vmatpush.bf16.msrb.mxu0 %v2572_v3  ;;  %1611 = vmatmul.bf16.vlgmr.msra.gmra.mxu1 %v3997_v15  ;;  %v2496_v3 = vor.u32 %v2846_v62, %v2493_v63 }
  0xaf   : > { %1659 = vmatpush.bf16.msrb.mxu1 %v2700_v6  ;;  %1673 = vmatpush.bf16.msrb.mxu2 %v2576_v7  ;;  %v2844_v6 = vld [vmem:[%s4208_s1 + $0x434] sm:$0xf0]  ;;  %v2603_v7 = vld [vmem:[%s4208_s1 + $0x528] sm:$0xf] }
  0xb0   : > { %1687 = vmatpush.bf16.msrb.mxu3 %v2704_v11  ;;  %1625 = vmatmul.bf16.vlgmr.msra.gmra.mxu2 %v3989_v12  ;;  %v2477_v11 = vld [vmem:[%s4208_s1 + $0x438] sm:$0xf0]  ;;  %v2476_v16 = vor.u32 %v2844_v6, %v2475_v4  ;;  %v2604_v17 = vor.u32 %v2876_v9, %v2603_v7 }
  0xb1   : > { %1639 = vmatmul.bf16.vlgmr.msra.gmra.mxu3 %v3997_v15 }
  0xb2   : > { %1646 = vmatpush.bf16.msrb.mxu0 %v2556_v18  ;;  %v2480_v18 = vor.u32 %v2842_v10, %v2477_v11 }
  0xb3   : > { %1660 = vmatpush.bf16.msrb.mxu1 %v2684_v19  ;;  %1674 = vmatpush.bf16.msrb.mxu2 %v2560_v20  ;;  %v2459_v19 = vld [vmem:[%s4208_s1 + $0x408] sm:$0xf]  ;;  %v2840_v20 = vld [vmem:[%s4208_s1 + $0x414] sm:$0xf0] }
  0xb4   : > { %1688 = vmatpush.bf16.msrb.mxu3 %v2688_v24  ;;  %v2838_v24 = vld [vmem:[%s4208_s1 + $0x40c] sm:$0xf]  ;;  %v2460_v28 = vor.u32 %v2840_v20, %v2459_v19 }
  0xb6   : > { %1647 = vmatpush.bf16.msrb.mxu0 %v2540_v30  ;;  %v657_v29 = vpop.f32.mrf.mxu0  ;;  %v2588_v30 = vor.u32 %v2872_v23, %v2587_v21 }
  0xb7   : > { %1661 = vmatpush.bf16.msrb.mxu1 %v2668_v31  ;;  %1675 = vmatpush.bf16.msrb.mxu2 %v2544_v32  ;;  %v2464_v31 = vor.u32 %v2838_v24, %v2461_v25  ;;  %v2592_v32 = vor.u32 %v2870_v26, %v2589_v27  ;;  %v671_v33 = vpop.f32.mrf.mxu1 }
  0xb8   : > { %1689 = vmatpush.bf16.msrb.mxu3 %v2672_v36  ;;  %v672_v0 = vadd.f32 %v671_v33, %v657_v29 }
  0xba   : > { %1648 = vmatpush.bf16.msrb.mxu0 %v2524_v42 }
  0xbb   : > { %1662 = vmatpush.bf16.msrb.mxu1 %v2652_v43  ;;  %1676 = vmatpush.bf16.msrb.mxu2 %v2528_v44  ;;  %v685_v34 = vpop.f32.mrf.mxu2 }
  0xbc   : > { %1690 = vmatpush.bf16.msrb.mxu3 %v2656_v48  ;;  %v699_v35 = vpop.f32.mrf.mxu3 }
  0xbd   : > { %v700_v10 = vadd.f32 %v699_v35, %v685_v34 }
  0xbe   : > { %1649 = vmatpush.bf16.msrb.mxu0 %v2508_v55  ;;  %v659_v36 = vpop.f32.mrf.mxu0 }
  0xbf   : > { %1663 = vmatpush.bf16.msrb.mxu1 %v2636_v57  ;;  %1677 = vmatpush.bf16.msrb.mxu2 %v2512_v58  ;;  %v673_v37 = vpop.f32.mrf.mxu1 }
  0xc0   : > { %1691 = vmatpush.bf16.msrb.mxu3 %v2640_v5  ;;  %v674_v11 = vadd.f32 %v673_v37, %v659_v36 }
  0xc2   : > { %1650 = vmatpush.bf16.msrb.mxu0 %v2492_v1 }
  0xc3   : > { %1664 = vmatpush.bf16.msrb.mxu1 %v2620_v2  ;;  %1678 = vmatpush.bf16.msrb.mxu2 %v2496_v3  ;;  %v687_v38 = vpop.f32.mrf.mxu2  ;;  %v4174_v2 = vld [vmem:[%s4209_s2] sm:$0xf] }
  0xc4   : > { %1692 = vmatpush.bf16.msrb.mxu3 %v2624_v8  ;;  %v701_v39 = vpop.f32.mrf.mxu3  ;;  %v1711_v9 = vperm.slane %v4174_v2, 0  ;;  %v1712_v24 = vperm.slane %v4174_v2, 1 }
  0xc6   : > { %1651 = vmatpush.bf16.msrb.mxu0 %v2476_v16 }
  0xc7   : > { %1665 = vmatpush.bf16.msrb.mxu1 %v2604_v17  ;;  %1679 = vmatpush.bf16.msrb.mxu2 %v2480_v18 }
  0xc8   : > { %1693 = vmatpush.bf16.msrb.mxu3 %v2608_v22 }
  0xca   : > { %1652 = vmatpush.bf16.msrb.mxu0 %v2460_v28  ;;  %v713_v40 = vpop.f32.mrf.mxu0  ;;  %v702_v28 = vadd.f32 %v701_v39, %v687_v38 }
  0xcb   : > { %1666 = vmatpush.bf16.msrb.mxu1 %v2588_v30  ;;  %1680 = vmatpush.bf16.msrb.mxu2 %v2464_v31 }
  0xcc   : > { %1694 = vmatpush.bf16.msrb.mxu3 %v2592_v32 }
  0xcd   : > { %1653 = vmatmul.bf16.vlgmr.msrb.gmra.mxu0 %v3989_v12  ;;  %v727_v41 = vpop.f32.mrf.mxu1 }
  0xce   : > { %1667 = vmatmul.bf16.vlgmr.msrb.gmra.mxu1 %v3997_v15  ;;  %1681 = vmatmul.bf16.vlgmr.msrb.gmra.mxu2 %v3989_v12  ;;  %v4157_v42 = vadd.f32 %v727_v41, %v713_v40 }
  0xcf   : > { %1695 = vmatmul.bf16.vlgmr.msrb.gmra.mxu3 %v3997_v15 }
  0xd1   : > { %v741_v43 = vpop.f32.mrf.mxu2 }
  0xd2   : > { %v715_v46 = vpop.f32.mrf.mxu0 }
  0xd4   : > { %v755_v44 = vpop.f32.mrf.mxu3 }
  0xd5   : > { %v4159_v45 = vadd.f32 %v755_v44, %v741_v43  ;;  %v729_v47 = vpop.f32.mrf.mxu1 }
  0xd6   : > { %v4161_v48 = vadd.f32 %v729_v47, %v715_v46 }
  0xd9   : > { %v743_v49 = vpop.f32.mrf.mxu2 }
  0xdc   : > { %v757_v12 = vpop.f32.mrf.mxu3 }
  0xdd   : > { %v4163_v50 = vadd.f32 %v757_v12, %v743_v49 }
  0xea   : > { %v1089_v15 = vpop.f32.mrf.mxu0 }
  0xeb   : > { %v1090_v51 = vadd.f32 %v1089_v15, %v672_v0  ;;  %v1713_v15 = vperm.slane %v4174_v2, 2 }
  0xed   : > { %v1103_v52 = vpop.f32.mrf.mxu1 }
  0xee   : > { %v1104_v7 = vadd.f32 %v1103_v52, %v1090_v51 }
  0xf1   : > { %v1117_v53 = vpop.f32.mrf.mxu2 }
  0xf2   : > { %v1091_v55 = vpop.f32.mrf.mxu0  ;;  %v1118_v14 = vadd.f32 %v1117_v53, %v700_v10 }
  0xf3   : > { %v1092_v16 = vadd.f32 %v1091_v55, %v674_v11 }
  0xf4   : > { %v1131_v54 = vpop.f32.mrf.mxu3 }
  0xf5   : > { %v1105_v57 = vpop.f32.mrf.mxu1  ;;  %v1132_v22 = vadd.f32 %v1131_v54, %v1118_v14 }
  0xf6   : > { %v1106_v26 = vadd.f32 %v1105_v57, %v1092_v16 }
  0xf9   : > { %v1119_v58 = vpop.f32.mrf.mxu2 }
  0xfa   : > { %v1120_v31 = vadd.f32 %v1119_v58, %v702_v28 }
  0xfc   : > { %v1133_v56 = vpop.f32.mrf.mxu3 }
  0xfd   : > { %v1134_v40 = vadd.f32 %v1133_v56, %v1120_v31 }
 0x10a   : > { %v1145_v59 = vpop.f32.mrf.mxu0 }
 0x10b   : > { %v1146_v38 = vadd.f32 %v1145_v59, %v4157_v42  ;;  %v1714_v59 = vperm.slane %v4174_v2, 3 }
 0x10d   : > { %v1159_v60 = vpop.f32.mrf.mxu1 }
 0x10e   : > { %v1160_v49 = vadd.f32 %v1159_v60, %v1146_v38 }
 0x111   : > { %v1173_v5 = vpop.f32.mrf.mxu2 }
 0x112   : > { %v1147_v62 = vpop.f32.mrf.mxu0  ;;  %v1174_v53 = vadd.f32 %v1173_v5, %v4159_v45 }
 0x113   : > { %v1148_v54 = vadd.f32 %v1147_v62, %v4161_v48 }
 0x114   : > { %v4165_v61 = vpop.f32.mrf.mxu3 }
 0x115   : > { %v4167_v63 = vpop.f32.mrf.mxu1  ;;  %v1188_v51 = vadd.f32 %v4165_v61, %v1174_v53 }
 0x119   : > { %v4169_v1 = vpop.f32.mrf.mxu2 }
 0x11a   : > { %v1176_v48 = vadd.f32 %v4169_v1, %v4163_v50 }
 0x11c   : > { %v4176_v3 = vpop.f32.mrf.mxu3 }
 0x11d   : > { %v1190_v10 = vadd.f32 %v4176_v3, %v1176_v48 }
 0x12a   : > { %v1598_v4 = vpop.f32.mrf.mxu0 }
 0x12b   : > { %v1612_v6 = vpop.f32.mrf.mxu1 }
 0x12c   : > { %v1613_v8 = vadd.f32 %v1612_v6, %v1598_v4  ;;  %v1162_v4 = vadd.f32 %v4167_v63, %v1148_v54 }
 0x12e   : > { %v1701_v13 = vadd.f32 %v1613_v8, %v1104_v7 }
 0x130   : > { %v1719_v17 = vadd.f32 %v1711_v9, %v1701_v13 }
 0x132   : > { %v1727_v19 = vmax.f32 %v1719_v17, 0.0  ;;  %v1600_v21 = vpop.f32.mrf.mxu0 }
 0x133   : > { %v1626_v18 = vpop.f32.mrf.mxu2  ;;  %v1614_v25 = vpop.f32.mrf.mxu1 }
 0x134   : > { %v1640_v20 = vpop.f32.mrf.mxu3  ;;  %1735 = vst [vmem:[%s4183_s7] sm:$0xff] %v1727_v19  ;;  %v1615_v27 = vadd.f32 %v1614_v25, %v1600_v21 }
 0x135   : > { %v1641_v23 = vadd.f32 %v1640_v20, %v1626_v18 }
 0x136   : > { %v1705_v30 = vadd.f32 %v1615_v27, %v1106_v26 }
 0x137   : > { %v1702_v29 = vadd.f32 %v1641_v23, %v1132_v22 }
 0x138   : > { %v1723_v33 = vadd.f32 %v1711_v9, %v1705_v30 }
 0x139   : > { %v1720_v32 = vadd.f32 %v1712_v24, %v1702_v29 }
 0x13a   : > { %v1731_v36 = vmax.f32 %v1723_v33, 0.0 }
 0x13b   : > { %v1728_v34 = vmax.f32 %v1720_v32, 0.0  ;;  %v1628_v35 = vpop.f32.mrf.mxu2 }
 0x13c   : > { %v1642_v37 = vpop.f32.mrf.mxu3  ;;  %1740 = vst [vmem:[%s4183_s7 + $0x20] sm:$0x3f] %v1731_v36 }
 0x13d   : > { %1736 = vst [vmem:[%s4183_s7 + $0x8] sm:$0xff] %v1728_v34  ;;  %v1643_v41 = vadd.f32 %v1642_v37, %v1628_v35 }
 0x13f   : > { %v1706_v43 = vadd.f32 %v1643_v41, %v1134_v40 }
 0x141   : > { %v1724_v44 = vadd.f32 %v1712_v24, %v1706_v43 }
 0x143   : > { %v1732_v46 = vmax.f32 %v1724_v44, 0.0 }
 0x145   : > { %1741 = vst [vmem:[%s4183_s7 + $0x28] sm:$0x3f] %v1732_v46 }
 0x14a   : > { %v1654_v39 = vpop.f32.mrf.mxu0 }
 0x14b   : > { %v1668_v47 = vpop.f32.mrf.mxu1 }
 0x14c   : > { %v1669_v12 = vadd.f32 %v1668_v47, %v1654_v39 }
 0x14e   : > { %v1703_v52 = vadd.f32 %v1669_v12, %v1160_v49 }
 0x150   : > { %v1721_v55 = vadd.f32 %v1713_v15, %v1703_v52 }
 0x151   : > { %v1682_v57 = vpop.f32.mrf.mxu2 }
 0x152   : > { %v1729_v58 = vmax.f32 %v1721_v55, 0.0  ;;  %v1696_v56 = vpop.f32.mrf.mxu3  ;;  %v1656_v0 = vpop.f32.mrf.mxu0 }
 0x153   : > { %v1697_v42 = vadd.f32 %v1696_v56, %v1682_v57  ;;  %v1670_v60 = vpop.f32.mrf.mxu1 }
 0x154   : > { %1737 = vst [vmem:[%s4183_s7 + $0x10] sm:$0xff] %v1729_v58  ;;  %v1671_v6 = vadd.f32 %v1670_v60, %v1656_v0 }
 0x155   : > { %v1704_v45 = vadd.f32 %v1697_v42, %v1188_v51 }
 0x156   : > { %v1707_v5 = vadd.f32 %v1671_v6, %v1162_v4 }
 0x157   : > { %v1722_v62 = vadd.f32 %v1714_v59, %v1704_v45 }
 0x158   : > { %v1725_v7 = vadd.f32 %v1713_v15, %v1707_v5 }
 0x159   : > { %v1730_v61 = vmax.f32 %v1722_v62, 0.0  ;;  %v1684_v8 = vpop.f32.mrf.mxu2 }
 0x15a   : > { %v1733_v9 = vmax.f32 %v1725_v7, 0.0  ;;  %v1698_v2 = vpop.f32.mrf.mxu3 }
 0x15b   : > { %1739 = vst.msk [vmem:[%s4183_s7 + $0x18] sm:$0xff] %vm1738_vm0, %v1730_v61  ;;  %v1699_v63 = vadd.f32 %v1698_v2, %v1684_v8 }
 0x15c   : > { %1742 = vst [vmem:[%s4183_s7 + $0x30] sm:$0x3f] %v1733_v9 }
 0x15d   : > { %v1708_v11 = vadd.f32 %v1699_v63, %v1190_v10 }
 0x15f   : > { %v1726_v13 = vadd.f32 %v1714_v59, %v1708_v11 }
 0x161   : > { %v1734_v14 = vmax.f32 %v1726_v13, 0.0 }
 0x163   : > { %1744 = vst.msk [vmem:[%s4183_s7 + $0x38] sm:$0x3f] %vm1743_vm1, %v1734_v14 }
 0x164 PF: > { %s13_s12 = sadd.s32 1, %s2915_s12  }
 0x165   : > { %p10_p4 = scmp.ge.s32.totalorder %s13_s12, 4  }
 0x167   :  { %12 = sbr.rel (!%p10_p4) target bundleno = 1 (0x1), region = 64 }

// kernel: cnn_forward.10
= control target key start
LH: loop header
LB: loop body
LE: loop exit
PB: predicated region body
PF: predicated region fallthrough
CT: control target
= control target key end

     0   :  { %s3366_s12 = smov 0   ;;  %s4785_s0 = inlined_call_operand.vmem [shape: f32[2,9,288], index: 0, kind: input, shape index: {}]   ;;  %s4786_s1 = inlined_call_operand.vmem [shape: bf16[3,288,448], index: 1, kind: input, shape index: {}]   ;;  %s4787_s2 = inlined_call_operand.vmem [shape: f32[1,448], index: 2, kind: input, shape index: {}]   ;;  %s4788_s3 = inlined_call_operand.vmem [shape: f32[2,7,448], index: 3, kind: output, shape index: {}]  }
   0x1 LB: > { %s2082_s13 = sadd.s32 4294967295, %s3344_s12   ;;  %p2086_p0 = scmp.ge.s32.totalorder %s3344_s12, 1  ;;  %s3344_s12 = sphi %s3366_s12, %s13_s12  }
   0x2   : > { %p137_p1 = scmp.lt.s32.totalorder %s3344_s12, 3 }
   0x4   : > { %p138_p2 = pnand %p2086_p0, %p137_p1 }
   0x5   : > { %p161_p3 = scmp.lt.s32.totalorder (!%p138_p2), %s2082_s13, 1 }
   0x6   : > { %141 = sbr.rel (%p138_p2) target bundleno = 374 (0x176), region = 32 }
   0xb   : > { %v2276_v0 = vld [vmem:[%s4786_s1 + $0x320] sm:$0xf]  ;;  %v3215_v1 = vld [vmem:[%s4786_s1 + $0x32c] sm:$0xf0]  ;;  %v3245_v9 = vld [vmem:[%s4786_s1 + $0x424] sm:$0xf] }
   0xc   : > { %v2404_v2 = vld [vmem:[%s4786_s1 + $0x420] sm:$0xf]  ;;  %v2277_v3 = vor.u32 %v3215_v1, %v2276_v0  ;;  %v3247_v4 = vld [vmem:[%s4786_s1 + $0x42c] sm:$0xf0]  ;;  %v2406_v10 = vld [vmem:[%s4786_s1 + $0x430] sm:$0xf0] }
   0xd   : > { %v2436_v5 = vld [vmem:[%s4786_s1 + $0x460] sm:$0xf]  ;;  %v3255_v6 = vld [vmem:[%s4786_s1 + $0x46c] sm:$0xf0]  ;;  %v2405_v7 = vor.u32 %v3247_v4, %v2404_v2  ;;  %v2409_v12 = vor.u32 %v3245_v9, %v2406_v10  ;;  %v3241_v20 = vld [vmem:[%s4786_s1 + $0x404] sm:$0xf] }
   0xe   : > { %v2437_v8 = vor.u32 %v3255_v6, %v2436_v5  ;;  %v2260_v11 = vld [vmem:[%s4786_s1 + $0x300] sm:$0xf]  ;;  %716 = vmatpush.bf16.msra.mxu0 %v2277_v3  ;;  %v3211_v13 = vld [vmem:[%s4786_s1 + $0x30c] sm:$0xf0]  ;;  %v2390_v22 = vld [vmem:[%s4786_s1 + $0x410] sm:$0xf0] }
   0xf   : > { %v2388_v14 = vld [vmem:[%s4786_s1 + $0x400] sm:$0xf]  ;;  %v3243_v15 = vld [vmem:[%s4786_s1 + $0x40c] sm:$0xf0]  ;;  %729 = vmatpush.bf16.msra.mxu1 %v2405_v7  ;;  %v2261_v16 = vor.u32 %v3211_v13, %v2260_v11  ;;  %768 = vmatpush.bf16.msra.mxu2 %v2409_v12  ;;  %v3213_v23 = vld [vmem:[%s4786_s1 + $0x324] sm:$0xf]  ;;  %v2393_v25 = vor.u32 %v3241_v20, %v2390_v22 }
  0x10   : > { %748 = vmatpush.bf16.msra.mxu3 %v2437_v8  ;;  %v2389_v17 = vor.u32 %v3243_v15, %v2388_v14  ;;  %v2420_v18 = vld [vmem:[%s4786_s1 + $0x440] sm:$0xf]  ;;  %v3251_v19 = vld [vmem:[%s4786_s1 + $0x44c] sm:$0xf0]  ;;  %v2278_v24 = vld [vmem:[%s4786_s1 + $0x330] sm:$0xf0] }
  0x11   : > { %v2421_v21 = vor.u32 %v3251_v19, %v2420_v18  ;;  %v2281_v26 = vor.u32 %v3213_v23, %v2278_v24  ;;  %v2244_v27 = vld [vmem:[%s4786_s1 + $0x2e0] sm:$0xf]  ;;  %v3207_v28 = vld [vmem:[%s4786_s1 + $0x2ec] sm:$0xf0]  ;;  %v3237_v32 = vld [vmem:[%s4786_s1 + $0x3e4] sm:$0xf] }
  0x12   : > { %v2372_v29 = vld [vmem:[%s4786_s1 + $0x3e0] sm:$0xf]  ;;  %717 = vmatpush.bf16.msra.mxu0 %v2261_v16  ;;  %v2245_v30 = vor.u32 %v3207_v28, %v2244_v27  ;;  %v3239_v31 = vld [vmem:[%s4786_s1 + $0x3ec] sm:$0xf0]  ;;  %v2374_v33 = vld [vmem:[%s4786_s1 + $0x3f0] sm:$0xf0] }
  0x13   : > { %730 = vmatpush.bf16.msra.mxu1 %v2389_v17  ;;  %v2373_v34 = vor.u32 %v3239_v31, %v2372_v29  ;;  %v3209_v35 = vld [vmem:[%s4786_s1 + $0x304] sm:$0xf]  ;;  %v2262_v36 = vld [vmem:[%s4786_s1 + $0x310] sm:$0xf0]  ;;  %v2228_v37 = vld [vmem:[%s4786_s1 + $0x2c0] sm:$0xf]  ;;  %769 = vmatpush.bf16.msra.mxu2 %v2393_v25  ;;  %v2377_v38 = vor.u32 %v3237_v32, %v2374_v33 }
  0x14   : > { %749 = vmatpush.bf16.msra.mxu3 %v2421_v21  ;;  %v2265_v39 = vor.u32 %v3209_v35, %v2262_v36  ;;  %v3203_v40 = vld [vmem:[%s4786_s1 + $0x2cc] sm:$0xf0]  ;;  %v2356_v41 = vld [vmem:[%s4786_s1 + $0x3c0] sm:$0xf]  ;;  %v3233_v43 = vld [vmem:[%s4786_s1 + $0x3c4] sm:$0xf] }
  0x15   : > { %v3235_v42 = vld [vmem:[%s4786_s1 + $0x3cc] sm:$0xf0]  ;;  %v2358_v44 = vld [vmem:[%s4786_s1 + $0x3d0] sm:$0xf0]  ;;  %v3205_v45 = vld [vmem:[%s4786_s1 + $0x2e4] sm:$0xf]  ;;  %v2229_v46 = vor.u32 %v3203_v40, %v2228_v37 }
  0x16   : > { %718 = vmatpush.bf16.msra.mxu0 %v2245_v30  ;;  %v2246_v47 = vld [vmem:[%s4786_s1 + $0x2f0] sm:$0xf0]  ;;  %v2357_v48 = vor.u32 %v3235_v42, %v2356_v41  ;;  %v2212_v49 = vld [vmem:[%s4786_s1 + $0x2a0] sm:$0xf]  ;;  %v3199_v50 = vld [vmem:[%s4786_s1 + $0x2ac] sm:$0xf0]  ;;  %v2361_v51 = vor.u32 %v3233_v43, %v2358_v44 }
  0x17   : > { %731 = vmatpush.bf16.msra.mxu1 %v2373_v34  ;;  %770 = vmatpush.bf16.msra.mxu2 %v2377_v38  ;;  %v2249_v52 = vor.u32 %v3205_v45, %v2246_v47  ;;  %v2340_v53 = vld [vmem:[%s4786_s1 + $0x3a0] sm:$0xf]  ;;  %v3231_v54 = vld [vmem:[%s4786_s1 + $0x3ac] sm:$0xf0]  ;;  %v3229_v55 = vld [vmem:[%s4786_s1 + $0x3a4] sm:$0xf]  ;;  %v2213_v59 = vor.u32 %v3199_v50, %v2212_v49 }
  0x18   : > { %755 = vmatpush.bf16.msrb.mxu3 %v2281_v26  ;;  %v2342_v56 = vld [vmem:[%s4786_s1 + $0x3b0] sm:$0xf0]  ;;  %v3201_v57 = vld [vmem:[%s4786_s1 + $0x2c4] sm:$0xf]  ;;  %v2196_v60 = vld [vmem:[%s4786_s1 + $0x280] sm:$0xf]  ;;  %v2341_v61 = vor.u32 %v3231_v54, %v2340_v53 }
  0x19   : > { %v2230_v58 = vld [vmem:[%s4786_s1 + $0x2d0] sm:$0xf0]  ;;  %v3195_v62 = vld [vmem:[%s4786_s1 + $0x28c] sm:$0xf0]  ;;  %v2324_v63 = vld [vmem:[%s4786_s1 + $0x380] sm:$0xf]  ;;  %v2345_v0 = vor.u32 %v3229_v55, %v2342_v56 }
  0x1a   : > { %719 = vmatpush.bf16.msra.mxu0 %v2229_v46  ;;  %v2233_v1 = vor.u32 %v3201_v57, %v2230_v58  ;;  %v3227_v2 = vld [vmem:[%s4786_s1 + $0x38c] sm:$0xf0]  ;;  %v3225_v3 = vld [vmem:[%s4786_s1 + $0x384] sm:$0xf]  ;;  %v2326_v4 = vld [vmem:[%s4786_s1 + $0x390] sm:$0xf0]  ;;  %v2197_v7 = vor.u32 %v3195_v62, %v2196_v60 }
  0x1b   : > { %732 = vmatpush.bf16.msra.mxu1 %v2357_v48  ;;  %771 = vmatpush.bf16.msra.mxu2 %v2361_v51  ;;  %s4790_s13 = smov (!%p161_p3, %s2082_s13), 1  ;;  %v3197_v5 = vld [vmem:[%s4786_s1 + $0x2a4] sm:$0xf]  ;;  %v2214_v6 = vld [vmem:[%s4786_s1 + $0x2b0] sm:$0xf0]  ;;  %v2325_v10 = vor.u32 %v3227_v2, %v2324_v63  ;;  %v2329_v13 = vor.u32 %v3225_v3, %v2326_v4  ;;  %vm712_vm0 = vcmask 261120  }
  0x1c   : > { %756 = vmatpush.bf16.msrb.mxu3 %v2265_v39  ;;  %v2180_v8 = vld [vmem:[%s4786_s1 + $0x260] sm:$0xf]  ;;  %v3191_v9 = vld [vmem:[%s4786_s1 + $0x26c] sm:$0xf0]  ;;  %s3329_s18 = smul.u32 48, %s4790_s13  ;;  %v2217_v14 = vor.u32 %v3197_v5, %v2214_v6  ;;  %s3112_s6 = sshll.u32 %s4790_s13, 5 }
  0x1d   : > { %v2308_v11 = vld [vmem:[%s4786_s1 + $0x360] sm:$0xf]  ;;  %v3223_v12 = vld [vmem:[%s4786_s1 + $0x36c] sm:$0xf0]  ;;  %v3221_v15 = vld [vmem:[%s4786_s1 + $0x364] sm:$0xf]  ;;  %v2181_v22 = vor.u32 %v3191_v9, %v2180_v8  ;;  %s4776_s9 = scalar_lea.vmem %s4788_s3, %s3112_s6 }
  0x1e   : > { %720 = vmatpush.bf16.msra.mxu0 %v2213_v59  ;;  %v2310_v16 = vld [vmem:[%s4786_s1 + $0x370] sm:$0xf0]  ;;  %v3193_v17 = vld [vmem:[%s4786_s1 + $0x284] sm:$0xf]  ;;  %s3555_s4 = scalar_lea.vmem %s4785_s0, %s3329_s18  ;;  %v2164_v19 = vld [vmem:[%s4786_s1 + $0x240] sm:$0xf]  ;;  %v2309_v26 = vor.u32 %v3223_v12, %v2308_v11 }
  0x1f   : > { %733 = vmatpush.bf16.msra.mxu1 %v2341_v61  ;;  %772 = vmatpush.bf16.msra.mxu2 %v2345_v0  ;;  %v2198_v18 = vld [vmem:[%s4786_s1 + $0x290] sm:$0xf0]  ;;  %v3187_v20 = vld [vmem:[%s4786_s1 + $0x24c] sm:$0xf0]  ;;  %v2292_v23 = vld [vmem:[%s4786_s1 + $0x340] sm:$0xf]  ;;  %v2313_v31 = vor.u32 %v3221_v15, %v2310_v16 }
  0x20   : > { %757 = vmatpush.bf16.msrb.mxu3 %v2249_v52  ;;  %v252_v21 = vld [vmem:[%s3555_s4 + $0x10] sm:$0xfe]  ;;  %v3217_v27 = vld [vmem:[%s4786_s1 + $0x344] sm:$0xf]  ;;  %v2201_v32 = vor.u32 %v3193_v17, %v2198_v18  ;;  %v251_v35 = vld [vmem:[%s3555_s4 + $0x8] sm:$0xfe]  ;;  %v2165_v41 = vor.u32 %v3187_v20, %v2164_v19 }
  0x21   : > { %v3219_v24 = vld [vmem:[%s4786_s1 + $0x34c] sm:$0xf0]  ;;  %v255_v25 = vpack.c.bf16 %v252_v21, %v252_v21  ;;  %v2294_v28 = vld [vmem:[%s4786_s1 + $0x350] sm:$0xf0]  ;;  %v3189_v29 = vld [vmem:[%s4786_s1 + $0x264] sm:$0xf]  ;;  %v254_v45 = vpack.c.bf16 %v251_v35, %v251_v35 }
  0x22   : > { %721 = vmatpush.bf16.msra.mxu0 %v2197_v7  ;;  %v2182_v30 = vld [vmem:[%s4786_s1 + $0x270] sm:$0xf0]  ;;  %v3253_v33 = vld [vmem:[%s4786_s1 + $0x464] sm:$0xf]  ;;  %v2284_v39 = vld [vmem:[%s4786_s1 + $0x328] sm:$0xf]  ;;  %v2293_v47 = vor.u32 %v3219_v24, %v2292_v23  ;;  %v2297_v52 = vor.u32 %v3217_v27, %v2294_v28 }
  0x23   : > { %734 = vmatpush.bf16.msra.mxu1 %v2325_v10  ;;  %773 = vmatpush.bf16.msra.mxu2 %v2329_v13  ;;  %v250_v34 = vld [vmem:[%s3555_s4] sm:$0xfe]  ;;  %v344_v36 = vshrl.u32 %v255_v25, 16  ;;  %v346_v37 = vshll.u32 %v255_v25, 16  ;;  %v2438_v38 = vld [vmem:[%s4786_s1 + $0x470] sm:$0xf0]  ;;  %v2185_v53 = vor.u32 %v3189_v29, %v2182_v30 }
  0x24   : > { %758 = vmatpush.bf16.msrb.mxu3 %v2233_v1  ;;  %v253_v40 = vpack.c.bf16 %v250_v34, %v250_v34  ;;  %v3216_v42 = vld [vmem:[%s4786_s1 + $0x334] sm:$0xf0]  ;;  %v2444_v43 = vld [vmem:[%s4786_s1 + $0x468] sm:$0xf]  ;;  %v3185_v50 = vld [vmem:[%s4786_s1 + $0x244] sm:$0xf]  ;;  %v2441_v59 = vor.u32 %v3253_v33, %v2438_v38 }
  0x25   : > { %v3256_v44 = vld [vmem:[%s4786_s1 + $0x474] sm:$0xf0]  ;;  %v348_v46 = vrot.slane %v346_v37, 1  ;;  %v2166_v51 = vld [vmem:[%s4786_s1 + $0x250] sm:$0xf0]  ;;  %v337_v54 = vshrl.u32 %v254_v45, 16  ;;  %v2285_v60 = vor.u32 %v3216_v42, %v2284_v39 }
  0x26   : > { %722 = vmatpush.bf16.msra.mxu0 %v2181_v22  ;;  %v330_v48 = vshrl.u32 %v253_v40, 16  ;;  %v332_v49 = vshll.u32 %v253_v40, 16  ;;  %v339_v55 = vshll.u32 %v254_v45, 16  ;;  %v3249_v56 = vld [vmem:[%s4786_s1 + $0x444] sm:$0xf]  ;;  %v2445_v0 = vor.u32 %v3256_v44, %v2444_v43 }
  0x27   : > { %735 = vmatpush.bf16.msra.mxu1 %v2309_v26  ;;  %774 = vmatpush.bf16.msra.mxu2 %v2313_v31  ;;  %v2422_v57 = vld [vmem:[%s4786_s1 + $0x450] sm:$0xf0]  ;;  %v3617_v58 = vor.u32 %v348_v46, %v344_v36  ;;  %v2268_v62 = vld [vmem:[%s4786_s1 + $0x308] sm:$0xf]  ;;  %v3212_v63 = vld [vmem:[%s4786_s1 + $0x314] sm:$0xf0]  ;;  %v2169_v9 = vor.u32 %v3185_v50, %v2166_v51 }
  0x28   : > { %759 = vmatpush.bf16.msrb.mxu3 %v2217_v14  ;;  %v334_v61 = vrot.slane %v332_v49, 1  ;;  %v341_v1 = vrot.slane %v339_v55, 1  ;;  %v2428_v2 = vld [vmem:[%s4786_s1 + $0x448] sm:$0xf]  ;;  %v3252_v3 = vld [vmem:[%s4786_s1 + $0x454] sm:$0xf0]  ;;  %v2425_v13 = vor.u32 %v3249_v56, %v2422_v57  ;;  %v2269_v14 = vor.u32 %v3212_v63, %v2268_v62 }
  0x29   : > { %2450 = vmatmul.msk.bf16.vlgmr.msra.gmra.mxu3 %vm712_vm0, %v3617_v58  ;;  %v2412_v5 = vld [vmem:[%s4786_s1 + $0x428] sm:$0xf]  ;;  %v3248_v6 = vld [vmem:[%s4786_s1 + $0x434] sm:$0xf0]  ;;  %v3214_v7 = vld [vmem:[%s4786_s1 + $0x32c] sm:$0xf]  ;;  %v2429_v15 = vor.u32 %v3252_v3, %v2428_v2 }
  0x2a   : > { %723 = vmatpush.bf16.msra.mxu0 %v2165_v41  ;;  %v3633_v4 = vor.u32 %v334_v61, %v330_v48  ;;  %v3644_v8 = vor.u32 %v341_v1, %v337_v54  ;;  %v2286_v10 = vld [vmem:[%s4786_s1 + $0x338] sm:$0xf0]  ;;  %v3246_v11 = vld [vmem:[%s4786_s1 + $0x42c] sm:$0xf]  ;;  %v2413_v16 = vor.u32 %v3248_v6, %v2412_v5  ;;  %v2252_v17 = vld [vmem:[%s4786_s1 + $0x2e8] sm:$0xf] }
  0x2b   : > { %736 = vmatpush.bf16.msra.mxu1 %v2293_v47  ;;  %775 = vmatpush.bf16.msra.mxu2 %v2297_v52  ;;  %v2414_v12 = vld [vmem:[%s4786_s1 + $0x438] sm:$0xf0]  ;;  %v3208_v18 = vld [vmem:[%s4786_s1 + $0x2f4] sm:$0xf0]  ;;  %v2289_v19 = vor.u32 %v3214_v7, %v2286_v10  ;;  %v2396_v21 = vld [vmem:[%s4786_s1 + $0x408] sm:$0xf] }
  0x2c   : > { %760 = vmatpush.bf16.msrb.mxu3 %v2201_v32  ;;  %v2417_v20 = vor.u32 %v3246_v11, %v2414_v12  ;;  %v3244_v22 = vld [vmem:[%s4786_s1 + $0x414] sm:$0xf0]  ;;  %v3210_v23 = vld [vmem:[%s4786_s1 + $0x30c] sm:$0xf]  ;;  %v2270_v24 = vld [vmem:[%s4786_s1 + $0x318] sm:$0xf0]  ;;  %v2253_v27 = vor.u32 %v3208_v18, %v2252_v17 }
  0x2d   : > { %724 = vmatmul.bf16.vlgmr.msra.gmra.mxu0 %v3633_v4  ;;  %v3242_v25 = vld [vmem:[%s4786_s1 + $0x40c] sm:$0xf]  ;;  %v2398_v26 = vld [vmem:[%s4786_s1 + $0x418] sm:$0xf0]  ;;  %v2397_v28 = vor.u32 %v3244_v22, %v2396_v21  ;;  %v2236_v29 = vld [vmem:[%s4786_s1 + $0x2c8] sm:$0xf]  ;;  %v2273_v31 = vor.u32 %v3210_v23, %v2270_v24 }
  0x2e   : > { %787 = vmatpush.bf16.msrb.mxu0 %v2441_v59  ;;  %776 = vmatmul.bf16.vlgmr.msra.gmra.mxu2 %v3644_v8  ;;  %v3204_v30 = vld [vmem:[%s4786_s1 + $0x2d4] sm:$0xf0]  ;;  %v2401_v32 = vor.u32 %v3242_v25, %v2398_v26  ;;  %v2380_v33 = vld [vmem:[%s4786_s1 + $0x3e8] sm:$0xf]  ;;  %v3206_v35 = vld [vmem:[%s4786_s1 + $0x2ec] sm:$0xf] }
  0x2f   : > { %794 = vmatpush.bf16.msrb.mxu1 %v2285_v60  ;;  %826 = vmatpush.bf16.msrb.mxu2 %v2445_v0  ;;  %v3240_v34 = vld [vmem:[%s4786_s1 + $0x3f4] sm:$0xf0]  ;;  %v2254_v36 = vld [vmem:[%s4786_s1 + $0x2f8] sm:$0xf0]  ;;  %v2237_v37 = vor.u32 %v3204_v30, %v2236_v29  ;;  %v3238_v38 = vld [vmem:[%s4786_s1 + $0x3ec] sm:$0xf] }
  0x30   : > { %761 = vmatpush.bf16.msrb.mxu3 %v2185_v53  ;;  %737 = vmatmul.bf16.vlgmr.msra.gmra.mxu1 %v3644_v8  ;;  %v2382_v39 = vld [vmem:[%s4786_s1 + $0x3f8] sm:$0xf0]  ;;  %v2381_v40 = vor.u32 %v3240_v34, %v2380_v33  ;;  %v2220_v41 = vld [vmem:[%s4786_s1 + $0x2a8] sm:$0xf]  ;;  %v3200_v42 = vld [vmem:[%s4786_s1 + $0x2b4] sm:$0xf0]  ;;  %v2257_v43 = vor.u32 %v3206_v35, %v2254_v36 }
  0x31   : > { %v2364_v44 = vld [vmem:[%s4786_s1 + $0x3c8] sm:$0xf]  ;;  %v3236_v45 = vld [vmem:[%s4786_s1 + $0x3d4] sm:$0xf0]  ;;  %v2385_v46 = vor.u32 %v3238_v38, %v2382_v39  ;;  %v3202_v47 = vld [vmem:[%s4786_s1 + $0x2cc] sm:$0xf]  ;;  %v2221_v49 = vor.u32 %v3200_v42, %v2220_v41 }
  0x32   : > { %788 = vmatpush.bf16.msrb.mxu0 %v2425_v13  ;;  %v2238_v48 = vld [vmem:[%s4786_s1 + $0x2d8] sm:$0xf0]  ;;  %v3234_v50 = vld [vmem:[%s4786_s1 + $0x3cc] sm:$0xf]  ;;  %v2365_v52 = vor.u32 %v3236_v45, %v2364_v44  ;;  %v2204_v53 = vld [vmem:[%s4786_s1 + $0x288] sm:$0xf] }
  0x33   : > { %795 = vmatpush.bf16.msrb.mxu1 %v2269_v14  ;;  %827 = vmatpush.bf16.msrb.mxu2 %v2429_v15  ;;  %v2366_v51 = vld [vmem:[%s4786_s1 + $0x3d8] sm:$0xf0]  ;;  %v3196_v54 = vld [vmem:[%s4786_s1 + $0x294] sm:$0xf0]  ;;  %v2241_v55 = vor.u32 %v3202_v47, %v2238_v48  ;;  %v2348_v56 = vld [vmem:[%s4786_s1 + $0x3a8] sm:$0xf] }
  0x34   : > { %762 = vmatpush.bf16.msrb.mxu3 %v2169_v9  ;;  %v3232_v57 = vld [vmem:[%s4786_s1 + $0x3b4] sm:$0xf0]  ;;  %v2369_v59 = vor.u32 %v3234_v50, %v2366_v51  ;;  %v3198_v60 = vld [vmem:[%s4786_s1 + $0x2ac] sm:$0xf]  ;;  %v2222_v61 = vld [vmem:[%s4786_s1 + $0x2b8] sm:$0xf0]  ;;  %v2205_v62 = vor.u32 %v3196_v54, %v2204_v53 }
  0x35   : > { %v3230_v63 = vld [vmem:[%s4786_s1 + $0x3ac] sm:$0xf]  ;;  %v2350_v0 = vld [vmem:[%s4786_s1 + $0x3b8] sm:$0xf0]  ;;  %v2349_v1 = vor.u32 %v3232_v57, %v2348_v56  ;;  %v2188_v2 = vld [vmem:[%s4786_s1 + $0x268] sm:$0xf]  ;;  %v2225_v5 = vor.u32 %v3198_v60, %v2222_v61 }
  0x36   : > { %833 = vmatpush.bf16.msra.mxu0 %v2289_v19  ;;  %v3192_v3 = vld [vmem:[%s4786_s1 + $0x274] sm:$0xf0]  ;;  %v2332_v6 = vld [vmem:[%s4786_s1 + $0x388] sm:$0xf]  ;;  %v2353_v9 = vor.u32 %v3230_v63, %v2350_v0  ;;  %v3194_v10 = vld [vmem:[%s4786_s1 + $0x28c] sm:$0xf] }
  0x37   : > { %846 = vmatpush.bf16.msra.mxu2 %v2417_v20  ;;  %796 = vmatpush.bf16.msrb.mxu1 %v2253_v27  ;;  %v3228_v7 = vld [vmem:[%s4786_s1 + $0x394] sm:$0xf0]  ;;  %v2206_v11 = vld [vmem:[%s4786_s1 + $0x298] sm:$0xf0]  ;;  %v2189_v12 = vor.u32 %v3192_v3, %v2188_v2  ;;  %v3226_v13 = vld [vmem:[%s4786_s1 + $0x38c] sm:$0xf] }
  0x38   : > { %807 = vmatpush.bf16.msra.mxu3 %v2413_v16  ;;  %v2334_v14 = vld [vmem:[%s4786_s1 + $0x398] sm:$0xf0]  ;;  %v2333_v15 = vor.u32 %v3228_v7, %v2332_v6  ;;  %v2172_v16 = vld [vmem:[%s4786_s1 + $0x248] sm:$0xf]  ;;  %v3188_v17 = vld [vmem:[%s4786_s1 + $0x254] sm:$0xf0]  ;;  %v2209_v19 = vor.u32 %v3194_v10, %v2206_v11 }
  0x39   : > { %763 = vmatmul.bf16.vlgmr.msrb.gmra.mxu3 %v3633_v4  ;;  %v2316_v18 = vld [vmem:[%s4786_s1 + $0x368] sm:$0xf]  ;;  %v3224_v20 = vld [vmem:[%s4786_s1 + $0x374] sm:$0xf0]  ;;  %v3254_v21 = vld [vmem:[%s4786_s1 + $0x46c] sm:$0xf]  ;;  %v2337_v23 = vor.u32 %v3226_v13, %v2334_v14  ;;  %v2173_v26 = vor.u32 %v3188_v17, %v2172_v16 }
  0x3a   : > { %834 = vmatpush.bf16.msra.mxu0 %v2273_v31  ;;  %v2446_v22 = vld [vmem:[%s4786_s1 + $0x478] sm:$0xf0]  ;;  %v3190_v24 = vld [vmem:[%s4786_s1 + $0x26c] sm:$0xf]  ;;  %v2317_v29 = vor.u32 %v3224_v20, %v2316_v18  ;;  %v2300_v30 = vld [vmem:[%s4786_s1 + $0x348] sm:$0xf] }
  0x3b   : > { %847 = vmatpush.bf16.msra.mxu2 %v2401_v32  ;;  %797 = vmatpush.bf16.msrb.mxu1 %v2237_v37  ;;  %v2190_v25 = vld [vmem:[%s4786_s1 + $0x278] sm:$0xf0]  ;;  %v3222_v27 = vld [vmem:[%s4786_s1 + $0x36c] sm:$0xf]  ;;  %v3220_v31 = vld [vmem:[%s4786_s1 + $0x354] sm:$0xf0]  ;;  %v2449_v33 = vor.u32 %v3254_v21, %v2446_v22 }
  0x3c   : > { %808 = vmatpush.bf16.msra.mxu3 %v2397_v28  ;;  %v2318_v28 = vld [vmem:[%s4786_s1 + $0x378] sm:$0xf0]  ;;  %v3186_v32 = vld [vmem:[%s4786_s1 + $0x24c] sm:$0xf]  ;;  %v2193_v34 = vor.u32 %v3190_v24, %v2190_v25  ;;  %v3143_v41 = vld [vmem:[%s4786_s1 + $0xec] sm:$0xf0]  ;;  %v2301_v45 = vor.u32 %v3220_v31, %v2300_v30 }
  0x3d   : > { %2451 = vmatmul.msk.bf16.vlgmr.msrb.gmra.mxu0 %vm712_vm0, %v3617_v58  ;;  %v2174_v35 = vld [vmem:[%s4786_s1 + $0x258] sm:$0xf0]  ;;  %v3250_v36 = vld [vmem:[%s4786_s1 + $0x44c] sm:$0xf]  ;;  %v2321_v38 = vor.u32 %v3222_v27, %v2318_v28  ;;  %v3175_v44 = vld [vmem:[%s4786_s1 + $0x1ec] sm:$0xf0] }
  0x3e   : > { %835 = vmatpush.bf16.msra.mxu0 %v2257_v43  ;;  %2452 = vmatmul.msk.bf16.vlgmr.msrb.gmra.mxu2 %vm712_vm0, %v3617_v58  ;;  %v2430_v37 = vld [vmem:[%s4786_s1 + $0x458] sm:$0xf0]  ;;  %v3218_v39 = vld [vmem:[%s4786_s1 + $0x34c] sm:$0xf]  ;;  %v2696_v43 = vld [vmem:[%s4786_s1 + $0x1e0] sm:$0xf] }
  0x3f   : > { %848 = vmatpush.bf16.msra.mxu2 %v2385_v46  ;;  %798 = vmatpush.bf16.msrb.mxu1 %v2221_v49  ;;  %v2302_v42 = vld [vmem:[%s4786_s1 + $0x358] sm:$0xf0]  ;;  %v3141_v46 = vld [vmem:[%s4786_s1 + $0xe4] sm:$0xf]  ;;  %v2570_v47 = vld [vmem:[%s4786_s1 + $0xf0] sm:$0xf0]  ;;  %v2433_v48 = vor.u32 %v3250_v36, %v2430_v37  ;;  %v2177_v49 = vor.u32 %v3186_v32, %v2174_v35  ;;  %v2697_v54 = vor.u32 %v3175_v44, %v2696_v43 }
  0x40   : > { %809 = vmatpush.bf16.msra.mxu3 %v2381_v40  ;;  %v2568_v40 = vld [vmem:[%s4786_s1 + $0xe0] sm:$0xf]  ;;  %v2305_v53 = vor.u32 %v3218_v39, %v2302_v42  ;;  %v3139_v56 = vld [vmem:[%s4786_s1 + $0xcc] sm:$0xf0]  ;;  %v2573_v57 = vor.u32 %v3141_v46, %v2570_v47  ;;  %v3137_v61 = vld [vmem:[%s4786_s1 + $0xc4] sm:$0xf] }
  0x41   : > { %v2569_v50 = vor.u32 %v3143_v41, %v2568_v40  ;;  %v2728_v51 = vld [vmem:[%s4786_s1 + $0x220] sm:$0xf]  ;;  %v3171_v60 = vld [vmem:[%s4786_s1 + $0x1cc] sm:$0xf0]  ;;  %v3133_v11 = vld [vmem:[%s4786_s1 + $0xa4] sm:$0xf] }
  0x42   : > { %836 = vmatpush.bf16.msra.mxu0 %v2241_v55  ;;  %v2552_v55 = vld [vmem:[%s4786_s1 + $0xc0] sm:$0xf]  ;;  %v3179_v2 = vld [vmem:[%s4786_s1 + $0x20c] sm:$0xf0]  ;;  %v2522_v20 = vld [vmem:[%s4786_s1 + $0x90] sm:$0xf0] }
  0x43   : > { %849 = vmatpush.bf16.msra.mxu2 %v2369_v59  ;;  %799 = vmatpush.bf16.msrb.mxu1 %v2205_v62  ;;  %v2680_v59 = vld [vmem:[%s4786_s1 + $0x1c0] sm:$0xf]  ;;  %v2554_v62 = vld [vmem:[%s4786_s1 + $0xd0] sm:$0xf0]  ;;  %v2553_v0 = vor.u32 %v3139_v56, %v2552_v55  ;;  %v3135_v6 = vld [vmem:[%s4786_s1 + $0xac] sm:$0xf0] }
  0x44   : > { %810 = vmatpush.bf16.msra.mxu3 %v2365_v52  ;;  %v3183_v52 = vld [vmem:[%s4786_s1 + $0x22c] sm:$0xf0]  ;;  %v2681_v3 = vor.u32 %v3171_v60, %v2680_v59  ;;  %v2557_v7 = vor.u32 %v3137_v61, %v2554_v62  ;;  %v2520_v16 = vld [vmem:[%s4786_s1 + $0x80] sm:$0xf]  ;;  %v3173_v21 = vld [vmem:[%s4786_s1 + $0x1e4] sm:$0xf] }
  0x45   : > { %v2729_v63 = vor.u32 %v3183_v52, %v2728_v51  ;;  %v3167_v10 = vld [vmem:[%s4786_s1 + $0x1ac] sm:$0xf0]  ;;  %v2698_v22 = vld [vmem:[%s4786_s1 + $0x1f0] sm:$0xf0]  ;;  %v2504_v25 = vld [vmem:[%s4786_s1 + $0x60] sm:$0xf] }
  0x46   : > { %837 = vmatpush.bf16.msra.mxu0 %v2225_v5  ;;  %v2536_v5 = vld [vmem:[%s4786_s1 + $0xa0] sm:$0xf]  ;;  %v3131_v17 = vld [vmem:[%s4786_s1 + $0x8c] sm:$0xf0]  ;;  %v2701_v28 = vor.u32 %v3173_v21, %v2698_v22  ;;  %v3125_v31 = vld [vmem:[%s4786_s1 + $0x64] sm:$0xf] }
  0x47   : > { %850 = vmatpush.bf16.msra.mxu2 %v2353_v9  ;;  %800 = vmatpush.bf16.msrb.mxu1 %v2189_v12  ;;  %v2664_v9 = vld [vmem:[%s4786_s1 + $0x1a0] sm:$0xf]  ;;  %v2538_v12 = vld [vmem:[%s4786_s1 + $0xb0] sm:$0xf0]  ;;  %v2537_v14 = vor.u32 %v3135_v6, %v2536_v5  ;;  %v3159_v30 = vld [vmem:[%s4786_s1 + $0x16c] sm:$0xf0] }
  0x48   : > { %811 = vmatpush.bf16.msra.mxu3 %v2349_v1  ;;  %v2712_v1 = vld [vmem:[%s4786_s1 + $0x200] sm:$0xf]  ;;  %v2541_v18 = vor.u32 %v3133_v11, %v2538_v12  ;;  %v2506_v32 = vld [vmem:[%s4786_s1 + $0x70] sm:$0xf0]  ;;  %v3121_v42 = vld [vmem:[%s4786_s1 + $0x44] sm:$0xf] }
  0x49   : > { %v2713_v13 = vor.u32 %v3179_v2, %v2712_v1  ;;  %v2488_v37 = vld [vmem:[%s4786_s1 + $0x40] sm:$0xf]  ;;  %v2509_v39 = vor.u32 %v3125_v31, %v2506_v32  ;;  %v2490_v43 = vld [vmem:[%s4786_s1 + $0x50] sm:$0xf0]  ;;  %v3165_v44 = vld [vmem:[%s4786_s1 + $0x1a4] sm:$0xf] }
  0x4a   : > { %838 = vmatpush.bf16.msra.mxu0 %v2209_v19  ;;  %v3129_v19 = vld [vmem:[%s4786_s1 + $0x84] sm:$0xf]  ;;  %v2616_v41 = vld [vmem:[%s4786_s1 + $0x140] sm:$0xf]  ;;  %v2474_v55 = vld [vmem:[%s4786_s1 + $0x30] sm:$0xf0] }
  0x4b   : > { %851 = vmatpush.bf16.msra.mxu2 %v2337_v23  ;;  %801 = vmatpush.bf16.msrb.mxu1 %v2173_v26  ;;  %v2521_v23 = vor.u32 %v3131_v17, %v2520_v16  ;;  %v3127_v26 = vld [vmem:[%s4786_s1 + $0x6c] sm:$0xf0]  ;;  %v2525_v27 = vor.u32 %v3129_v19, %v2522_v20  ;;  %v2600_v52 = vld [vmem:[%s4786_s1 + $0x120] sm:$0xf]  ;;  %v3161_v56 = vld [vmem:[%s4786_s1 + $0x184] sm:$0xf] }
  0x4c   : > { %812 = vmatpush.bf16.msra.mxu3 %v2333_v15  ;;  %v2665_v15 = vor.u32 %v3167_v10, %v2664_v9  ;;  %v2505_v35 = vor.u32 %v3127_v26, %v2504_v25  ;;  %v2456_v60 = vld [vmem:[%s4786_s1] sm:$0xf]  ;;  %v3115_v62 = vld [vmem:[%s4786_s1 + $0xc] sm:$0xf0]  ;;  %v2458_v5 = vld [vmem:[%s4786_s1 + $0x10] sm:$0xf0] }
  0x4d   : > { %v174_v6 = vld [vmem:[%s3555_s4 + $0x10] sm:$0x7f]  ;;  %v3181_v10 = vld [vmem:[%s4786_s1 + $0x224] sm:$0xf]  ;;  %v2457_v11 = vor.u32 %v3115_v62, %v2456_v60  ;;  %v2736_v17 = vld [vmem:[%s4786_s1 + $0x228] sm:$0xf] }
  0x4e   : > { %839 = vmatpush.bf16.msra.mxu0 %v2193_v34  ;;  %802 = vmatmul.bf16.vlgmr.msrb.gmra.mxu1 %v3633_v4  ;;  %v2682_v34 = vld [vmem:[%s4786_s1 + $0x1d0] sm:$0xf0]  ;;  %v4042_v16 = vpack.c.bf16 %v174_v6, %v174_v6  ;;  %v3153_v20 = vld [vmem:[%s4786_s1 + $0x144] sm:$0xf]  ;;  %v173_v21 = vld [vmem:[%s3555_s4 + $0x8] sm:$0x7f] }
  0x4f   : > { %865 = vmatpush.bf16.msra.mxu1 %v2449_v33  ;;  %852 = vmatpush.bf16.msra.mxu2 %v2321_v38  ;;  %v3169_v33 = vld [vmem:[%s4786_s1 + $0x1c4] sm:$0xf]  ;;  %v3123_v38 = vld [vmem:[%s4786_s1 + $0x4c] sm:$0xf0]  ;;  %v2634_v9 = vld [vmem:[%s4786_s1 + $0x170] sm:$0xf0] }
  0x50   : > { %813 = vmatpush.bf16.msra.mxu3 %v2317_v29  ;;  %v2632_v29 = vld [vmem:[%s4786_s1 + $0x160] sm:$0xf]  ;;  %v2685_v40 = vor.u32 %v3169_v33, %v2682_v34  ;;  %v2489_v46 = vor.u32 %v3123_v38, %v2488_v37  ;;  %v2730_v12 = vld [vmem:[%s4786_s1 + $0x230] sm:$0xf0]  ;;  %v3177_v25 = vld [vmem:[%s4786_s1 + $0x204] sm:$0xf] }
  0x51   : > { %v2633_v36 = vor.u32 %v3159_v30, %v2632_v29  ;;  %v2733_v22 = vor.u32 %v3181_v10, %v2730_v12  ;;  %v2714_v26 = vld [vmem:[%s4786_s1 + $0x210] sm:$0xf0]  ;;  %v2560_v29 = vld [vmem:[%s4786_s1 + $0xc8] sm:$0xf]  ;;  %v3140_v30 = vld [vmem:[%s4786_s1 + $0xd4] sm:$0xf0] }
  0x52   : > { %840 = vmatpush.bf16.msra.mxu0 %v2177_v49  ;;  %v3119_v49 = vld [vmem:[%s4786_s1 + $0x2c] sm:$0xf0]  ;;  %v2720_v31 = vld [vmem:[%s4786_s1 + $0x208] sm:$0xf]  ;;  %v3180_v32 = vld [vmem:[%s4786_s1 + $0x214] sm:$0xf0] }
  0x53   : > { %866 = vmatpush.bf16.msra.mxu1 %v2433_v48  ;;  %853 = vmatpush.bf16.msra.mxu2 %v2305_v53  ;;  %v2472_v48 = vld [vmem:[%s4786_s1 + $0x20] sm:$0xf]  ;;  %v3151_v53 = vld [vmem:[%s4786_s1 + $0x12c] sm:$0xf0]  ;;  %v2704_v33 = vld [vmem:[%s4786_s1 + $0x1e8] sm:$0xf] }
  0x54   : > { %814 = vmatpush.bf16.msra.mxu3 %v2301_v45  ;;  %v2666_v45 = vld [vmem:[%s4786_s1 + $0x1b0] sm:$0xf0]  ;;  %v2473_v59 = vor.u32 %v3119_v49, %v2472_v48  ;;  %v2601_v61 = vor.u32 %v3151_v53, %v2600_v52  ;;  %v3176_v34 = vld [vmem:[%s4786_s1 + $0x1f4] sm:$0xf0]  ;;  %v3174_v37 = vld [vmem:[%s4786_s1 + $0x1ec] sm:$0xf] }
  0x55   : > { %841 = vmatmul.bf16.vlgmr.msra.gmra.mxu0 %v3633_v4  ;;  %v2648_v4 = vld [vmem:[%s4786_s1 + $0x180] sm:$0xf]  ;;  %v2669_v51 = vor.u32 %v3165_v44, %v2666_v45  ;;  %v2706_v38 = vld [vmem:[%s4786_s1 + $0x1f8] sm:$0xf0]  ;;  %v2544_v44 = vld [vmem:[%s4786_s1 + $0xa8] sm:$0xf] }
  0x56   : > { %1248 = vmatpush.bf16.msrb.mxu0 %v2697_v54  ;;  %854 = vmatmul.bf16.vlgmr.msra.gmra.mxu2 %v3644_v8  ;;  %v3117_v54 = vld [vmem:[%s4786_s1 + $0x24] sm:$0xf]  ;;  %v3136_v45 = vld [vmem:[%s4786_s1 + $0xb4] sm:$0xf0]  ;;  %v2578_v60 = vld [vmem:[%s4786_s1 + $0xf8] sm:$0xf0] }
  0x57   : > { %1274 = vmatpush.bf16.msrb.mxu2 %v2573_v57  ;;  %815 = vmatmul.bf16.vlgmr.msra.gmra.mxu3 %v3644_v8  ;;  %v3163_v8 = vld [vmem:[%s4786_s1 + $0x18c] sm:$0xf0]  ;;  %v2650_v57 = vld [vmem:[%s4786_s1 + $0x190] sm:$0xf0]  ;;  %v2477_v1 = vor.u32 %v3117_v54, %v2474_v55  ;;  %v3172_v48 = vld [vmem:[%s4786_s1 + $0x1d4] sm:$0xf0]  ;;  %v2545_v52 = vor.u32 %v3136_v45, %v2544_v44 }
  0x58   : > { %1235 = vmatpush.bf16.msrb.mxu3 %v2569_v50  ;;  %1267 = vmatpush.bf16.msrb.mxu1 %v2729_v63  ;;  %v2649_v24 = vor.u32 %v3163_v8, %v2648_v4  ;;  %v2493_v50 = vor.u32 %v3121_v42, %v2490_v43  ;;  %v2584_v63 = vld [vmem:[%s4786_s1 + $0x100] sm:$0xf]  ;;  %v2653_v2 = vor.u32 %v3161_v56, %v2650_v57  ;;  %v3145_v53 = vld [vmem:[%s4786_s1 + $0x104] sm:$0xf]  ;;  %v2586_v54 = vld [vmem:[%s4786_s1 + $0x110] sm:$0xf0] }
  0x59   : > { %v172_v4 = vld [vmem:[%s3555_s4] sm:$0x7f]  ;;  %v2721_v42 = vor.u32 %v3180_v32, %v2720_v31  ;;  %v2705_v43 = vor.u32 %v3176_v34, %v2704_v33  ;;  %v2528_v55 = vld [vmem:[%s4786_s1 + $0x88] sm:$0xf]  ;;  %v3132_v57 = vld [vmem:[%s4786_s1 + $0x94] sm:$0xf0] }
  0x5a   : > { %1249 = vmatpush.bf16.msrb.mxu0 %v2681_v3  ;;  %v3113_v3 = vld [vmem:[%s4786_s1 + $0x4] sm:$0xf]  ;;  %v2672_v62 = vld [vmem:[%s4786_s1 + $0x1a8] sm:$0xf]  ;;  %v3138_v10 = vld [vmem:[%s4786_s1 + $0xcc] sm:$0xf] }
  0x5b   : > { %1275 = vmatpush.bf16.msrb.mxu2 %v2557_v7  ;;  %v3157_v7 = vld [vmem:[%s4786_s1 + $0x164] sm:$0xf]  ;;  %v2461_v8 = vor.u32 %v3113_v3, %v2458_v5  ;;  %v2529_v3 = vor.u32 %v3132_v57, %v2528_v55  ;;  %v2512_v6 = vld [vmem:[%s4786_s1 + $0x68] sm:$0xf]  ;;  %v3120_v33 = vld [vmem:[%s4786_s1 + $0x34] sm:$0xf0] }
  0x5c   : > { %1236 = vmatpush.bf16.msrb.mxu3 %v2553_v0  ;;  %1268 = vmatpush.bf16.msrb.mxu1 %v2713_v13  ;;  %v3147_v0 = vld [vmem:[%s4786_s1 + $0x10c] sm:$0xf0]  ;;  %v2576_v13 = vld [vmem:[%s4786_s1 + $0xe8] sm:$0xf]  ;;  %v2637_v19 = vor.u32 %v3157_v7, %v2634_v9  ;;  %v3128_v9 = vld [vmem:[%s4786_s1 + $0x74] sm:$0xf0] }
  0x5d   : > { %v2480_v31 = vld [vmem:[%s4786_s1 + $0x28] sm:$0xf]  ;;  %v3130_v34 = vld [vmem:[%s4786_s1 + $0x8c] sm:$0xf]  ;;  %v3116_v44 = vld [vmem:[%s4786_s1 + $0x14] sm:$0xf0] }
  0x5e   : > { %1250 = vmatpush.bf16.msrb.mxu0 %v2665_v15  ;;  %2453 = vmatmul.msk.bf16.vlgmr.msra.gmra.mxu1 %vm712_vm0, %v3617_v58  ;;  %v3155_v58 = vld [vmem:[%s4786_s1 + $0x14c] sm:$0xf0]  ;;  %v2585_v15 = vor.u32 %v3147_v0, %v2584_v63  ;;  %v3168_v63 = vld [vmem:[%s4786_s1 + $0x1b4] sm:$0xf0]  ;;  %v2589_v0 = vor.u32 %v3145_v53, %v2586_v54  ;;  %v3150_v53 = vld [vmem:[%s4786_s1 + $0x12c] sm:$0xf] }
  0x5f   : > { %1276 = vmatpush.bf16.msrb.mxu2 %v2541_v18  ;;  %v2617_v47 = vor.u32 %v3155_v58, %v2616_v41  ;;  %v3184_v18 = vld [vmem:[%s4786_s1 + $0x234] sm:$0xf0]  ;;  %v3149_v41 = vld [vmem:[%s4786_s1 + $0x124] sm:$0xf]  ;;  %v2602_v58 = vld [vmem:[%s4786_s1 + $0x130] sm:$0xf0]  ;;  %v2673_v7 = vor.u32 %v3168_v63, %v2672_v62 }
  0x60   : > { %1237 = vmatpush.bf16.msrb.mxu3 %v2537_v14  ;;  %1287 = vmatpush.bf16.msra.mxu1 %v2701_v28  ;;  %v3144_v14 = vld [vmem:[%s4786_s1 + $0xf4] sm:$0xf0]  ;;  %v4064_v28 = vpack.c.bf16 %v172_v4, %v172_v4  ;;  %v2605_v49 = vor.u32 %v3149_v41, %v2602_v58  ;;  %v2626_v41 = vld [vmem:[%s4786_s1 + $0x158] sm:$0xf0]  ;;  %v2481_v58 = vor.u32 %v3120_v33, %v2480_v31  ;;  %v2592_v57 = vld [vmem:[%s4786_s1 + $0x108] sm:$0xf] }
  0x61   : > { %v2610_v54 = vld [vmem:[%s4786_s1 + $0x138] sm:$0xf0]  ;;  %v3122_v62 = vld [vmem:[%s4786_s1 + $0x4c] sm:$0xf]  ;;  %v3327_v33 = vld [vmem:[%s4786_s1 + $0x6ac] sm:$0xf0] }
  0x62   : > { %1251 = vmatpush.bf16.msrb.mxu0 %v2649_v24  ;;  %v2618_v24 = vld [vmem:[%s4786_s1 + $0x150] sm:$0xf0]  ;;  %v2498_v63 = vld [vmem:[%s4786_s1 + $0x58] sm:$0xf0]  ;;  %vm2025_vm1 = vcmask 522240  }
  0x63   : > { %1277 = vmatpush.bf16.msrb.mxu2 %v2525_v27  ;;  %v2737_v27 = vor.u32 %v3184_v18, %v2736_v17  ;;  %v2658_v17 = vld [vmem:[%s4786_s1 + $0x198] sm:$0xf0]  ;;  %v2513_v18 = vor.u32 %v3128_v9, %v2512_v6  ;;  %v2932_v6 = vld [vmem:[%s4786_s1 + $0x560] sm:$0xf] }
  0x64   : > { %1238 = vmatpush.bf16.msrb.mxu3 %v2521_v23  ;;  %1288 = vmatpush.bf16.msra.mxu1 %v2685_v40  ;;  %v2577_v23 = vor.u32 %v3144_v14, %v2576_v13  ;;  %v2561_v40 = vor.u32 %v3140_v30, %v2560_v29  ;;  %v2656_v13 = vld [vmem:[%s4786_s1 + $0x188] sm:$0xf]  ;;  %v3164_v14 = vld [vmem:[%s4786_s1 + $0x194] sm:$0xf0]  ;;  %v3060_v9 = vld [vmem:[%s4786_s1 + $0x660] sm:$0xf] }
  0x66   : > { %1252 = vmatpush.bf16.msrb.mxu0 %v2633_v36  ;;  %v2621_v36 = vor.u32 %v3153_v20, %v2618_v24  ;;  %v3124_v20 = vld [vmem:[%s4786_s1 + $0x54] sm:$0xf0]  ;;  %v2640_v24 = vld [vmem:[%s4786_s1 + $0x168] sm:$0xf] }
  0x67   : > { %1278 = vmatpush.bf16.msrb.mxu2 %v2509_v39  ;;  %v2717_v39 = vor.u32 %v3177_v25, %v2714_v26  ;;  %v3160_v25 = vld [vmem:[%s4786_s1 + $0x174] sm:$0xf0]  ;;  %v3158_v26 = vld [vmem:[%s4786_s1 + $0x16c] sm:$0xf] }
  0x68   : > { %1239 = vmatpush.bf16.msrb.mxu3 %v2505_v35  ;;  %1289 = vmatpush.bf16.msra.mxu1 %v2669_v51  ;;  %v4086_v35 = vpack.c.bf16 %v173_v21, %v173_v21  ;;  %v2690_v51 = vld [vmem:[%s4786_s1 + $0x1d8] sm:$0xf0]  ;;  %v3134_v21 = vld [vmem:[%s4786_s1 + $0xac] sm:$0xf]  ;;  %v2641_v32 = vor.u32 %v3160_v25, %v2640_v24  ;;  %v3315_v25 = vld [vmem:[%s4786_s1 + $0x64c] sm:$0xf0] }
  0x6a   : > { %1253 = vmatpush.bf16.msrb.mxu0 %v2617_v47  ;;  %v2688_v47 = vld [vmem:[%s4786_s1 + $0x1c8] sm:$0xf] }
  0x6b   : > { %1279 = vmatpush.bf16.msrb.mxu2 %v2493_v50  ;;  %v3170_v50 = vld [vmem:[%s4786_s1 + $0x1cc] sm:$0xf]  ;;  %v2689_v56 = vor.u32 %v3172_v48, %v2688_v47  ;;  %v2514_v48 = vld [vmem:[%s4786_s1 + $0x78] sm:$0xf0] }
  0x6c   : > { %1240 = vmatpush.bf16.msrb.mxu3 %v2489_v46  ;;  %1290 = vmatpush.bf16.msra.mxu1 %v2653_v2  ;;  %v2709_v46 = vor.u32 %v3174_v37, %v2706_v38  ;;  %v2674_v2 = vld [vmem:[%s4786_s1 + $0x1b8] sm:$0xf0]  ;;  %v2624_v38 = vld [vmem:[%s4786_s1 + $0x148] sm:$0xf]  ;;  %v3126_v47 = vld [vmem:[%s4786_s1 + $0x6c] sm:$0xf] }
  0x6e   : > { %1254 = vmatpush.bf16.msrb.mxu0 %v2601_v61  ;;  %2742 = vmatmul.msk.bf16.vlgmr.msrb.gmra.mxu1 %vm712_vm0, %v4042_v16  ;;  %v2693_v61 = vor.u32 %v3170_v50, %v2690_v51  ;;  %v3152_v50 = vld [vmem:[%s4786_s1 + $0x134] sm:$0xf0]  ;;  %v3182_v51 = vld [vmem:[%s4786_s1 + $0x22c] sm:$0xf] }
  0x6f   : > { %1280 = vmatpush.bf16.msrb.mxu2 %v2477_v1  ;;  %v3166_v1 = vld [vmem:[%s4786_s1 + $0x1ac] sm:$0xf] }
  0x70   : > { %1241 = vmatpush.bf16.msrb.mxu3 %v2473_v59  ;;  %1291 = vmatpush.bf16.msra.mxu1 %v2637_v19  ;;  %v3142_v59 = vld [vmem:[%s4786_s1 + $0xec] sm:$0xf]  ;;  %v2677_v12 = vor.u32 %v3166_v1, %v2674_v2  ;;  %v2657_v19 = vor.u32 %v3164_v14, %v2656_v13  ;;  %v2613_v1 = vor.u32 %v3150_v53, %v2610_v54  ;;  %v2594_v2 = vld [vmem:[%s4786_s1 + $0x118] sm:$0xf0]  ;;  %v2934_v13 = vld [vmem:[%s4786_s1 + $0x570] sm:$0xf0] }
  0x71   : > { %v2581_v5 = vor.u32 %v3142_v59, %v2578_v60  ;;  %v3148_v59 = vld [vmem:[%s4786_s1 + $0x114] sm:$0xf0]  ;;  %v3307_v53 = vld [vmem:[%s4786_s1 + $0x60c] sm:$0xf0]  ;;  %v3273_v54 = vld [vmem:[%s4786_s1 + $0x504] sm:$0xf] }
  0x72   : > { %1255 = vmatpush.bf16.msrb.mxu0 %v2585_v15  ;;  %v3162_v15 = vld [vmem:[%s4786_s1 + $0x18c] sm:$0xf]  ;;  %v2593_v14 = vor.u32 %v3148_v59, %v2592_v57 }
  0x73   : > { %1281 = vmatpush.bf16.msrb.mxu2 %v2461_v8  ;;  %v2496_v8 = vld [vmem:[%s4786_s1 + $0x48] sm:$0xf] }
  0x74   : > { %1242 = vmatpush.bf16.msrb.mxu3 %v2457_v11  ;;  %1292 = vmatpush.bf16.msra.mxu1 %v2621_v36  ;;  %v2562_v11 = vld [vmem:[%s4786_s1 + $0xd8] sm:$0xf0]  ;;  %v2497_v29 = vor.u32 %v3124_v20, %v2496_v8 }
  0x75   : > { %1256 = vmatmul.bf16.vlgmr.msrb.gmra.mxu0 %v4086_v35  ;;  %v2565_v4 = vor.u32 %v3138_v10, %v2562_v11  ;;  %v2530_v36 = vld [vmem:[%s4786_s1 + $0x98] sm:$0xf0]  ;;  %v2501_v10 = vor.u32 %v3122_v62, %v2498_v63  ;;  %v3319_v11 = vld [vmem:[%s4786_s1 + $0x66c] sm:$0xf0] }
  0x76   : > { %1313 = vmatpush.bf16.msra.mxu0 %v2577_v23  ;;  %1282 = vmatmul.bf16.vlgmr.msrb.gmra.mxu2 %v4064_v28  ;;  %v2661_v23 = vor.u32 %v3162_v15, %v2658_v17  ;;  %v3118_v17 = vld [vmem:[%s4786_s1 + $0x2c] sm:$0xf] }
  0x77   : > { %1345 = vmatpush.bf16.msra.mxu2 %v2737_v27  ;;  %1243 = vmatmul.bf16.vlgmr.msrb.gmra.mxu3 %v4064_v28  ;;  %v2642_v27 = vld [vmem:[%s4786_s1 + $0x178] sm:$0xf0] }
  0x78   : > { %1306 = vmatpush.bf16.msra.mxu3 %v2733_v22  ;;  %1293 = vmatpush.bf16.msra.mxu1 %v2605_v49  ;;  %v2546_v22 = vld [vmem:[%s4786_s1 + $0xb8] sm:$0xf0]  ;;  %v2645_v37 = vor.u32 %v3158_v26, %v2642_v27  ;;  %v3281_v26 = vld [vmem:[%s4786_s1 + $0x544] sm:$0xf]  ;;  %v2918_v27 = vld [vmem:[%s4786_s1 + $0x550] sm:$0xf0] }
  0x79   : > { %v2549_v30 = vor.u32 %v3134_v21, %v2546_v22  ;;  %v2916_v21 = vld [vmem:[%s4786_s1 + $0x540] sm:$0xf]  ;;  %v3283_v22 = vld [vmem:[%s4786_s1 + $0x54c] sm:$0xf0] }
  0x7a   : > { %1314 = vmatpush.bf16.msra.mxu0 %v2561_v40  ;;  %v3154_v40 = vld [vmem:[%s4786_s1 + $0x14c] sm:$0xf]  ;;  %v2917_v31 = vor.u32 %v3283_v22, %v2916_v21 }
  0x7b   : > { %1346 = vmatpush.bf16.msra.mxu2 %v2721_v42  ;;  %v2533_v42 = vor.u32 %v3130_v34, %v2530_v36  ;;  %v2629_v49 = vor.u32 %v3154_v40, %v2626_v41  ;;  %v2921_v36 = vor.u32 %v3281_v26, %v2918_v27  ;;  %v3311_v41 = vld [vmem:[%s4786_s1 + $0x62c] sm:$0xf0]  ;;  %v2964_v26 = vld [vmem:[%s4786_s1 + $0x5a0] sm:$0xf]  ;;  %v3305_v27 = vld [vmem:[%s4786_s1 + $0x604] sm:$0xf] }
  0x7c   : > { %1307 = vmatpush.bf16.msra.mxu3 %v2717_v39  ;;  %1294 = vmatpush.bf16.msra.mxu1 %v2589_v0  ;;  %v3156_v39 = vld [vmem:[%s4786_s1 + $0x154] sm:$0xf0]  ;;  %v3146_v0 = vld [vmem:[%s4786_s1 + $0x10c] sm:$0xf] }
  0x7d   : > { %v2625_v45 = vor.u32 %v3156_v39, %v2624_v38  ;;  %v3279_v38 = vld [vmem:[%s4786_s1 + $0x52c] sm:$0xf0]  ;;  %v3028_v39 = vld [vmem:[%s4786_s1 + $0x620] sm:$0xf] }
  0x7e   : > { %1315 = vmatpush.bf16.msra.mxu0 %v2545_v52  ;;  %v2738_v52 = vld [vmem:[%s4786_s1 + $0x238] sm:$0xf0] }
  0x7f   : > { %1365 = vmatpush.bf16.msrb.mxu2 %v2709_v46  ;;  %1295 = vmatmul.bf16.vlgmr.msra.gmra.mxu1 %v4086_v35  ;;  %v2608_v46 = vld [vmem:[%s4786_s1 + $0x128] sm:$0xf] }
  0x80   : > { %1326 = vmatpush.bf16.msrb.mxu3 %v2705_v43  ;;  %1352 = vmatpush.bf16.msrb.mxu1 %v2581_v5  ;;  %v2464_v43 = vld [vmem:[%s4786_s1 + $0x8] sm:$0xf]  ;;  %v2609_v60 = vor.u32 %v3152_v50, %v2608_v46  ;;  %v2722_v5 = vld [vmem:[%s4786_s1 + $0x218] sm:$0xf0]  ;;  %v3275_v46 = vld [vmem:[%s4786_s1 + $0x50c] sm:$0xf0] }
  0x81   : > { %v2465_v55 = vor.u32 %v3116_v44, %v2464_v43  ;;  %v2884_v44 = vld [vmem:[%s4786_s1 + $0x500] sm:$0xf] }
  0x82   : > { %1316 = vmatpush.bf16.msra.mxu0 %v2529_v3  ;;  %v3178_v3 = vld [vmem:[%s4786_s1 + $0x20c] sm:$0xf]  ;;  %v3012_v50 = vld [vmem:[%s4786_s1 + $0x600] sm:$0xf]  ;;  %v2885_v57 = vor.u32 %v3275_v46, %v2884_v44  ;;  %v3301_v46 = vld [vmem:[%s4786_s1 + $0x5e4] sm:$0xf] }
  0x83   : > { %1366 = vmatpush.bf16.msrb.mxu2 %v2693_v61  ;;  %v2741_v61 = vor.u32 %v3182_v51, %v2738_v52  ;;  %v2725_v15 = vor.u32 %v3178_v3, %v2722_v5  ;;  %v3317_v51 = vld [vmem:[%s4786_s1 + $0x664] sm:$0xf]  ;;  %v3062_v52 = vld [vmem:[%s4786_s1 + $0x670] sm:$0xf0]  ;;  %v3013_v62 = vor.u32 %v3307_v53, %v3012_v50  ;;  %v3303_v3 = vld [vmem:[%s4786_s1 + $0x5ec] sm:$0xf0] }
  0x84   : > { %1327 = vmatpush.bf16.msrb.mxu3 %v2689_v56  ;;  %1353 = vmatpush.bf16.msrb.mxu1 %v2565_v4  ;;  %v2517_v56 = vor.u32 %v3126_v47, %v2514_v48  ;;  %v2597_v4 = vor.u32 %v3146_v0, %v2594_v2  ;;  %v3076_v47 = vld [vmem:[%s4786_s1 + $0x680] sm:$0xf]  ;;  %v3323_v48 = vld [vmem:[%s4786_s1 + $0x68c] sm:$0xf0]  ;;  %v3065_v59 = vor.u32 %v3317_v51, %v3062_v52  ;;  %v3046_v2 = vld [vmem:[%s4786_s1 + $0x650] sm:$0xf0] }
  0x85   : > { %v2996_v0 = vld [vmem:[%s4786_s1 + $0x5e0] sm:$0xf]  ;;  %v3269_v5 = vld [vmem:[%s4786_s1 + $0x4e4] sm:$0xf]  ;;  %v3094_v50 = vld [vmem:[%s4786_s1 + $0x6b0] sm:$0xf0] }
  0x86   : > { %1317 = vmatpush.bf16.msra.mxu0 %v2513_v18  ;;  %2744 = vmatmul.msk.bf16.vlgmr.msra.gmra.mxu2 %vm712_vm0, %v4042_v16  ;;  %v2482_v18 = vld [vmem:[%s4786_s1 + $0x38] sm:$0xf0]  ;;  %v2940_v51 = vld [vmem:[%s4786_s1 + $0x568] sm:$0xf]  ;;  %v3288_v52 = vld [vmem:[%s4786_s1 + $0x574] sm:$0xf0] }
  0x87   : > { %1367 = vmatpush.bf16.msrb.mxu2 %v2677_v12  ;;  %2743 = vmatmul.msk.bf16.vlgmr.msra.gmra.mxu3 %vm712_vm0, %v4042_v16  ;;  %v3285_v12 = vld [vmem:[%s4786_s1 + $0x564] sm:$0xf]  ;;  %v2485_v24 = vor.u32 %v3118_v17, %v2482_v18  ;;  %v3030_v18 = vld [vmem:[%s4786_s1 + $0x630] sm:$0xf0] }
  0x88   : > { %1328 = vmatpush.bf16.msrb.mxu3 %v2673_v7  ;;  %1354 = vmatpush.bf16.msrb.mxu1 %v2549_v30  ;;  %v3287_v7 = vld [vmem:[%s4786_s1 + $0x56c] sm:$0xf0]  ;;  %v2937_v20 = vor.u32 %v3285_v12, %v2934_v13  ;;  %v2466_v30 = vld [vmem:[%s4786_s1 + $0x18] sm:$0xf0]  ;;  %v1396_v12 = vld [vmem:[%s3555_s4 + $0x28] sm:$0x1]  ;;  %v2997_v13 = vor.u32 %v3303_v3, %v2996_v0  ;;  %v2941_v3 = vor.u32 %v3288_v52, %v2940_v51 }
  0x89   : > { %v2933_v8 = vor.u32 %v3287_v7, %v2932_v6  ;;  %v2870_v6 = vld [vmem:[%s4786_s1 + $0x4f0] sm:$0xf0]  ;;  %v2852_v7 = vld [vmem:[%s4786_s1 + $0x4c0] sm:$0xf]  ;;  %v3309_v17 = vld [vmem:[%s4786_s1 + $0x624] sm:$0xf] }
  0x8a   : > { %1318 = vmatpush.bf16.msra.mxu0 %v2497_v29  ;;  %v3114_v29 = vld [vmem:[%s4786_s1 + $0xc] sm:$0xf]  ;;  %v3033_v22 = vor.u32 %v3309_v17, %v3030_v18  ;;  %v3078_v0 = vld [vmem:[%s4786_s1 + $0x690] sm:$0xf0]  ;;  %v3070_v18 = vld [vmem:[%s4786_s1 + $0x678] sm:$0xf0] }
  0x8b   : > { %1368 = vmatpush.bf16.msrb.mxu2 %v2661_v23  ;;  %v3044_v23 = vld [vmem:[%s4786_s1 + $0x640] sm:$0xf]  ;;  %v2469_v40 = vor.u32 %v3114_v29, %v2466_v30  ;;  %v3014_v29 = vld [vmem:[%s4786_s1 + $0x610] sm:$0xf0]  ;;  %v3295_v30 = vld [vmem:[%s4786_s1 + $0x5ac] sm:$0xf0] }
  0x8c   : > { %1329 = vmatpush.bf16.msrb.mxu3 %v2657_v19  ;;  %1355 = vmatpush.bf16.msrb.mxu1 %v2533_v42  ;;  %v3061_v19 = vor.u32 %v3319_v11, %v3060_v9  ;;  %v3045_v34 = vor.u32 %v3315_v25, %v3044_v23  ;;  %v2902_v42 = vld [vmem:[%s4786_s1 + $0x530] sm:$0xf0]  ;;  %v3263_v23 = vld [vmem:[%s4786_s1 + $0x4ac] sm:$0xf0]  ;;  %v3318_v17 = vld [vmem:[%s4786_s1 + $0x66c] sm:$0xf] }
  0x8d   : > { %v1393_v11 = vld [vmem:[%s3555_s4 + $0x10] sm:$0xfc]  ;;  %v3310_v51 = vld [vmem:[%s4786_s1 + $0x62c] sm:$0xf]  ;;  %v3038_v52 = vld [vmem:[%s4786_s1 + $0x638] sm:$0xf0] }
  0x8e   : > { %1319 = vmatpush.bf16.msra.mxu0 %v2481_v58  ;;  %v3277_v58 = vld [vmem:[%s4786_s1 + $0x524] sm:$0xf] }
  0x8f   : > { %1369 = vmatpush.bf16.msrb.mxu2 %v2645_v37  ;;  %v2900_v37 = vld [vmem:[%s4786_s1 + $0x520] sm:$0xf] }
  0x90   : > { %1330 = vmatpush.bf16.msrb.mxu3 %v2641_v32  ;;  %1356 = vmatpush.bf16.msrb.mxu1 %v2517_v56  ;;  %v3092_v32 = vld [vmem:[%s4786_s1 + $0x6a0] sm:$0xf]  ;;  %v3077_v56 = vor.u32 %v3323_v48, %v3076_v47  ;;  %v2998_v47 = vld [vmem:[%s4786_s1 + $0x5f0] sm:$0xf0]  ;;  %v3325_v48 = vld [vmem:[%s4786_s1 + $0x6a4] sm:$0xf] }
  0x91   : > { %v3093_v43 = vor.u32 %v3327_v33, %v3092_v32  ;;  %v2838_v32 = vld [vmem:[%s4786_s1 + $0x4b0] sm:$0xf0]  ;;  %v2820_v33 = vld [vmem:[%s4786_s1 + $0x480] sm:$0xf] }
  0x92   : > { %1320 = vmatpush.bf16.msra.mxu0 %v2465_v55  ;;  %v2886_v55 = vld [vmem:[%s4786_s1 + $0x510] sm:$0xf0] }
  0x93   : > { %1370 = vmatpush.bf16.msrb.mxu2 %v2629_v49  ;;  %v2905_v49 = vor.u32 %v3277_v58, %v2902_v42  ;;  %v2889_v63 = vor.u32 %v3273_v54, %v2886_v55  ;;  %v1391_v58 = vld [vmem:[%s3555_s4] sm:$0xfc]  ;;  %v1394_v42 = vld [vmem:[%s3555_s4 + $0x18] sm:$0x1]  ;;  %v3001_v55 = vor.u32 %v3301_v46, %v2998_v47 }
  0x94   : > { %1331 = vmatpush.bf16.msrb.mxu3 %v2625_v45  ;;  %1357 = vmatpush.bf16.msrb.mxu1 %v2501_v10  ;;  %v2901_v45 = vor.u32 %v3279_v38, %v2900_v37  ;;  %v3267_v10 = vld [vmem:[%s4786_s1 + $0x4cc] sm:$0xf0]  ;;  %v3017_v38 = vor.u32 %v3305_v27, %v3014_v29  ;;  %v1397_v53 = vpack.c.bf16 %v1394_v42, %v1391_v58  ;;  %v2942_v58 = vld [vmem:[%s4786_s1 + $0x578] sm:$0xf0] }
  0x95   : > { %1321 = vmatmul.bf16.vlgmr.msra.gmra.mxu0 %v4064_v28  ;;  %v2853_v21 = vor.u32 %v3267_v10, %v2852_v7  ;;  %v3084_v7 = vld [vmem:[%s4786_s1 + $0x688] sm:$0xf]  ;;  %v3073_v29 = vor.u32 %v3318_v17, %v3070_v18  ;;  %v3302_v18 = vld [vmem:[%s4786_s1 + $0x5ec] sm:$0xf] }
  0x96   : > { %1384 = vmatpush.bf16.msrb.mxu0 %v2741_v61  ;;  %v3271_v61 = vld [vmem:[%s4786_s1 + $0x4ec] sm:$0xf0]  ;;  %v4535_v10 = vrot.slane %v1397_v53, 1 }
  0x97   : > { %1371 = vmatpush.bf16.msrb.mxu2 %v2613_v1  ;;  %v3313_v1 = vld [vmem:[%s4786_s1 + $0x644] sm:$0xf] }
  0x98   : > { %1332 = vmatpush.bf16.msrb.mxu3 %v2609_v60  ;;  %1358 = vmatpush.bf16.msrb.mxu1 %v2485_v24  ;;  %v2868_v60 = vld [vmem:[%s4786_s1 + $0x4e0] sm:$0xf]  ;;  %v3049_v9 = vor.u32 %v3313_v1, %v3046_v2  ;;  %v3097_v2 = vor.u32 %v3325_v48, %v3094_v50  ;;  %v3036_v48 = vld [vmem:[%s4786_s1 + $0x628] sm:$0xf] }
  0x9a   : > { %1385 = vmatpush.bf16.msrb.mxu0 %v2725_v15  ;;  %v2980_v15 = vld [vmem:[%s4786_s1 + $0x5c0] sm:$0xf] }
  0x9b   : > { %1372 = vmatpush.bf16.msrb.mxu2 %v2597_v4  ;;  %v3299_v4 = vld [vmem:[%s4786_s1 + $0x5cc] sm:$0xf0] }
  0x9c   : > { %1333 = vmatpush.bf16.msrb.mxu3 %v2593_v14  ;;  %1359 = vmatpush.bf16.msrb.mxu1 %v2469_v40  ;;  %v2873_v14 = vor.u32 %v3269_v5, %v2870_v6  ;;  %v2981_v24 = vor.u32 %v3299_v4, %v2980_v15  ;;  %v3291_v40 = vld [vmem:[%s4786_s1 + $0x58c] sm:$0xf0]  ;;  %v2924_v5 = vld [vmem:[%s4786_s1 + $0x548] sm:$0xf]  ;;  %v3284_v6 = vld [vmem:[%s4786_s1 + $0x554] sm:$0xf0] }
  0x9d   : > { %v3320_v15 = vld [vmem:[%s4786_s1 + $0x674] sm:$0xf0] }
  0x9e   : > { %1857 = vmatpush.bf16.msra.mxu0 %v3061_v19  ;;  %1373 = vmatmul.bf16.vlgmr.msrb.gmra.mxu2 %v4086_v35  ;;  %v2854_v19 = vld [vmem:[%s4786_s1 + $0x4d0] sm:$0xf0] }
  0x9f   : > { %1883 = vmatpush.bf16.msra.mxu2 %v2937_v20  ;;  %1334 = vmatmul.bf16.vlgmr.msrb.gmra.mxu3 %v4086_v35  ;;  %v3029_v35 = vor.u32 %v3311_v41, %v3028_v39  ;;  %v1399_v20 = vpack.c.bf16 %v1396_v12, %v1393_v11  ;;  %v2948_v39 = vld [vmem:[%s4786_s1 + $0x580] sm:$0xf]  ;;  %v3257_v41 = vld [vmem:[%s4786_s1 + $0x484] sm:$0xf]  ;;  %v3324_v11 = vld [vmem:[%s4786_s1 + $0x694] sm:$0xf0] }
  0xa0   : > { %1844 = vmatpush.bf16.msra.mxu3 %v2933_v8  ;;  %1876 = vmatpush.bf16.msra.mxu1 %v3093_v43  ;;  %v3265_v8 = vld [vmem:[%s4786_s1 + $0x4c4] sm:$0xf]  ;;  %v2965_v43 = vor.u32 %v3295_v30, %v2964_v26  ;;  %v3068_v12 = vld [vmem:[%s4786_s1 + $0x668] sm:$0xf]  ;;  %v3280_v26 = vld [vmem:[%s4786_s1 + $0x534] sm:$0xf0] }
  0xa1   : > { %1360 = vmatmul.bf16.vlgmr.msrb.gmra.mxu1 %v4064_v28  ;;  %v2869_v28 = vor.u32 %v3271_v61, %v2868_v60  ;;  %v2857_v25 = vor.u32 %v3265_v8, %v2854_v19  ;;  %v2949_v60 = vor.u32 %v3291_v40, %v2948_v39  ;;  %v3293_v19 = vld [vmem:[%s4786_s1 + $0x5a4] sm:$0xf] }
  0xa2   : > { %1858 = vmatpush.bf16.msra.mxu0 %v3045_v34  ;;  %v3259_v34 = vld [vmem:[%s4786_s1 + $0x48c] sm:$0xf0] }
  0xa3   : > { %1884 = vmatpush.bf16.msra.mxu2 %v2921_v36  ;;  %v4470_v36 = vrot.slane %v1399_v20, 1  ;;  %v2821_v54 = vor.u32 %v3259_v34, %v2820_v33  ;;  %v2966_v20 = vld [vmem:[%s4786_s1 + $0x5b0] sm:$0xf0]  ;;  %v3314_v33 = vld [vmem:[%s4786_s1 + $0x64c] sm:$0xf] }
  0xa4   : > { %1845 = vmatpush.bf16.msra.mxu3 %v2917_v31  ;;  %1877 = vmatpush.bf16.msra.mxu1 %v3077_v56  ;;  %v3261_v31 = vld [vmem:[%s4786_s1 + $0x4a4] sm:$0xf]  ;;  %v3100_v56 = vld [vmem:[%s4786_s1 + $0x6a8] sm:$0xf]  ;;  %v2969_v30 = vor.u32 %v3293_v19, %v2966_v20  ;;  %v3054_v34 = vld [vmem:[%s4786_s1 + $0x658] sm:$0xf0] }
  0xa5   : > { %2745 = vmatmul.msk.bf16.vlgmr.msrb.gmra.mxu0 %vm712_vm0, %v4042_v16  ;;  %v2836_v16 = vld [vmem:[%s4786_s1 + $0x4a0] sm:$0xf]  ;;  %v2841_v44 = vor.u32 %v3261_v31, %v2838_v32  ;;  %v3052_v31 = vld [vmem:[%s4786_s1 + $0x648] sm:$0xf]  ;;  %v3316_v32 = vld [vmem:[%s4786_s1 + $0x654] sm:$0xf0]  ;;  %v3057_v46 = vor.u32 %v3314_v33, %v3054_v34 }
  0xa6   : > { %1859 = vmatpush.bf16.msra.mxu0 %v3029_v35  ;;  %v2837_v37 = vor.u32 %v3263_v23, %v2836_v16  ;;  %v1392_v35 = vld [vmem:[%s3555_s4 + $0x8] sm:$0xfc]  ;;  %v2925_v16 = vor.u32 %v3284_v6, %v2924_v5  ;;  %v3085_v23 = vor.u32 %v3324_v11, %v3084_v7  ;;  %v2910_v7 = vld [vmem:[%s4786_s1 + $0x538] sm:$0xf0] }
  0xa7   : > { %1885 = vmatpush.bf16.msra.mxu2 %v2905_v49  ;;  %v1395_v49 = vld [vmem:[%s3555_s4 + $0x20] sm:$0x1]  ;;  %v3278_v6 = vld [vmem:[%s4786_s1 + $0x52c] sm:$0xf]  ;;  %v2860_v11 = vld [vmem:[%s4786_s1 + $0x4c8] sm:$0xf] }
  0xa8   : > { %1846 = vmatpush.bf16.msra.mxu3 %v2901_v45  ;;  %1896 = vmatpush.bf16.msrb.mxu1 %v3065_v59  ;;  %v2822_v45 = vld [vmem:[%s4786_s1 + $0x490] sm:$0xf0]  ;;  %v3297_v59 = vld [vmem:[%s4786_s1 + $0x5c4] sm:$0xf]  ;;  %v1398_v1 = vpack.c.bf16 %v1395_v49, %v1392_v35  ;;  %v3312_v35 = vld [vmem:[%s4786_s1 + $0x634] sm:$0xf0]  ;;  %v2913_v17 = vor.u32 %v3278_v6, %v2910_v7 }
  0xa9   : > { %v2825_v61 = vor.u32 %v3257_v41, %v2822_v45  ;;  %v3286_v41 = vld [vmem:[%s4786_s1 + $0x56c] sm:$0xf]  ;;  %v3276_v45 = vld [vmem:[%s4786_s1 + $0x514] sm:$0xf0]  ;;  %v2990_v34 = vld [vmem:[%s4786_s1 + $0x5d8] sm:$0xf0] }
  0xaa   : > { %1860 = vmatpush.bf16.msra.mxu0 %v3013_v62  ;;  %v2982_v62 = vld [vmem:[%s4786_s1 + $0x5d0] sm:$0xf0]  ;;  %v4552_v8 = vrot.slane %v1398_v1, 1  ;;  %v2945_v50 = vor.u32 %v3286_v41, %v2942_v58  ;;  %v3306_v1 = vld [vmem:[%s4786_s1 + $0x60c] sm:$0xf] }
  0xab   : > { %1886 = vmatpush.bf16.msra.mxu2 %v2889_v63  ;;  %v3321_v63 = vld [vmem:[%s4786_s1 + $0x684] sm:$0xf]  ;;  %v3298_v33 = vld [vmem:[%s4786_s1 + $0x5cc] sm:$0xf]  ;;  %v2828_v58 = vld [vmem:[%s4786_s1 + $0x488] sm:$0xf] }
  0xac   : > { %1847 = vmatpush.bf16.msra.mxu3 %v2885_v57  ;;  %1897 = vmatpush.bf16.msrb.mxu1 %v3049_v9  ;;  %v3328_v57 = vld [vmem:[%s4786_s1 + $0x6b4] sm:$0xf0]  ;;  %v725_v9 = vpop.f32.mrf.mxu0  ;;  %v2846_v6 = vld [vmem:[%s4786_s1 + $0x4b8] sm:$0xf0] }
  0xae   : > { %1861 = vmatpush.bf16.msra.mxu0 %v2997_v13  ;;  %v738_v13 = vpop.f32.mrf.mxu1 }
  0xaf   : > { %1887 = vmatpush.bf16.msra.mxu2 %v2873_v14  ;;  %v2985_v14 = vor.u32 %v3297_v59, %v2982_v62  ;;  %v739_v4 = vadd.f32 %v738_v13, %v725_v9  ;;  %v2876_v59 = vld [vmem:[%s4786_s1 + $0x4e8] sm:$0xf] }
  0xb0   : > { %1848 = vmatpush.bf16.msra.mxu3 %v2869_v28  ;;  %1898 = vmatpush.bf16.msrb.mxu1 %v3033_v22  ;;  %v3101_v28 = vor.u32 %v3328_v57, %v3100_v56  ;;  %v3081_v22 = vor.u32 %v3321_v63, %v3078_v0  ;;  %v2926_v56 = vld [vmem:[%s4786_s1 + $0x558] sm:$0xf0]  ;;  %v3037_v57 = vor.u32 %v3312_v35, %v3036_v48  ;;  %v3020_v62 = vld [vmem:[%s4786_s1 + $0x608] sm:$0xf]  ;;  %v3308_v63 = vld [vmem:[%s4786_s1 + $0x614] sm:$0xf0] }
  0xb1   : > { %3106 = vmatmul.msk.bf16.vlgmr.msra.gmra.mxu1 %vm712_vm0, %v4470_v36  ;;  %v777_v39 = vpop.f32.mrf.mxu2  ;;  %v3021_v9 = vor.u32 %v3308_v63, %v3020_v62  ;;  %v3102_v48 = vld [vmem:[%s4786_s1 + $0x6b8] sm:$0xf0] }
  0xb2   : > { %1862 = vmatpush.bf16.msra.mxu0 %v2981_v24  ;;  %v3069_v24 = vor.u32 %v3320_v15, %v3068_v12  ;;  %v3268_v12 = vld [vmem:[%s4786_s1 + $0x4d4] sm:$0xf0]  ;;  %v3086_v62 = vld [vmem:[%s4786_s1 + $0x698] sm:$0xf0] }
  0xb3   : > { %1888 = vmatpush.bf16.msra.mxu2 %v2857_v25  ;;  %v2908_v25 = vld [vmem:[%s4786_s1 + $0x528] sm:$0xf]  ;;  %v3304_v15 = vld [vmem:[%s4786_s1 + $0x5f4] sm:$0xf0]  ;;  %v2861_v20 = vor.u32 %v3268_v12, %v2860_v11  ;;  %v3258_v12 = vld [vmem:[%s4786_s1 + $0x48c] sm:$0xf] }
  0xb4   : > { %1849 = vmatpush.bf16.msra.mxu3 %v2853_v21  ;;  %1899 = vmatpush.bf16.msrb.mxu1 %v3017_v38  ;;  %v751_v21 = vpop.f32.mrf.mxu3  ;;  %v2950_v38 = vld [vmem:[%s4786_s1 + $0x590] sm:$0xf0]  ;;  %v2909_v40 = vor.u32 %v3280_v26, %v2908_v25  ;;  %v727_v42 = vpop.f32.mrf.mxu0  ;;  %v3264_v25 = vld [vmem:[%s4786_s1 + $0x4b4] sm:$0xf0] }
  0xb5   : > { %v4567_v27 = vadd.f32 %v751_v21, %v739_v4  ;;  %v3006_v4 = vld [vmem:[%s4786_s1 + $0x5f8] sm:$0xf0]  ;;  %v3274_v21 = vld [vmem:[%s4786_s1 + $0x50c] sm:$0xf]  ;;  %v3260_v42 = vld [vmem:[%s4786_s1 + $0x494] sm:$0xf0] }
  0xb6   : > { %1863 = vmatpush.bf16.msra.mxu0 %v2965_v43  ;;  %v3053_v43 = vor.u32 %v3316_v32, %v3052_v31  ;;  %v740_v49 = vpop.f32.mrf.mxu1  ;;  %v3009_v26 = vor.u32 %v3302_v18, %v3006_v4 }
  0xb7   : > { %1889 = vmatpush.bf16.msra.mxu2 %v2841_v44  ;;  %v2892_v44 = vld [vmem:[%s4786_s1 + $0x508] sm:$0xf]  ;;  %v3294_v49 = vld [vmem:[%s4786_s1 + $0x5ac] sm:$0xf] }
  0xb8   : > { %1850 = vmatpush.bf16.msra.mxu3 %v2837_v37  ;;  %1900 = vmatpush.bf16.msrb.mxu1 %v3001_v55  ;;  %v3289_v37 = vld [vmem:[%s4786_s1 + $0x584] sm:$0xf]  ;;  %v3282_v55 = vld [vmem:[%s4786_s1 + $0x54c] sm:$0xf] }
  0xb9   : > { %v2953_v47 = vor.u32 %v3289_v37, %v2950_v38  ;;  %v2929_v0 = vor.u32 %v3282_v55, %v2926_v56 }
  0xba   : > { %1864 = vmatpush.bf16.msra.mxu0 %v2949_v60  ;;  %v3272_v60 = vld [vmem:[%s4786_s1 + $0x4f4] sm:$0xf0] }
  0xbb   : > { %1890 = vmatpush.bf16.msra.mxu2 %v2825_v61  ;;  %v3041_v61 = vor.u32 %v3310_v51, %v3038_v52  ;;  %v2877_v5 = vor.u32 %v3272_v60, %v2876_v59  ;;  %v2829_v51 = vor.u32 %v3260_v42, %v2828_v58  ;;  %v3292_v60 = vld [vmem:[%s4786_s1 + $0x594] sm:$0xf0] }
  0xbc   : > { %1851 = vmatpush.bf16.msra.mxu3 %v2821_v54  ;;  %1901 = vmatpush.bf16.msrb.mxu1 %v2985_v14  ;;  %v753_v53 = vpop.f32.mrf.mxu3  ;;  %v2893_v54 = vor.u32 %v3276_v45, %v2892_v44  ;;  %v3004_v14 = vld [vmem:[%s4786_s1 + $0x5e8] sm:$0xf]  ;;  %v2993_v45 = vor.u32 %v3298_v33, %v2990_v34 }
  0xbd   : > { %1865 = vmatmul.bf16.vlgmr.msra.gmra.mxu0 %v4552_v8  ;;  %v3266_v53 = vld [vmem:[%s4786_s1 + $0x4cc] sm:$0xf] }
  0xbe   : > { %1922 = vmatpush.bf16.msrb.mxu0 %v2941_v3  ;;  %1891 = vmatmul.bf16.vlgmr.msra.gmra.mxu2 %v4535_v10  ;;  %v779_v3 = vpop.f32.mrf.mxu2 }
  0xbf   : > { %1954 = vmatpush.bf16.msrb.mxu2 %v3101_v28  ;;  %1852 = vmatmul.bf16.vlgmr.msra.gmra.mxu3 %v4535_v10  ;;  %v790_v28 = vpop.f32.mrf.mxu0 }
  0xc0   : > { %1915 = vmatpush.bf16.msrb.mxu3 %v3097_v2  ;;  %1902 = vmatpush.bf16.msrb.mxu1 %v2969_v30  ;;  %v3022_v2 = vld [vmem:[%s4786_s1 + $0x618] sm:$0xf0]  ;;  %v3300_v30 = vld [vmem:[%s4786_s1 + $0x5d4] sm:$0xf0] }
  0xc1   : > { %v3025_v13 = vor.u32 %v3306_v1, %v3022_v2  ;;  %v3290_v1 = vld [vmem:[%s4786_s1 + $0x58c] sm:$0xf]  ;;  %v2958_v2 = vld [vmem:[%s4786_s1 + $0x598] sm:$0xf0] }
  0xc2   : > { %1923 = vmatpush.bf16.msrb.mxu0 %v2925_v16 }
  0xc3   : > { %1955 = vmatpush.bf16.msrb.mxu2 %v3085_v23  ;;  %v3005_v23 = vor.u32 %v3304_v15, %v3004_v14 }
  0xc4   : > { %1916 = vmatpush.bf16.msrb.mxu3 %v3081_v22  ;;  %1903 = vmatpush.bf16.msrb.mxu1 %v2953_v47  ;;  %v764_v19 = vpop.f32.mrf.mxu3  ;;  %v2894_v22 = vld [vmem:[%s4786_s1 + $0x518] sm:$0xf0]  ;;  %v3326_v47 = vld [vmem:[%s4786_s1 + $0x6ac] sm:$0xf] }
  0xc5   : > { %v778_v16 = vadd.f32 %v777_v39, %v764_v19  ;;  %v2897_v32 = vor.u32 %v3274_v21, %v2894_v22  ;;  %v3270_v39 = vld [vmem:[%s4786_s1 + $0x4ec] sm:$0xf]  ;;  %v3105_v56 = vor.u32 %v3326_v47, %v3102_v48 }
  0xc6   : > { %1924 = vmatpush.bf16.msrb.mxu0 %v2909_v40  ;;  %v4692_v38 = vpop.f32.mrf.mxu2  ;;  %v2878_v40 = vld [vmem:[%s4786_s1 + $0x4f8] sm:$0xf0] }
  0xc7   : > { %1974 = vmatpush.bf16.msra.mxu2 %v3073_v29  ;;  %1904 = vmatmul.bf16.vlgmr.msrb.gmra.mxu1 %v4552_v8  ;;  %v2988_v29 = vld [vmem:[%s4786_s1 + $0x5c8] sm:$0xf]  ;;  %v4682_v31 = vadd.f32 %v790_v28, %v778_v16  ;;  %v792_v44 = vpop.f32.mrf.mxu0  ;;  %v2881_v35 = vor.u32 %v3270_v39, %v2878_v40 }
  0xc8   : > { %1935 = vmatpush.bf16.msra.mxu3 %v3069_v24  ;;  %1961 = vmatpush.bf16.msra.mxu1 %v2945_v50  ;;  %v2844_v24 = vld [vmem:[%s4786_s1 + $0x4a8] sm:$0xf]  ;;  %v2989_v41 = vor.u32 %v3300_v30, %v2988_v29  ;;  %v2974_v50 = vld [vmem:[%s4786_s1 + $0x5b8] sm:$0xf0] }
  0xc9   : > { %v2845_v37 = vor.u32 %v3264_v25, %v2844_v24  ;;  %v2977_v59 = vor.u32 %v3294_v49, %v2974_v50 }
  0xca   : > { %1925 = vmatpush.bf16.msrb.mxu0 %v2893_v54  ;;  %v2862_v54 = vld [vmem:[%s4786_s1 + $0x4d8] sm:$0xf0] }
  0xcb   : > { %1975 = vmatpush.bf16.msra.mxu2 %v3057_v46  ;;  %v3296_v46 = vld [vmem:[%s4786_s1 + $0x5b4] sm:$0xf0]  ;;  %v803_v63 = vpop.f32.mrf.mxu1 }
  0xcc   : > { %1936 = vmatpush.bf16.msra.mxu3 %v3053_v43  ;;  %1962 = vmatpush.bf16.msra.mxu1 %v2929_v0  ;;  %v2972_v43 = vld [vmem:[%s4786_s1 + $0x5a8] sm:$0xf]  ;;  %v766_v52 = vpop.f32.mrf.mxu3  ;;  %v2865_v0 = vor.u32 %v3266_v53, %v2862_v54 }
  0xcd   : > { %v2973_v55 = vor.u32 %v3296_v46, %v2972_v43 }
  0xce   : > { %1926 = vmatpush.bf16.msrb.mxu0 %v2877_v5  ;;  %3108 = vmatmul.msk.bf16.vlgmr.msrb.gmra.mxu2 %vm712_vm0, %v4470_v36  ;;  %v831_v3 = vpop.f32.mrf.mxu2  ;;  %v3262_v5 = vld [vmem:[%s4786_s1 + $0x4ac] sm:$0xf] }
  0xcf   : > { %1976 = vmatpush.bf16.msra.mxu2 %v3041_v61  ;;  %3107 = vmatmul.msk.bf16.vlgmr.msrb.gmra.mxu3 %vm712_vm0, %v4470_v36  ;;  %v3322_v61 = vld [vmem:[%s4786_s1 + $0x68c] sm:$0xf]  ;;  %v2849_v11 = vor.u32 %v3262_v5, %v2846_v6 }
  0xd0   : > { %1937 = vmatpush.bf16.msra.mxu3 %v3037_v57  ;;  %1963 = vmatpush.bf16.msra.mxu1 %v2913_v17  ;;  %v2956_v57 = vld [vmem:[%s4786_s1 + $0x588] sm:$0xf]  ;;  %v3089_v28 = vor.u32 %v3322_v61, %v3086_v62 }
  0xd1   : > { %v2957_v7 = vor.u32 %v3292_v60, %v2956_v57 }
  0xd2   : > { %1927 = vmatpush.bf16.msrb.mxu0 %v2861_v20  ;;  %v842_v14 = vpop.f32.mrf.mxu0 }
  0xd3   : > { %1977 = vmatpush.bf16.msra.mxu2 %v3025_v13  ;;  %v2830_v13 = vld [vmem:[%s4786_s1 + $0x498] sm:$0xf0]  ;;  %v805_v15 = vpop.f32.mrf.mxu1 }
  0xd4   : > { %1938 = vmatpush.bf16.msra.mxu3 %v3021_v9  ;;  %1964 = vmatpush.bf16.msra.mxu1 %v2897_v32  ;;  %v2961_v9 = vor.u32 %v3290_v1, %v2958_v2  ;;  %v2833_v17 = vor.u32 %v3258_v12, %v2830_v13  ;;  %v2004_v1 = vld [vmem:[%s4787_s2] sm:$0xf] }
  0xd5   : > { %v2006_v6 = vperm.slane %v2004_v1, 0 }
  0xd6   : > { %1928 = vmatpush.bf16.msrb.mxu0 %v2845_v37 }
  0xd7   : > { %1978 = vmatpush.bf16.msra.mxu2 %v3009_v26 }
  0xd8   : > { %1939 = vmatpush.bf16.msra.mxu3 %v3005_v23  ;;  %1965 = vmatpush.bf16.msra.mxu1 %v2881_v35 }
  0xd9   : > { %v855_v19 = vpop.f32.mrf.mxu2 }
  0xda   : > { %1929 = vmatpush.bf16.msrb.mxu0 %v2829_v51  ;;  %v816_v18 = vpop.f32.mrf.mxu3  ;;  %v856_v20 = vadd.f32 %v855_v19, %v842_v14  ;;  %v844_v21 = vpop.f32.mrf.mxu0  ;;  %v2007_v19 = vperm.slane %v2004_v1, 1 }
  0xdb   : > { %1979 = vmatpush.bf16.msra.mxu2 %v2993_v45  ;;  %v817_v4 = vadd.f32 %v816_v18, %v803_v63  ;;  %v868_v16 = vpop.f32.mrf.mxu1 }
  0xdc   : > { %1940 = vmatpush.bf16.msra.mxu3 %v2989_v41  ;;  %1966 = vmatpush.bf16.msra.mxu1 %v2865_v0  ;;  %v869_v23 = vadd.f32 %v868_v16, %v856_v20 }
  0xdd   : > { %1930 = vmatmul.bf16.vlgmr.msrb.gmra.mxu0 %v4535_v10  ;;  %v830_v22 = vadd.f32 %v4692_v38, %v817_v4 }
  0xde   : > { %1993 = vmatpush.bf16.msra.mxu0 %v3105_v56 }
  0xdf   : > { %1980 = vmatpush.bf16.msra.mxu2 %v2977_v59 }
  0xe0   : > { %1941 = vmatpush.bf16.msra.mxu3 %v2973_v55  ;;  %1967 = vmatpush.bf16.msra.mxu1 %v2849_v11 }
  0xe1   : > { %v857_v25 = vpop.f32.mrf.mxu2 }
  0xe2   : > { %1994 = vmatpush.bf16.msra.mxu0 %v3089_v28  ;;  %v818_v24 = vpop.f32.mrf.mxu3 }
  0xe3   : > { %1981 = vmatpush.bf16.msra.mxu2 %v2961_v9  ;;  %v870_v26 = vpop.f32.mrf.mxu1 }
  0xe4   : > { %1942 = vmatpush.bf16.msra.mxu3 %v2957_v7  ;;  %1968 = vmatpush.bf16.msra.mxu1 %v2833_v17 }
  0xe6   : > { %1982 = vmatmul.bf16.vlgmr.msra.gmra.mxu2 %v4552_v8 }
  0xe7   : > { %1943 = vmatmul.bf16.vlgmr.msra.gmra.mxu3 %v4552_v8  ;;  %1969 = vmatmul.bf16.vlgmr.msra.gmra.mxu1 %v4535_v10 }
  0xeb   : > { %v1270_v29 = vpop.f32.mrf.mxu1 }
  0xed   : > { %3109 = vmatmul.msk.bf16.vlgmr.msra.gmra.mxu0 %vm712_vm0, %v4470_v36 }
  0xf2   : > { %v1257_v8 = vpop.f32.mrf.mxu0 }
  0xf3   : > { %v1272_v30 = vpop.f32.mrf.mxu1 }
  0xf9   : > { %v1283_v34 = vpop.f32.mrf.mxu2 }
  0xfa   : > { %v1244_v32 = vpop.f32.mrf.mxu3  ;;  %v1284_v37 = vadd.f32 %v1283_v34, %v4682_v31  ;;  %v1259_v39 = vpop.f32.mrf.mxu0 }
  0xfb   : > { %v1245_v33 = vadd.f32 %v1244_v32, %v4567_v27 }
  0xfc   : > { %v1296_v40 = vpop.f32.mrf.mxu1 }
  0xfd   : > { %v1258_v38 = vadd.f32 %v1257_v8, %v1245_v33  ;;  %v1297_v58 = vadd.f32 %v1296_v40, %v1284_v37  ;;  %v2008_v37 = vperm.slane %v2004_v1, 2 }
  0xff   : > { %v1271_v10 = vadd.f32 %v1270_v29, %v1258_v38 }
 0x101   : > { %v1285_v42 = vpop.f32.mrf.mxu2 }
 0x102   : > { %v1246_v41 = vpop.f32.mrf.mxu3 }
 0x103   : > { %v2009_v41 = vperm.slane %v2004_v1, 3 }
 0x104   : > { %v1298_v43 = vpop.f32.mrf.mxu1 }
 0x109   : > { %v1348_v45 = vpop.f32.mrf.mxu2 }
 0x10a   : > { %v1309_v36 = vpop.f32.mrf.mxu3 }
 0x10b   : > { %v1310_v44 = vadd.f32 %v1309_v36, %v1297_v58 }
 0x111   : > { %v1350_v35 = vpop.f32.mrf.mxu2 }
 0x112   : > { %v1322_v46 = vpop.f32.mrf.mxu0  ;;  %v1311_v48 = vpop.f32.mrf.mxu3 }
 0x113   : > { %v1323_v47 = vadd.f32 %v1322_v46, %v830_v22 }
 0x11a   : > { %v1324_v49 = vpop.f32.mrf.mxu0 }
 0x11e   : > { %v1361_v31 = vpop.f32.mrf.mxu1 }
 0x11f   : > { %v1362_v53 = vadd.f32 %v1361_v31, %v869_v23 }
 0x121   : > { %v1374_v51 = vpop.f32.mrf.mxu2 }
 0x122   : > { %v1335_v27 = vpop.f32.mrf.mxu3  ;;  %v1375_v54 = vadd.f32 %v1374_v51, %v1362_v53  ;;  %v1387_v55 = vpop.f32.mrf.mxu0 }
 0x123   : > { %v1336_v50 = vadd.f32 %v1335_v27, %v1323_v47 }
 0x125   : > { %v1349_v52 = vadd.f32 %v1348_v45, %v1336_v50 }
 0x126   : > { %v1363_v59 = vpop.f32.mrf.mxu1 }
 0x129   : > { %v1376_v57 = vpop.f32.mrf.mxu2 }
 0x12a   : > { %v1337_v56 = vpop.f32.mrf.mxu3  ;;  %v1389_v60 = vpop.f32.mrf.mxu0 }
 0x12e   : > { %v1879_v61 = vpop.f32.mrf.mxu1 }
 0x136   : > { %v1881_v63 = vpop.f32.mrf.mxu1 }
 0x13a   : > { %v1866_v62 = vpop.f32.mrf.mxu0 }
 0x141   : > { %v1892_v3 = vpop.f32.mrf.mxu2 }
 0x142   : > { %v1853_v0 = vpop.f32.mrf.mxu3  ;;  %v1868_v7 = vpop.f32.mrf.mxu0 }
 0x143   : > { %v1867_v2 = vadd.f32 %v1866_v62, %v1853_v0 }
 0x144   : > { %v1905_v9 = vpop.f32.mrf.mxu1 }
 0x145   : > { %v1880_v5 = vadd.f32 %v1879_v61, %v1867_v2  ;;  %v1906_v17 = vadd.f32 %v1905_v9, %v1892_v3 }
 0x147   : > { %v2000_v28 = vadd.f32 %v1880_v5, %v1271_v10  ;;  %v1388_v10 = vadd.f32 %v1387_v55, %v1375_v54 }
 0x149   : > { %v2014_v11 = vadd.f32 %v2006_v6, %v2000_v28  ;;  %v1894_v14 = vpop.f32.mrf.mxu2 }
 0x14a   : > { %v1855_v12 = vpop.f32.mrf.mxu3 }
 0x14b   : > { %v2018_v13 = vmax.f32 %v2014_v11, 0.0 }
 0x14c   : > { %v1907_v15 = vpop.f32.mrf.mxu1 }
 0x14d   : > { %2022 = vst [vmem:[%s4776_s9] sm:$0x7f] %v2018_v13 }
 0x151   : > { %v1957_v20 = vpop.f32.mrf.mxu2 }
 0x152   : > { %v1918_v18 = vpop.f32.mrf.mxu3 }
 0x153   : > { %v1919_v4 = vadd.f32 %v1918_v18, %v1906_v17 }
 0x155   : > { %v2001_v21 = vadd.f32 %v1919_v4, %v1310_v44 }
 0x157   : > { %v2015_v22 = vadd.f32 %v2007_v19, %v2001_v21 }
 0x159   : > { %v2019_v16 = vmax.f32 %v2015_v22, 0.0  ;;  %v1959_v25 = vpop.f32.mrf.mxu2 }
 0x15a   : > { %v1931_v23 = vpop.f32.mrf.mxu0  ;;  %v1920_v24 = vpop.f32.mrf.mxu3 }
 0x15b   : > { %2023 = vst [vmem:[%s4776_s9 + $0x8] sm:$0x7f] %v2019_v16 }
 0x162   : > { %v1933_v26 = vpop.f32.mrf.mxu0 }
 0x164   : > { %v1970_v8 = vpop.f32.mrf.mxu1 }
 0x169   : > { %v1983_v32 = vpop.f32.mrf.mxu2 }
 0x16a   : > { %v1944_v29 = vpop.f32.mrf.mxu3  ;;  %v1984_v33 = vadd.f32 %v1983_v32, %v1970_v8  ;;  %v1996_v39 = vpop.f32.mrf.mxu0 }
 0x16b   : > { %v1945_v30 = vadd.f32 %v1944_v29, %v1931_v23 }
 0x16c   : > { %v1997_v40 = vadd.f32 %v1996_v39, %v1984_v33  ;;  %v1972_v36 = vpop.f32.mrf.mxu1 }
 0x16d   : > { %v1958_v34 = vadd.f32 %v1957_v20, %v1945_v30 }
 0x16e   : > { %v2003_v42 = vadd.f32 %v1997_v40, %v1388_v10 }
 0x16f   : > { %v2002_v38 = vadd.f32 %v1958_v34, %v1349_v52 }
 0x170   : > { %v2017_v46 = vadd.f32 %v2009_v41, %v2003_v42 }
 0x171   : > { %v2016_v58 = vadd.f32 %v2008_v37, %v2002_v38  ;;  %v1985_v45 = vpop.f32.mrf.mxu2 }
 0x172   : > { %v1946_v43 = vpop.f32.mrf.mxu3  ;;  %v2021_v47 = vmax.f32 %v2017_v46, 0.0  ;;  %v1998_v48 = vpop.f32.mrf.mxu0 }
 0x173   : > { %v2020_v44 = vmax.f32 %v2016_v58, 0.0 }
 0x174   : > { %2026 = vst.msk [vmem:[%s4776_s9 + $0x18] sm:$0x7f] %vm2025_vm1, %v2021_v47 }
 0x175   : > { %2024 = vst [vmem:[%s4776_s9 + $0x10] sm:$0x7f] %v2020_v44 }
 0x176 PF: > { %s13_s12 = sadd.s32 1, %s3344_s12  }
 0x177   : > { %p10_p4 = scmp.ge.s32.totalorder %s13_s12, 4  }
 0x179   :  { %12 = sbr.rel (!%p10_p4) target bundleno = 1 (0x1), region = 64 }

// kernel: cnn_forward.11
= control target key start
LH: loop header
LB: loop body
LE: loop exit
PB: predicated region body
PF: predicated region fallthrough
CT: control target
= control target key end

     0   :  { %s3892_s0 = inlined_call_operand.vmem [shape: f32[2,3136], index: 0, kind: input, shape index: {}]   ;;  %s3893_s1 = inlined_call_operand.vmem [shape: bf16[3136,128], index: 1, kind: input, shape index: {}]   ;;  %s3894_s2 = inlined_call_operand.vmem [shape: f32[1,128], index: 2, kind: input, shape index: {}]   ;;  %s3895_s3 = inlined_call_operand.vmem [shape: bf16[128,10], index: 3, kind: input, shape index: {}]   ;;  %s3896_s4 = inlined_call_operand.vmem [shape: f32[1,10], index: 4, kind: input, shape index: {}]   ;;  %s3897_s5 = inlined_call_operand.hbm [shape: f32[2,10], index: 5, kind: output, shape index: {}]  }
   0x1   :  { %v2945_v0 = vld [vmem:[%s3893_s1 + $0x38] sm:$0xff]  ;;  %v2944_v4 = vld [vmem:[%s3893_s1 + $0x30] sm:$0xff]  ;;  %v2943_v8 = vld [vmem:[%s3893_s1 + $0x28] sm:$0xff] }
   0x2   :  { %v2961_v1 = vld [vmem:[%s3893_s1 + $0xb8] sm:$0xff]  ;;  %1695 = vmatpush.bf16.msra.mxu0 %v2945_v0  ;;  %v2960_v5 = vld [vmem:[%s3893_s1 + $0xb0] sm:$0xff]  ;;  %v2959_v9 = vld [vmem:[%s3893_s1 + $0xa8] sm:$0xff] }
   0x3   :  { %v2969_v2 = vld [vmem:[%s3893_s1 + $0xf8] sm:$0xff]  ;;  %1721 = vmatpush.bf16.msra.mxu2 %v2961_v1  ;;  %v2968_v6 = vld [vmem:[%s3893_s1 + $0xf0] sm:$0xff]  ;;  %v2967_v10 = vld [vmem:[%s3893_s1 + $0xe8] sm:$0xff] }
   0x4   :  { %v2953_v3 = vld [vmem:[%s3893_s1 + $0x78] sm:$0xff]  ;;  %1734 = vmatpush.bf16.msra.mxu3 %v2969_v2  ;;  %v2952_v7 = vld [vmem:[%s3893_s1 + $0x70] sm:$0xff]  ;;  %v2951_v11 = vld [vmem:[%s3893_s1 + $0x68] sm:$0xff] }
   0x5   :  { %1708 = vmatpush.bf16.msra.mxu1 %v2953_v3  ;;  %v2942_v12 = vld [vmem:[%s3893_s1 + $0x20] sm:$0xff]  ;;  %v2941_v16 = vld [vmem:[%s3893_s1 + $0x18] sm:$0xff]  ;;  %v2940_v21 = vld [vmem:[%s3893_s1 + $0x10] sm:$0xff] }
   0x6   :  { %1696 = vmatpush.bf16.msra.mxu0 %v2944_v4  ;;  %v2958_v13 = vld [vmem:[%s3893_s1 + $0xa0] sm:$0xff]  ;;  %v2957_v17 = vld [vmem:[%s3893_s1 + $0x98] sm:$0xff]  ;;  %v2956_v22 = vld [vmem:[%s3893_s1 + $0x90] sm:$0xff] }
   0x7   :  { %1722 = vmatpush.bf16.msra.mxu2 %v2960_v5  ;;  %v2966_v14 = vld [vmem:[%s3893_s1 + $0xe0] sm:$0xff]  ;;  %v2965_v18 = vld [vmem:[%s3893_s1 + $0xd8] sm:$0xff]  ;;  %v2964_v23 = vld [vmem:[%s3893_s1 + $0xd0] sm:$0xff] }
   0x8   :  { %1735 = vmatpush.bf16.msra.mxu3 %v2968_v6  ;;  %v2950_v15 = vld [vmem:[%s3893_s1 + $0x60] sm:$0xff]  ;;  %v2949_v19 = vld [vmem:[%s3893_s1 + $0x58] sm:$0xff]  ;;  %v2948_v24 = vld [vmem:[%s3893_s1 + $0x50] sm:$0xff] }
   0x9   :  { %1709 = vmatpush.bf16.msra.mxu1 %v2952_v7  ;;  %v22_v20 = vld [vmem:[%s3892_s0] sm:$0xff] }
   0xa   :  { %1697 = vmatpush.bf16.msra.mxu0 %v2943_v8  ;;  %36 = vst [vmem:[#allocation1] ss:$4 sm:$0xff] %v22_v20 }
   0xb   :  { %1723 = vmatpush.bf16.msra.mxu2 %v2959_v9 }
   0xc   :  { %1736 = vmatpush.bf16.msra.mxu3 %v2967_v10 }
   0xd   :  { %1710 = vmatpush.bf16.msra.mxu1 %v2951_v11 }
   0xe   :  { %1698 = vmatpush.bf16.msra.mxu0 %v2942_v12 }
   0xf   :  { %1724 = vmatpush.bf16.msra.mxu2 %v2958_v13 }
  0x10   :  { %1737 = vmatpush.bf16.msra.mxu3 %v2966_v14 }
  0x11   :  { %1711 = vmatpush.bf16.msra.mxu1 %v2950_v15 }
  0x12   :  { %1699 = vmatpush.bf16.msra.mxu0 %v2941_v16 }
  0x13   :  { %1725 = vmatpush.bf16.msra.mxu2 %v2957_v17 }
  0x14   :  { %1738 = vmatpush.bf16.msra.mxu3 %v2965_v18 }
  0x15   :  { %1712 = vmatpush.bf16.msra.mxu1 %v2949_v19 }
  0x16   :  { %10 = vsyncpa [#allocation3], 0  ;;  %1700 = vmatpush.bf16.msra.mxu0 %v2940_v21  ;;  %v2939_v25 = vld [vmem:[%s3893_s1 + $0x8] sm:$0xff]  ;;  %v2938_v29 = vld [vmem:[%s3893_s1] sm:$0xff]  ;;  %vm1691_vm0 = vcmask 523264   ;;  %s3171_s11 = smov [#allocation2]  }
  0x17   :  { %1726 = vmatpush.bf16.msra.mxu2 %v2956_v22  ;;  %v2955_v26 = vld [vmem:[%s3893_s1 + $0x88] sm:$0xff]  ;;  %v2954_v30 = vld [vmem:[%s3893_s1 + $0x80] sm:$0xff]  ;;  %v24_v31 = vld [vmem:[%s3892_s0 + $0x10] sm:$0xff]  ;;  %s2110_s12 = sshll.u32 %s3171_s11, 4  ;;  %s2112_s15 = sshll.u32 %s3897_s5, 4  ;;  %vm2103_vm1 = vcmask 74752   ;;  %s2111_s12 = int_to_ptr.vmem [resolvable:$true] %s2110_s12  ;;  %s2113_s15 = int_to_ptr.hbm [resolvable:$true] %s2112_s15 }
  0x18   :  { %1739 = vmatpush.bf16.msra.mxu3 %v2964_v23  ;;  %v2963_v27 = vld [vmem:[%s3893_s1 + $0xc8] sm:$0xff]  ;;  %v41_v32 = vld.sshfl [vmem:[#allocation1 + $0x10] sm:$0xff pattern:$0x73625140]  ;;  %v2962_v36 = vld [vmem:[%s3893_s1 + $0xc0] sm:$0xff] }
  0x19   :  { %1713 = vmatpush.bf16.msra.mxu1 %v2948_v24  ;;  %v2947_v28 = vld [vmem:[%s3893_s1 + $0x48] sm:$0xff]  ;;  %v39_v33 = vld.sshfl [vmem:[#allocation1] sm:$0xff pattern:$0x73625140]  ;;  %v2977_v37 = vld [vmem:[%s3893_s1 + $0x138] sm:$0xff]  ;;  %v96_v41 = vpack.c.bf16 %v41_v32, %v41_v32 }
  0x1a   :  { %1701 = vmatpush.bf16.msra.mxu0 %v2939_v25  ;;  %v42_v34 = vld.sshfl [vmem:[#allocation1 + $0x18] sm:$0xff pattern:$0x73625140]  ;;  %v40_v35 = vld.sshfl [vmem:[#allocation1 + $0x8] sm:$0xff pattern:$0x73625140]  ;;  %v94_v44 = vpack.c.bf16 %v39_v33, %v39_v33 }
  0x1b   :  { %1727 = vmatpush.bf16.msra.mxu2 %v2955_v26  ;;  %47 = vst [vmem:[#allocation1] ss:$4 sm:$0xff] %v24_v31  ;;  %v2993_v38 = vld [vmem:[%s3893_s1 + $0x1b8] sm:$0xff]  ;;  %v2946_v40 = vld [vmem:[%s3893_s1 + $0x40] sm:$0xff]  ;;  %v23_v42 = vld [vmem:[%s3892_s0 + $0x8] sm:$0xff]  ;;  %v97_v46 = vpack.c.bf16 %v42_v34, %v42_v34  ;;  %v95_v49 = vpack.c.bf16 %v40_v35, %v40_v35 }
  0x1c   :  { %1740 = vmatpush.bf16.msra.mxu3 %v2963_v27  ;;  %v3001_v39 = vld [vmem:[%s3893_s1 + $0x1f8] sm:$0xff]  ;;  %38 = vst [vmem:[#allocation1 + $0x20] ss:$4 sm:$0xff] %v23_v42  ;;  %v2976_v45 = vld [vmem:[%s3893_s1 + $0x130] sm:$0xff]  ;;  %v2975_v51 = vld [vmem:[%s3893_s1 + $0x128] sm:$0xff] }
  0x1d   :  { %1714 = vmatpush.bf16.msra.mxu1 %v2947_v28  ;;  %v2985_v43 = vld [vmem:[%s3893_s1 + $0x178] sm:$0xff]  ;;  %v2992_v47 = vld [vmem:[%s3893_s1 + $0x1b0] sm:$0xff]  ;;  %v2991_v52 = vld [vmem:[%s3893_s1 + $0x1a8] sm:$0xff] }
  0x1e   :  { %1702 = vmatpush.bf16.msra.mxu0 %v2938_v29  ;;  %v3000_v48 = vld [vmem:[%s3893_s1 + $0x1f0] sm:$0xff]  ;;  %v2999_v53 = vld [vmem:[%s3893_s1 + $0x1e8] sm:$0xff]  ;;  %v2974_v56 = vld [vmem:[%s3893_s1 + $0x120] sm:$0xff] }
  0x1f   :  { %1728 = vmatpush.bf16.msra.mxu2 %v2954_v30  ;;  %v2984_v50 = vld [vmem:[%s3893_s1 + $0x170] sm:$0xff]  ;;  %v2983_v54 = vld [vmem:[%s3893_s1 + $0x168] sm:$0xff]  ;;  %v25_v58 = vld [vmem:[%s3892_s0 + $0x18] sm:$0xff] }
  0x20   :  { %1741 = vmatpush.bf16.msra.mxu3 %v2962_v36  ;;  %v2990_v61 = vld [vmem:[%s3893_s1 + $0x1a0] sm:$0xff]  ;;  %v2973_v0 = vld [vmem:[%s3893_s1 + $0x118] sm:$0xff]  ;;  %v2972_v4 = vld [vmem:[%s3893_s1 + $0x110] sm:$0xff] }
  0x21   :  { %1715 = vmatpush.bf16.msra.mxu1 %v2946_v40  ;;  %1703 = vmatmul.bf16.vlgmr.msra.gmra.mxu0 %v94_v44  ;;  %v2998_v62 = vld [vmem:[%s3893_s1 + $0x1e0] sm:$0xff]  ;;  %v2989_v1 = vld [vmem:[%s3893_s1 + $0x198] sm:$0xff]  ;;  %v2988_v5 = vld [vmem:[%s3893_s1 + $0x190] sm:$0xff] }
  0x22   :  { %1747 = vmatpush.bf16.msrb.mxu0 %v2977_v37  ;;  %1729 = vmatmul.bf16.vlgmr.msra.gmra.mxu2 %v96_v41  ;;  %v2982_v63 = vld [vmem:[%s3893_s1 + $0x160] sm:$0xff]  ;;  %v2997_v2 = vld [vmem:[%s3893_s1 + $0x1d8] sm:$0xff]  ;;  %v2996_v6 = vld [vmem:[%s3893_s1 + $0x1d0] sm:$0xff] }
  0x23   :  { %1773 = vmatpush.bf16.msrb.mxu2 %v2993_v38  ;;  %1742 = vmatmul.bf16.vlgmr.msra.gmra.mxu3 %v97_v46  ;;  %v3343_v55 = vld.sshfl [vmem:[#allocation1 + $0x30] sm:$0xff pattern:$0x73625140]  ;;  %v3348_v57 = vld.sshfl [vmem:[#allocation1 + $0x20] sm:$0xff pattern:$0x73625140] }
  0x24   :  { %1786 = vmatpush.bf16.msrb.mxu3 %v3001_v39  ;;  %1716 = vmatmul.bf16.vlgmr.msra.gmra.mxu1 %v95_v49  ;;  %v3353_v59 = vld.sshfl [vmem:[#allocation1 + $0x38] sm:$0xff pattern:$0x73625140]  ;;  %v3355_v60 = vld.sshfl [vmem:[#allocation1 + $0x28] sm:$0xff pattern:$0x73625140]  ;;  %v100_v20 = vpack.c.bf16 %v3343_v55, %v3343_v55  ;;  %v98_v22 = vpack.c.bf16 %v3348_v57, %v3348_v57 }
  0x25   :  { %1760 = vmatpush.bf16.msrb.mxu1 %v2985_v43  ;;  %48 = vst [vmem:[#allocation1 + $0x20] ss:$4 sm:$0xff] %v25_v58  ;;  %v2981_v3 = vld [vmem:[%s3893_s1 + $0x158] sm:$0xff]  ;;  %v2980_v7 = vld [vmem:[%s3893_s1 + $0x150] sm:$0xff]  ;;  %v2971_v8 = vld [vmem:[%s3893_s1 + $0x108] sm:$0xff]  ;;  %v101_v23 = vpack.c.bf16 %v3353_v59, %v3353_v59  ;;  %v99_v27 = vpack.c.bf16 %v3355_v60, %v3355_v60 }
  0x26   :  { %1748 = vmatpush.bf16.msrb.mxu0 %v2976_v45  ;;  %v2987_v9 = vld [vmem:[%s3893_s1 + $0x188] sm:$0xff]  ;;  %v2970_v12 = vld [vmem:[%s3893_s1 + $0x100] sm:$0xff]  ;;  %v3009_v15 = vld [vmem:[%s3893_s1 + $0x238] sm:$0xff] }
  0x27   :  { %1774 = vmatpush.bf16.msrb.mxu2 %v2992_v47  ;;  %v2995_v10 = vld [vmem:[%s3893_s1 + $0x1c8] sm:$0xff]  ;;  %v2986_v13 = vld [vmem:[%s3893_s1 + $0x180] sm:$0xff]  ;;  %v3025_v16 = vld [vmem:[%s3893_s1 + $0x2b8] sm:$0xff] }
  0x28   :  { %1787 = vmatpush.bf16.msrb.mxu3 %v3000_v48  ;;  %v2979_v11 = vld [vmem:[%s3893_s1 + $0x148] sm:$0xff]  ;;  %v2994_v14 = vld [vmem:[%s3893_s1 + $0x1c0] sm:$0xff]  ;;  %v3033_v17 = vld [vmem:[%s3893_s1 + $0x2f8] sm:$0xff] }
  0x29   :  { %1761 = vmatpush.bf16.msrb.mxu1 %v2984_v50  ;;  %v2978_v18 = vld [vmem:[%s3893_s1 + $0x140] sm:$0xff]  ;;  %v3017_v19 = vld [vmem:[%s3893_s1 + $0x278] sm:$0xff]  ;;  %v3008_v21 = vld [vmem:[%s3893_s1 + $0x230] sm:$0xff] }
  0x2a   :  { %1749 = vmatpush.bf16.msrb.mxu0 %v2975_v51  ;;  %v3024_v24 = vld [vmem:[%s3893_s1 + $0x2b0] sm:$0xff]  ;;  %v3441_v26 = vld.sshfl [vmem:[#allocation1] sm:$0xff pattern:$0x73625140]  ;;  %v3007_v33 = vld [vmem:[%s3893_s1 + $0x228] sm:$0xff] }
  0x2b   :  { %1775 = vmatpush.bf16.msrb.mxu2 %v2991_v52  ;;  %v3032_v25 = vld [vmem:[%s3893_s1 + $0x2f0] sm:$0xff]  ;;  %v3447_v29 = vld.sshfl [vmem:[#allocation1 + $0x8] sm:$0xff pattern:$0x73625140]  ;;  %v26_v31 = vld [vmem:[%s3892_s0 + $0x20] sm:$0xff]  ;;  %v102_v60 = vpack.c.bf16 %v3441_v26, %v3441_v26 }
  0x2c   :  { %1788 = vmatpush.bf16.msrb.mxu3 %v2999_v53  ;;  %v3445_v28 = vld.sshfl [vmem:[#allocation1 + $0x10] sm:$0xff pattern:$0x73625140]  ;;  %v3455_v32 = vld.sshfl [vmem:[#allocation1 + $0x18] sm:$0xff pattern:$0x73625140] }
  0x2d   :  { %1762 = vmatpush.bf16.msrb.mxu1 %v2983_v54  ;;  %v3016_v30 = vld [vmem:[%s3893_s1 + $0x270] sm:$0xff]  ;;  %57 = vst [vmem:[#allocation1] ss:$4 sm:$0xff] %v26_v31  ;;  %v3023_v34 = vld [vmem:[%s3893_s1 + $0x2a8] sm:$0xff]  ;;  %v3006_v37 = vld [vmem:[%s3893_s1 + $0x220] sm:$0xff] }
  0x2e   :  { %1750 = vmatpush.bf16.msrb.mxu0 %v2974_v56  ;;  %v3031_v35 = vld [vmem:[%s3893_s1 + $0x2e8] sm:$0xff]  ;;  %v3022_v38 = vld [vmem:[%s3893_s1 + $0x2a0] sm:$0xff]  ;;  %v3005_v41 = vld [vmem:[%s3893_s1 + $0x218] sm:$0xff] }
  0x2f   :  { %1776 = vmatpush.bf16.msrb.mxu2 %v2990_v61  ;;  %v3015_v36 = vld [vmem:[%s3893_s1 + $0x268] sm:$0xff]  ;;  %v3030_v39 = vld [vmem:[%s3893_s1 + $0x2e0] sm:$0xff]  ;;  %v3021_v42 = vld [vmem:[%s3893_s1 + $0x298] sm:$0xff]  ;;  %v104_v61 = vpack.c.bf16 %v3445_v28, %v3445_v28 }
  0x30   :  { %1789 = vmatpush.bf16.msrb.mxu3 %v2998_v62  ;;  %v3014_v40 = vld [vmem:[%s3893_s1 + $0x260] sm:$0xff]  ;;  %v3029_v43 = vld [vmem:[%s3893_s1 + $0x2d8] sm:$0xff]  ;;  %v3004_v45 = vld [vmem:[%s3893_s1 + $0x210] sm:$0xff] }
  0x31   :  { %1763 = vmatpush.bf16.msrb.mxu1 %v2982_v63  ;;  %v3013_v44 = vld [vmem:[%s3893_s1 + $0x258] sm:$0xff]  ;;  %v3020_v46 = vld [vmem:[%s3893_s1 + $0x290] sm:$0xff]  ;;  %v3003_v49 = vld [vmem:[%s3893_s1 + $0x208] sm:$0xff]  ;;  %v105_v63 = vpack.c.bf16 %v3455_v32, %v3455_v32 }
  0x32   :  { %1751 = vmatpush.bf16.msrb.mxu0 %v2973_v0  ;;  %v3028_v47 = vld [vmem:[%s3893_s1 + $0x2d0] sm:$0xff]  ;;  %v3019_v50 = vld [vmem:[%s3893_s1 + $0x288] sm:$0xff]  ;;  %v3002_v53 = vld [vmem:[%s3893_s1 + $0x200] sm:$0xff] }
  0x33   :  { %1777 = vmatpush.bf16.msrb.mxu2 %v2989_v1  ;;  %v3012_v48 = vld [vmem:[%s3893_s1 + $0x250] sm:$0xff]  ;;  %v3027_v51 = vld [vmem:[%s3893_s1 + $0x2c8] sm:$0xff]  ;;  %v3018_v54 = vld [vmem:[%s3893_s1 + $0x280] sm:$0xff] }
  0x34   :  { %1790 = vmatpush.bf16.msrb.mxu3 %v2997_v2  ;;  %v3011_v52 = vld [vmem:[%s3893_s1 + $0x248] sm:$0xff]  ;;  %v3026_v55 = vld [vmem:[%s3893_s1 + $0x2c0] sm:$0xff]  ;;  %v3041_v56 = vld [vmem:[%s3893_s1 + $0x338] sm:$0xff] }
  0x35   :  { %1764 = vmatpush.bf16.msrb.mxu1 %v2981_v3  ;;  %v3057_v57 = vld [vmem:[%s3893_s1 + $0x3b8] sm:$0xff]  ;;  %v3010_v59 = vld [vmem:[%s3893_s1 + $0x240] sm:$0xff]  ;;  %v3040_v0 = vld [vmem:[%s3893_s1 + $0x330] sm:$0xff]  ;;  %v103_v3 = vpack.c.bf16 %v3447_v29, %v3447_v29 }
  0x36   :  { %1752 = vmatpush.bf16.msrb.mxu0 %v2972_v4  ;;  %v3065_v58 = vld [vmem:[%s3893_s1 + $0x3f8] sm:$0xff]  ;;  %v3056_v1 = vld [vmem:[%s3893_s1 + $0x3b0] sm:$0xff]  ;;  %v3553_v2 = vld.sshfl [vmem:[#allocation1 + $0x20] sm:$0xff pattern:$0x73625140] }
  0x37   :  { %1778 = vmatpush.bf16.msrb.mxu2 %v2988_v5  ;;  %v3049_v62 = vld [vmem:[%s3893_s1 + $0x378] sm:$0xff]  ;;  %v3557_v4 = vld.sshfl [vmem:[#allocation1 + $0x30] sm:$0xff pattern:$0x73625140]  ;;  %v3035_v26 = vld [vmem:[%s3893_s1 + $0x308] sm:$0xff] }
  0x38   :  { %1791 = vmatpush.bf16.msrb.mxu3 %v2996_v6  ;;  %v3559_v5 = vld.sshfl [vmem:[#allocation1 + $0x28] sm:$0xff pattern:$0x73625140]  ;;  %v3064_v6 = vld [vmem:[%s3893_s1 + $0x3f0] sm:$0xff]  ;;  %v3050_v31 = vld [vmem:[%s3893_s1 + $0x380] sm:$0xff] }
  0x39   :  { %1765 = vmatpush.bf16.msrb.mxu1 %v2980_v7  ;;  %v27_v7 = vld [vmem:[%s3892_s0 + $0x28] sm:$0xff]  ;;  %v3073_v32 = vld [vmem:[%s3893_s1 + $0x438] sm:$0xff] }
  0x3a   :  { %1753 = vmatpush.bf16.msrb.mxu0 %v2971_v8  ;;  %v3567_v8 = vld.sshfl [vmem:[#allocation1 + $0x38] sm:$0xff pattern:$0x73625140]  ;;  %v3059_v28 = vld [vmem:[%s3893_s1 + $0x3c8] sm:$0xff] }
  0x3b   :  { %1779 = vmatpush.bf16.msrb.mxu2 %v2987_v9  ;;  %v3048_v9 = vld [vmem:[%s3893_s1 + $0x370] sm:$0xff]  ;;  %58 = vst [vmem:[#allocation1 + $0x20] ss:$4 sm:$0xff] %v27_v7  ;;  %v3043_v29 = vld [vmem:[%s3893_s1 + $0x348] sm:$0xff]  ;;  %v3105_v7 = vld [vmem:[%s3893_s1 + $0x538] sm:$0xff] }
  0x3c   :  { %1792 = vmatpush.bf16.msrb.mxu3 %v2995_v10  ;;  %v3039_v10 = vld [vmem:[%s3893_s1 + $0x328] sm:$0xff] }
  0x3d   :  { %1766 = vmatpush.bf16.msrb.mxu1 %v2979_v11  ;;  %v3055_v11 = vld [vmem:[%s3893_s1 + $0x3a8] sm:$0xff] }
  0x3e   :  { %1754 = vmatpush.bf16.msrb.mxu0 %v2970_v12  ;;  %v3063_v12 = vld [vmem:[%s3893_s1 + $0x3e8] sm:$0xff] }
  0x3f   :  { %1780 = vmatpush.bf16.msrb.mxu2 %v2986_v13  ;;  %v3047_v13 = vld [vmem:[%s3893_s1 + $0x368] sm:$0xff] }
  0x40   :  { %1793 = vmatpush.bf16.msrb.mxu3 %v2994_v14  ;;  %v3038_v14 = vld [vmem:[%s3893_s1 + $0x320] sm:$0xff] }
  0x41   :  { %1767 = vmatpush.bf16.msrb.mxu1 %v2978_v18  ;;  %1755 = vmatmul.bf16.vlgmr.msrb.gmra.mxu0 %v98_v22  ;;  %v3037_v18 = vld [vmem:[%s3893_s1 + $0x318] sm:$0xff]  ;;  %v3036_v22 = vld [vmem:[%s3893_s1 + $0x310] sm:$0xff] }
  0x42   :  { %1799 = vmatpush.bf16.msra.mxu0 %v3009_v15  ;;  %1781 = vmatmul.bf16.vlgmr.msrb.gmra.mxu2 %v100_v20  ;;  %v3054_v15 = vld [vmem:[%s3893_s1 + $0x3a0] sm:$0xff]  ;;  %v3061_v20 = vld [vmem:[%s3893_s1 + $0x3d8] sm:$0xff] }
  0x43   :  { %1825 = vmatpush.bf16.msra.mxu2 %v3025_v16  ;;  %1794 = vmatmul.bf16.vlgmr.msrb.gmra.mxu3 %v101_v23  ;;  %v3062_v16 = vld [vmem:[%s3893_s1 + $0x3e0] sm:$0xff]  ;;  %v3052_v23 = vld [vmem:[%s3893_s1 + $0x390] sm:$0xff] }
  0x44   :  { %1838 = vmatpush.bf16.msra.mxu3 %v3033_v17  ;;  %1768 = vmatmul.bf16.vlgmr.msrb.gmra.mxu1 %v99_v27  ;;  %v3046_v17 = vld [vmem:[%s3893_s1 + $0x360] sm:$0xff]  ;;  %v3051_v27 = vld [vmem:[%s3893_s1 + $0x388] sm:$0xff] }
  0x45   :  { %1812 = vmatpush.bf16.msra.mxu1 %v3017_v19  ;;  %v3053_v19 = vld [vmem:[%s3893_s1 + $0x398] sm:$0xff] }
  0x46   :  { %1800 = vmatpush.bf16.msra.mxu0 %v3008_v21  ;;  %v3045_v21 = vld [vmem:[%s3893_s1 + $0x358] sm:$0xff] }
  0x47   :  { %1826 = vmatpush.bf16.msra.mxu2 %v3024_v24  ;;  %v3060_v24 = vld [vmem:[%s3893_s1 + $0x3d0] sm:$0xff] }
  0x48   :  { %1839 = vmatpush.bf16.msra.mxu3 %v3032_v25  ;;  %v3044_v25 = vld [vmem:[%s3893_s1 + $0x350] sm:$0xff] }
  0x49   :  { %1813 = vmatpush.bf16.msra.mxu1 %v3016_v30  ;;  %v3034_v30 = vld [vmem:[%s3893_s1 + $0x300] sm:$0xff] }
  0x4a   :  { %1801 = vmatpush.bf16.msra.mxu0 %v3007_v33  ;;  %v3058_v33 = vld [vmem:[%s3893_s1 + $0x3c0] sm:$0xff] }
  0x4b   :  { %1827 = vmatpush.bf16.msra.mxu2 %v3023_v34  ;;  %v3089_v34 = vld [vmem:[%s3893_s1 + $0x4b8] sm:$0xff] }
  0x4c   :  { %1840 = vmatpush.bf16.msra.mxu3 %v3031_v35  ;;  %v3097_v35 = vld [vmem:[%s3893_s1 + $0x4f8] sm:$0xff] }
  0x4d   :  { %1814 = vmatpush.bf16.msra.mxu1 %v3015_v36  ;;  %v3042_v36 = vld [vmem:[%s3893_s1 + $0x340] sm:$0xff] }
  0x4e   :  { %1802 = vmatpush.bf16.msra.mxu0 %v3006_v37  ;;  %v106_v37 = vpack.c.bf16 %v3553_v2, %v3553_v2  ;;  %v3066_v2 = vld [vmem:[%s3893_s1 + $0x400] sm:$0xff] }
  0x4f   :  { %1828 = vmatpush.bf16.msra.mxu2 %v3022_v38  ;;  %v108_v38 = vpack.c.bf16 %v3557_v4, %v3557_v4  ;;  %v3090_v4 = vld [vmem:[%s3893_s1 + $0x4c0] sm:$0xff] }
  0x50   :  { %1841 = vmatpush.bf16.msra.mxu3 %v3030_v39  ;;  %v3081_v39 = vld [vmem:[%s3893_s1 + $0x478] sm:$0xff] }
  0x51   :  { %1815 = vmatpush.bf16.msra.mxu1 %v3014_v40  ;;  %v109_v40 = vpack.c.bf16 %v3567_v8, %v3567_v8  ;;  %v3121_v8 = vld [vmem:[%s3893_s1 + $0x5b8] sm:$0xff] }
  0x52   :  { %1803 = vmatpush.bf16.msra.mxu0 %v3005_v41  ;;  %v107_v41 = vpack.c.bf16 %v3559_v5, %v3559_v5  ;;  %v59_v5 = vld.sshfl [vmem:[#allocation1] sm:$0xff pattern:$0x73625140] }
  0x53   :  { %1829 = vmatpush.bf16.msra.mxu2 %v3021_v42  ;;  %v3072_v42 = vld [vmem:[%s3893_s1 + $0x430] sm:$0xff] }
  0x54   :  { %1842 = vmatpush.bf16.msra.mxu3 %v3029_v43  ;;  %v3088_v43 = vld [vmem:[%s3893_s1 + $0x4b0] sm:$0xff] }
  0x55   :  { %1816 = vmatpush.bf16.msra.mxu1 %v3013_v44  ;;  %v3096_v44 = vld [vmem:[%s3893_s1 + $0x4f0] sm:$0xff] }
  0x56   :  { %1804 = vmatpush.bf16.msra.mxu0 %v3004_v45  ;;  %v3080_v45 = vld [vmem:[%s3893_s1 + $0x470] sm:$0xff] }
  0x57   :  { %1830 = vmatpush.bf16.msra.mxu2 %v3020_v46  ;;  %v3071_v46 = vld [vmem:[%s3893_s1 + $0x428] sm:$0xff] }
  0x58   :  { %1843 = vmatpush.bf16.msra.mxu3 %v3028_v47  ;;  %v3087_v47 = vld [vmem:[%s3893_s1 + $0x4a8] sm:$0xff] }
  0x59   :  { %1817 = vmatpush.bf16.msra.mxu1 %v3012_v48  ;;  %v3095_v48 = vld [vmem:[%s3893_s1 + $0x4e8] sm:$0xff] }
  0x5a   :  { %1805 = vmatpush.bf16.msra.mxu0 %v3003_v49  ;;  %v3079_v49 = vld [vmem:[%s3893_s1 + $0x468] sm:$0xff] }
  0x5b   :  { %1831 = vmatpush.bf16.msra.mxu2 %v3019_v50  ;;  %v3070_v50 = vld [vmem:[%s3893_s1 + $0x420] sm:$0xff] }
  0x5c   :  { %1844 = vmatpush.bf16.msra.mxu3 %v3027_v51  ;;  %v3086_v51 = vld [vmem:[%s3893_s1 + $0x4a0] sm:$0xff] }
  0x5d   :  { %1818 = vmatpush.bf16.msra.mxu1 %v3011_v52  ;;  %v3094_v52 = vld [vmem:[%s3893_s1 + $0x4e0] sm:$0xff] }
  0x5e   :  { %1806 = vmatpush.bf16.msra.mxu0 %v3002_v53  ;;  %v3078_v53 = vld [vmem:[%s3893_s1 + $0x460] sm:$0xff] }
  0x5f   :  { %1832 = vmatpush.bf16.msra.mxu2 %v3018_v54  ;;  %v3069_v54 = vld [vmem:[%s3893_s1 + $0x418] sm:$0xff] }
  0x60   :  { %1845 = vmatpush.bf16.msra.mxu3 %v3026_v55  ;;  %v3085_v55 = vld [vmem:[%s3893_s1 + $0x498] sm:$0xff] }
  0x61   :  { %1819 = vmatpush.bf16.msra.mxu1 %v3010_v59  ;;  %1807 = vmatmul.bf16.vlgmr.msra.gmra.mxu0 %v102_v60  ;;  %v3084_v59 = vld [vmem:[%s3893_s1 + $0x490] sm:$0xff] }
  0x62   :  { %1851 = vmatpush.bf16.msrb.mxu0 %v3041_v56  ;;  %1833 = vmatmul.bf16.vlgmr.msra.gmra.mxu2 %v104_v61  ;;  %v3093_v56 = vld [vmem:[%s3893_s1 + $0x4d8] sm:$0xff]  ;;  %v3092_v60 = vld [vmem:[%s3893_s1 + $0x4d0] sm:$0xff] }
  0x63   :  { %1877 = vmatpush.bf16.msrb.mxu2 %v3057_v57  ;;  %1846 = vmatmul.bf16.vlgmr.msra.gmra.mxu3 %v105_v63  ;;  %v3077_v57 = vld [vmem:[%s3893_s1 + $0x458] sm:$0xff]  ;;  %v3076_v61 = vld [vmem:[%s3893_s1 + $0x450] sm:$0xff]  ;;  %v3083_v63 = vld [vmem:[%s3893_s1 + $0x488] sm:$0xff] }
  0x64   :  { %1890 = vmatpush.bf16.msrb.mxu3 %v3065_v58  ;;  %1820 = vmatmul.bf16.vlgmr.msra.gmra.mxu1 %v103_v3  ;;  %v3068_v58 = vld [vmem:[%s3893_s1 + $0x410] sm:$0xff]  ;;  %v3082_v3 = vld [vmem:[%s3893_s1 + $0x480] sm:$0xff] }
  0x65   :  { %1864 = vmatpush.bf16.msrb.mxu1 %v3049_v62  ;;  %v3067_v62 = vld [vmem:[%s3893_s1 + $0x408] sm:$0xff] }
  0x66   :  { %1852 = vmatpush.bf16.msrb.mxu0 %v3040_v0  ;;  %v3091_v0 = vld [vmem:[%s3893_s1 + $0x4c8] sm:$0xff] }
  0x67   :  { %1878 = vmatpush.bf16.msrb.mxu2 %v3056_v1  ;;  %v3075_v1 = vld [vmem:[%s3893_s1 + $0x448] sm:$0xff] }
  0x68   :  { %1891 = vmatpush.bf16.msrb.mxu3 %v3064_v6  ;;  %v61_v6 = vld.sshfl [vmem:[#allocation1 + $0x10] sm:$0xff pattern:$0x73625140] }
  0x69   :  { %1865 = vmatpush.bf16.msrb.mxu1 %v3048_v9  ;;  %v62_v9 = vld.sshfl [vmem:[#allocation1 + $0x18] sm:$0xff pattern:$0x73625140] }
  0x6a   :  { %1853 = vmatpush.bf16.msrb.mxu0 %v3039_v10  ;;  %v3129_v10 = vld [vmem:[%s3893_s1 + $0x5f8] sm:$0xff] }
  0x6b   :  { %1879 = vmatpush.bf16.msrb.mxu2 %v3055_v11  ;;  %v3074_v11 = vld [vmem:[%s3893_s1 + $0x440] sm:$0xff] }
  0x6c   :  { %1892 = vmatpush.bf16.msrb.mxu3 %v3063_v12  ;;  %v60_v12 = vld.sshfl [vmem:[#allocation1 + $0x8] sm:$0xff pattern:$0x73625140] }
  0x6d   :  { %1866 = vmatpush.bf16.msrb.mxu1 %v3047_v13  ;;  %v110_v13 = vpack.c.bf16 %v59_v5, %v59_v5  ;;  %v3132_v5 = vld [vmem:[%s3893_s1 + $0x610] sm:$0xff] }
  0x6e   :  { %1854 = vmatpush.bf16.msrb.mxu0 %v3038_v14  ;;  %v112_v14 = vpack.c.bf16 %v61_v6, %v61_v6  ;;  %v3131_v6 = vld [vmem:[%s3893_s1 + $0x608] sm:$0xff] }
  0x6f   :  { %1880 = vmatpush.bf16.msrb.mxu2 %v3054_v15  ;;  %v3113_v15 = vld [vmem:[%s3893_s1 + $0x578] sm:$0xff] }
  0x70   :  { %1893 = vmatpush.bf16.msrb.mxu3 %v3062_v16  ;;  %v113_v16 = vpack.c.bf16 %v62_v9, %v62_v9 }
  0x71   :  { %1867 = vmatpush.bf16.msrb.mxu1 %v3046_v17  ;;  %v111_v17 = vpack.c.bf16 %v60_v12, %v60_v12 }
  0x72   :  { %1855 = vmatpush.bf16.msrb.mxu0 %v3037_v18  ;;  %v3104_v18 = vld [vmem:[%s3893_s1 + $0x530] sm:$0xff] }
  0x73   :  { %1881 = vmatpush.bf16.msrb.mxu2 %v3053_v19  ;;  %v3120_v19 = vld [vmem:[%s3893_s1 + $0x5b0] sm:$0xff] }
  0x74   :  { %1894 = vmatpush.bf16.msrb.mxu3 %v3061_v20  ;;  %v3128_v20 = vld [vmem:[%s3893_s1 + $0x5f0] sm:$0xff] }
  0x75   :  { %1868 = vmatpush.bf16.msrb.mxu1 %v3045_v21  ;;  %v3112_v21 = vld [vmem:[%s3893_s1 + $0x570] sm:$0xff] }
  0x76   :  { %1856 = vmatpush.bf16.msrb.mxu0 %v3036_v22  ;;  %v3103_v22 = vld [vmem:[%s3893_s1 + $0x528] sm:$0xff] }
  0x77   :  { %1882 = vmatpush.bf16.msrb.mxu2 %v3052_v23  ;;  %v3119_v23 = vld [vmem:[%s3893_s1 + $0x5a8] sm:$0xff] }
  0x78   :  { %1895 = vmatpush.bf16.msrb.mxu3 %v3060_v24  ;;  %v3127_v24 = vld [vmem:[%s3893_s1 + $0x5e8] sm:$0xff] }
  0x79   :  { %1869 = vmatpush.bf16.msrb.mxu1 %v3044_v25  ;;  %v28_v25 = vld [vmem:[%s3892_s0 + $0x30] sm:$0x3] }
  0x7a   :  { %1857 = vmatpush.bf16.msrb.mxu0 %v3035_v26  ;;  %v3143_v26 = vld [vmem:[%s3894_s2] ss:$0 sm:$0xff]  ;;  %67 = vst [vmem:[#allocation1] ss:$4 sm:$0xff] %v28_v25 }
  0x7b   :  { %1883 = vmatpush.bf16.msrb.mxu2 %v3051_v27  ;;  %v3111_v27 = vld [vmem:[%s3893_s1 + $0x568] sm:$0xff] }
  0x7c   :  { %1896 = vmatpush.bf16.msrb.mxu3 %v3059_v28  ;;  %v3102_v28 = vld [vmem:[%s3893_s1 + $0x520] sm:$0xff] }
  0x7d   :  { %1870 = vmatpush.bf16.msrb.mxu1 %v3043_v29  ;;  %v3118_v29 = vld [vmem:[%s3893_s1 + $0x5a0] sm:$0xff] }
  0x7e   :  { %1858 = vmatpush.bf16.msrb.mxu0 %v3034_v30  ;;  %v3126_v30 = vld [vmem:[%s3893_s1 + $0x5e0] sm:$0xff] }
  0x7f   :  { %1884 = vmatpush.bf16.msrb.mxu2 %v3050_v31 }
  0x80   :  { %1897 = vmatpush.bf16.msrb.mxu3 %v3058_v33  ;;  %v3110_v33 = vld [vmem:[%s3893_s1 + $0x560] sm:$0xff] }
  0x81   :  { %1871 = vmatpush.bf16.msrb.mxu1 %v3042_v36  ;;  %1859 = vmatmul.bf16.vlgmr.msrb.gmra.mxu0 %v106_v37  ;;  %v3117_v36 = vld [vmem:[%s3893_s1 + $0x598] sm:$0xff] }
  0x82   :  { %1903 = vmatpush.bf16.msra.mxu0 %v3073_v32  ;;  %1885 = vmatmul.bf16.vlgmr.msrb.gmra.mxu2 %v108_v38  ;;  %v3125_v37 = vld [vmem:[%s3893_s1 + $0x5d8] sm:$0xff] }
  0x83   :  { %1929 = vmatpush.bf16.msra.mxu2 %v3089_v34  ;;  %1898 = vmatmul.bf16.vlgmr.msrb.gmra.mxu3 %v109_v40  ;;  %v3101_v34 = vld [vmem:[%s3893_s1 + $0x518] sm:$0xff] }
  0x84   :  { %1942 = vmatpush.bf16.msra.mxu3 %v3097_v35  ;;  %1872 = vmatmul.bf16.vlgmr.msrb.gmra.mxu1 %v107_v41  ;;  %v3109_v40 = vld [vmem:[%s3893_s1 + $0x558] sm:$0xff] }
  0x85   :  { %1916 = vmatpush.bf16.msra.mxu1 %v3081_v39 }
  0x86   :  { %1904 = vmatpush.bf16.msra.mxu0 %v3072_v42  ;;  %v3100_v42 = vld [vmem:[%s3893_s1 + $0x510] sm:$0xff] }
  0x87   :  { %1930 = vmatpush.bf16.msra.mxu2 %v3088_v43 }
  0x88   :  { %1943 = vmatpush.bf16.msra.mxu3 %v3096_v44  ;;  %v3116_v44 = vld [vmem:[%s3893_s1 + $0x590] sm:$0xff] }
  0x89   :  { %1917 = vmatpush.bf16.msra.mxu1 %v3080_v45  ;;  %v3124_v45 = vld [vmem:[%s3893_s1 + $0x5d0] sm:$0xff] }
  0x8a   :  { %1905 = vmatpush.bf16.msra.mxu0 %v3071_v46 }
  0x8b   :  { %1931 = vmatpush.bf16.msra.mxu2 %v3087_v47 }
  0x8c   :  { %1944 = vmatpush.bf16.msra.mxu3 %v3095_v48  ;;  %v3108_v48 = vld [vmem:[%s3893_s1 + $0x550] sm:$0xff] }
  0x8d   :  { %1918 = vmatpush.bf16.msra.mxu1 %v3079_v49  ;;  %v3099_v49 = vld [vmem:[%s3893_s1 + $0x508] sm:$0xff] }
  0x8e   :  { %1906 = vmatpush.bf16.msra.mxu0 %v3070_v50 }
  0x8f   :  { %1932 = vmatpush.bf16.msra.mxu2 %v3086_v51  ;;  %v3115_v51 = vld [vmem:[%s3893_s1 + $0x588] sm:$0xff] }
  0x90   :  { %1945 = vmatpush.bf16.msra.mxu3 %v3094_v52  ;;  %v3123_v52 = vld [vmem:[%s3893_s1 + $0x5c8] sm:$0xff] }
  0x91   :  { %1919 = vmatpush.bf16.msra.mxu1 %v3078_v53 }
  0x92   :  { %1907 = vmatpush.bf16.msra.mxu0 %v3069_v54  ;;  %v3107_v54 = vld [vmem:[%s3893_s1 + $0x548] sm:$0xff] }
  0x93   :  { %1933 = vmatpush.bf16.msra.mxu2 %v3085_v55  ;;  %v3098_v55 = vld [vmem:[%s3893_s1 + $0x500] sm:$0xff] }
  0x94   :  { %1946 = vmatpush.bf16.msra.mxu3 %v3093_v56  ;;  %v3114_v56 = vld [vmem:[%s3893_s1 + $0x580] sm:$0xff] }
  0x95   :  { %1920 = vmatpush.bf16.msra.mxu1 %v3077_v57  ;;  %v3122_v57 = vld [vmem:[%s3893_s1 + $0x5c0] sm:$0xff] }
  0x96   :  { %1908 = vmatpush.bf16.msra.mxu0 %v3068_v58  ;;  %v63_v58 = vld.sshfl [vmem:[#allocation1 + $0x20] sm:$0xff pattern:$0x73625140] }
  0x97   :  { %1934 = vmatpush.bf16.msra.mxu2 %v3084_v59 }
  0x98   :  { %1947 = vmatpush.bf16.msra.mxu3 %v3092_v60  ;;  %v65_v60 = vld.sshfl [vmem:[#allocation1 + $0x30] sm:$0xff pattern:$0x73625140] }
  0x99   :  { %1921 = vmatpush.bf16.msra.mxu1 %v3076_v61  ;;  %v66_v61 = vld.sshfl [vmem:[#allocation1 + $0x38] sm:$0xff pattern:$0x73625140] }
  0x9a   :  { %1909 = vmatpush.bf16.msra.mxu0 %v3067_v62  ;;  %v3133_v62 = vld [vmem:[%s3893_s1 + $0x618] sm:$0xff] }
  0x9b   :  { %1935 = vmatpush.bf16.msra.mxu2 %v3083_v63  ;;  %v3106_v63 = vld [vmem:[%s3893_s1 + $0x540] sm:$0xff] }
  0x9c   :  { %1948 = vmatpush.bf16.msra.mxu3 %v3091_v0  ;;  %v114_v0 = vpack.c.bf16 %v63_v58, %v63_v58 }
  0x9d   :  { %1922 = vmatpush.bf16.msra.mxu1 %v3075_v1  ;;  %v64_v1 = vld.sshfl [vmem:[#allocation1 + $0x28] sm:$0xff pattern:$0x73625140] }
  0x9e   :  { %1910 = vmatpush.bf16.msra.mxu0 %v3066_v2  ;;  %v1704_v31 = vpop.f32.mrf.mxu0  ;;  %v116_v2 = vpack.c.bf16 %v65_v60, %v65_v60  ;;  %v3134_v60 = vld [vmem:[%s3895_s3] sm:$0xff] }
  0x9f   :  { %1936 = vmatpush.bf16.msra.mxu2 %v3082_v3  ;;  %v1705_v32 = vadd.f32 %v3143_v26, %v1704_v31  ;;  %v117_v3 = vpack.c.bf16 %v66_v61, %v66_v61 }
  0xa0   :  { %1949 = vmatpush.bf16.msra.mxu3 %v3090_v4  ;;  %v115_v4 = vpack.c.bf16 %v64_v1, %v64_v1 }
  0xa1   :  { %1923 = vmatpush.bf16.msra.mxu1 %v3074_v11  ;;  %1911 = vmatmul.bf16.vlgmr.msra.gmra.mxu0 %v110_v13  ;;  %v1717_v35 = vpop.f32.mrf.mxu1 }
  0xa2   :  { %1955 = vmatpush.bf16.msrb.mxu0 %v3105_v7  ;;  %1937 = vmatmul.bf16.vlgmr.msra.gmra.mxu2 %v112_v14  ;;  %v1718_v38 = vadd.f32 %v1717_v35, %v1705_v32  ;;  %v3130_v7 = vld [vmem:[%s3893_s1 + $0x600] sm:$0xff] }
  0xa3   :  { %1981 = vmatpush.bf16.msrb.mxu2 %v3121_v8  ;;  %1950 = vmatmul.bf16.vlgmr.msra.gmra.mxu3 %v113_v16 }
  0xa4   :  { %1994 = vmatpush.bf16.msrb.mxu3 %v3129_v10  ;;  %1924 = vmatmul.bf16.vlgmr.msra.gmra.mxu1 %v111_v17  ;;  %v68_v10 = vld.sshfl [vmem:[#allocation1] sm:$0xff pattern:$0x73625140] }
  0xa5   :  { %1968 = vmatpush.bf16.msrb.mxu1 %v3113_v15  ;;  %v1730_v39 = vpop.f32.mrf.mxu2  ;;  %v118_v13 = vpack.c.bf16 %v68_v10, %v68_v10 }
  0xa6   :  { %1956 = vmatpush.bf16.msrb.mxu0 %v3104_v18  ;;  %v1731_v41 = vadd.f32 %v1730_v39, %v1718_v38  ;;  %v1743_v43 = vpop.f32.mrf.mxu3  ;;  %v1706_v47 = vpop.f32.mrf.mxu0  ;;  %v3141_v38 = vld [vmem:[%s3895_s3 + $0x38] sm:$0xff] }
  0xa7   :  { %1982 = vmatpush.bf16.msrb.mxu2 %v3120_v19 }
  0xa8   :  { %1995 = vmatpush.bf16.msrb.mxu3 %v3128_v20  ;;  %v1744_v46 = vadd.f32 %v1743_v43, %v1731_v41  ;;  %v3140_v41 = vld [vmem:[%s3895_s3 + $0x30] sm:$0xff] }
  0xa9   :  { %1969 = vmatpush.bf16.msrb.mxu1 %v3112_v21  ;;  %v1719_v50 = vpop.f32.mrf.mxu1 }
  0xaa   :  { %1957 = vmatpush.bf16.msrb.mxu0 %v3103_v22 }
  0xab   :  { %1983 = vmatpush.bf16.msrb.mxu2 %v3119_v23 }
  0xac   :  { %1996 = vmatpush.bf16.msrb.mxu3 %v3127_v24 }
  0xad   :  { %1970 = vmatpush.bf16.msrb.mxu1 %v3111_v27  ;;  %v1732_v53 = vpop.f32.mrf.mxu2 }
  0xae   :  { %1958 = vmatpush.bf16.msrb.mxu0 %v3102_v28  ;;  %v1745_v59 = vpop.f32.mrf.mxu3 }
  0xaf   :  { %1984 = vmatpush.bf16.msrb.mxu2 %v3118_v29 }
  0xb0   :  { %1997 = vmatpush.bf16.msrb.mxu3 %v3126_v30 }
  0xb1   :  { %1971 = vmatpush.bf16.msrb.mxu1 %v3110_v33 }
  0xb2   :  { %1959 = vmatpush.bf16.msrb.mxu0 %v3101_v34 }
  0xb3   :  { %1985 = vmatpush.bf16.msrb.mxu2 %v3117_v36 }
  0xb4   :  { %1998 = vmatpush.bf16.msrb.mxu3 %v3125_v37 }
  0xb5   :  { %1972 = vmatpush.bf16.msrb.mxu1 %v3109_v40 }
  0xb6   :  { %1960 = vmatpush.bf16.msrb.mxu0 %v3100_v42 }
  0xb7   :  { %1986 = vmatpush.bf16.msrb.mxu2 %v3116_v44  ;;  %v3139_v44 = vld [vmem:[%s3895_s3 + $0x28] sm:$0xff] }
  0xb8   :  { %1999 = vmatpush.bf16.msrb.mxu3 %v3124_v45 }
  0xb9   :  { %1973 = vmatpush.bf16.msrb.mxu1 %v3108_v48  ;;  %v3137_v48 = vld [vmem:[%s3895_s3 + $0x18] sm:$0xff] }
  0xba   :  { %1961 = vmatpush.bf16.msrb.mxu0 %v3099_v49 }
  0xbb   :  { %1987 = vmatpush.bf16.msrb.mxu2 %v3115_v51 }
  0xbc   :  { %2000 = vmatpush.bf16.msrb.mxu3 %v3123_v52  ;;  %v3136_v52 = vld [vmem:[%s3895_s3 + $0x10] sm:$0xff] }
  0xbd   :  { %1974 = vmatpush.bf16.msrb.mxu1 %v3107_v54 }
  0xbe   :  { %1962 = vmatpush.bf16.msrb.mxu0 %v3098_v55  ;;  %v1756_v8 = vpop.f32.mrf.mxu0  ;;  %v3135_v55 = vld [vmem:[%s3895_s3 + $0x8] sm:$0xff] }
  0xbf   :  { %1988 = vmatpush.bf16.msrb.mxu2 %v3114_v56  ;;  %v1757_v9 = vadd.f32 %v1756_v8, %v1744_v46  ;;  %v3138_v46 = vld [vmem:[%s3895_s3 + $0x20] sm:$0xff] }
  0xc0   :  { %2001 = vmatpush.bf16.msrb.mxu3 %v3122_v57 }
  0xc1   :  { %1975 = vmatpush.bf16.msrb.mxu1 %v3106_v63  ;;  %1963 = vmatmul.bf16.vlgmr.msrb.gmra.mxu0 %v114_v0  ;;  %v1769_v11 = vpop.f32.mrf.mxu1 }
  0xc2   :  { %2011 = vmatpush.bf16.msra.mxu0 %v3133_v62  ;;  %1989 = vmatmul.bf16.vlgmr.msrb.gmra.mxu2 %v116_v2  ;;  %v1770_v12 = vadd.f32 %v1769_v11, %v1757_v9 }
  0xc3   :  { %2002 = vmatmul.bf16.vlgmr.msrb.gmra.mxu3 %v117_v3 }
  0xc4   :  { %1976 = vmatmul.bf16.vlgmr.msrb.gmra.mxu1 %v115_v4 }
  0xc5   :  { %v1782_v14 = vpop.f32.mrf.mxu2  ;;  %2090 = vmatpush.bf16.msra.mxu1 %v3141_v38 }
  0xc6   :  { %2012 = vmatpush.bf16.msra.mxu0 %v3132_v5  ;;  %v1783_v15 = vadd.f32 %v1782_v14, %v1770_v12  ;;  %v1795_v16 = vpop.f32.mrf.mxu3  ;;  %v1758_v18 = vpop.f32.mrf.mxu0 }
  0xc8   :  { %v1796_v17 = vadd.f32 %v1795_v16, %v1783_v15 }
  0xc9   :  { %v1771_v19 = vpop.f32.mrf.mxu1  ;;  %2091 = vmatpush.bf16.msra.mxu1 %v3140_v41 }
  0xca   :  { %2013 = vmatpush.bf16.msra.mxu0 %v3131_v6  ;;  %v3144_v19 = vld [vmem:[%s3896_s4] ss:$0 sm:$0xff] }
  0xcd   :  { %v1784_v20 = vpop.f32.mrf.mxu2  ;;  %2092 = vmatpush.bf16.msra.mxu1 %v3139_v44 }
  0xce   :  { %2014 = vmatpush.bf16.msra.mxu0 %v3130_v7  ;;  %v1797_v21 = vpop.f32.mrf.mxu3 }
  0xd1   :  { %2905 = vmatmul.msk.bf16.vlgmr.msra.gmra.mxu0 %vm1691_vm0, %v118_v13  ;;  %2093 = vmatpush.bf16.msra.mxu1 %v3138_v46 }
  0xd5   :  { %2094 = vmatpush.bf16.msra.mxu1 %v3137_v48 }
  0xd9   :  { %2095 = vmatpush.bf16.msra.mxu1 %v3136_v52 }
  0xdd   :  { %2096 = vmatpush.bf16.msra.mxu1 %v3135_v55 }
  0xde   :  { %v1808_v22 = vpop.f32.mrf.mxu0 }
  0xdf   :  { %v1809_v23 = vadd.f32 %v1808_v22, %v1796_v17 }
  0xe1   :  { %v1821_v24 = vpop.f32.mrf.mxu1  ;;  %2097 = vmatpush.bf16.msra.mxu1 %v3134_v60 }
  0xe2   :  { %v1822_v25 = vadd.f32 %v1821_v24, %v1809_v23 }
  0xe5   :  { %v1834_v26 = vpop.f32.mrf.mxu2 }
  0xe6   :  { %v1835_v27 = vadd.f32 %v1834_v26, %v1822_v25  ;;  %v1847_v28 = vpop.f32.mrf.mxu3  ;;  %v1810_v29 = vpop.f32.mrf.mxu0 }
  0xe8   :  { %v1848_v30 = vadd.f32 %v1847_v28, %v1835_v27 }
  0xe9   :  { %v1823_v31 = vpop.f32.mrf.mxu1 }
  0xed   :  { %v1836_v32 = vpop.f32.mrf.mxu2 }
  0xee   :  { %v1849_v33 = vpop.f32.mrf.mxu3 }
  0xfe   :  { %v1860_v34 = vpop.f32.mrf.mxu0 }
  0xff   :  { %v1861_v53 = vadd.f32 %v1860_v34, %v1848_v30 }
 0x101   :  { %v1873_v35 = vpop.f32.mrf.mxu1 }
 0x102   :  { %v1874_v56 = vadd.f32 %v1873_v35, %v1861_v53 }
 0x105   :  { %v1886_v36 = vpop.f32.mrf.mxu2 }
 0x106   :  { %v1899_v37 = vpop.f32.mrf.mxu3  ;;  %v1862_v39 = vpop.f32.mrf.mxu0  ;;  %v1887_v59 = vadd.f32 %v1886_v36, %v1874_v56 }
 0x108   :  { %v1900_v61 = vadd.f32 %v1899_v37, %v1887_v59 }
 0x109   :  { %v1875_v40 = vpop.f32.mrf.mxu1 }
 0x10d   :  { %v1888_v42 = vpop.f32.mrf.mxu2 }
 0x10e   :  { %v1901_v43 = vpop.f32.mrf.mxu3 }
 0x11e   :  { %v1912_v45 = vpop.f32.mrf.mxu0 }
 0x11f   :  { %v1913_v62 = vadd.f32 %v1912_v45, %v1900_v61 }
 0x121   :  { %v1925_v47 = vpop.f32.mrf.mxu1 }
 0x122   :  { %v1926_v63 = vadd.f32 %v1925_v47, %v1913_v62 }
 0x125   :  { %v1938_v49 = vpop.f32.mrf.mxu2 }
 0x126   :  { %v1951_v50 = vpop.f32.mrf.mxu3  ;;  %v1914_v51 = vpop.f32.mrf.mxu0  ;;  %v1939_v0 = vadd.f32 %v1938_v49, %v1926_v63 }
 0x128   :  { %v1952_v2 = vadd.f32 %v1951_v50, %v1939_v0 }
 0x129   :  { %v1927_v54 = vpop.f32.mrf.mxu1 }
 0x12d   :  { %v1940_v57 = vpop.f32.mrf.mxu2 }
 0x12e   :  { %v1953_v58 = vpop.f32.mrf.mxu3 }
 0x13e   :  { %v1964_v1 = vpop.f32.mrf.mxu0 }
 0x13f   :  { %v1965_v4 = vadd.f32 %v1964_v1, %v1952_v2 }
 0x141   :  { %v1977_v3 = vpop.f32.mrf.mxu1 }
 0x142   :  { %v1978_v8 = vadd.f32 %v1977_v3, %v1965_v4 }
 0x145   :  { %v1990_v5 = vpop.f32.mrf.mxu2 }
 0x146   :  { %v2003_v6 = vpop.f32.mrf.mxu3  ;;  %v1966_v7 = vpop.f32.mrf.mxu0  ;;  %v1991_v9 = vadd.f32 %v1990_v5, %v1978_v8 }
 0x148   :  { %v2004_v11 = vadd.f32 %v2003_v6, %v1991_v9 }
 0x149   :  { %v1979_v10 = vpop.f32.mrf.mxu1 }
 0x14d   :  { %v1992_v12 = vpop.f32.mrf.mxu2 }
 0x14e   :  { %v2005_v13 = vpop.f32.mrf.mxu3  ;;  %v2016_v14 = vpop.f32.mrf.mxu0 }
 0x14f   :  { %v2017_v15 = vadd.f32 %v2016_v14, %v2004_v11 }
 0x151   :  { %v2020_v16 = vmax.f32 %v2017_v15, 0.0 }
 0x153   :  { %v2021_v17 = vpack.c.bf16 %v2020_v16, %v2020_v16 }
 0x155   :  { %2098 = vmatmul.bf16.vlgmr.msra.gmra.mxu1 %v2021_v17 }
 0x156   :  { %v2018_v18 = vpop.f32.mrf.mxu0 }
 0x1d2   :  { %v2099_v20 = vpop.f32.mrf.mxu1 }
 0x1d3   :  { %v2100_v21 = vadd.f32 %v3144_v19, %v2099_v20 }
 0x1d5   :  { %2104 = vst.msk [vmem:[#allocation2] sm:$0x3] %vm2103_vm1, %v2100_v21 }
 0x1d6   :  { %2115 = dma.vmem_to_hbm [thread:$0]  %s2111_s12, 32, %s2113_s15, [#allocation3]  }
 0x1da   :  { %v2101_v22 = vpop.f32.mrf.mxu1 }
 0x1db   :  { %3169 = dma.done.wait [#allocation3], 32  }
 0x1dc   :  { %3170 = vsyncadd [#allocation3], 4294967264 }
 0x1dd   :  { %2120 = vsyncpa [#allocation3], 1 }

</bundles_post_ra>
